<compile_context>
chip_gen: v7x
topology: tpu7x:2x2x1
jax: 0.10.0
libtpu: 0.0.40
codegen_flags: <defaults>
</compile_context>

<pallas_src>
import functools
import math

import jax
import jax.numpy as jnp
from jax import lax
from jax.experimental import pallas as pl
from jax.experimental.pallas import tpu as pltpu


def _resblock_kernel(xpad_ref, xres_ref, w1_ref, w2_ref, b1_ref, b2_ref,
                     o_ref, act_ref, *, res_scale):
    """One (batch group, row tile) step.

    xpad_ref : (nb, H+4, Wp, C)  bf16  zero-padded input (2 rows / >=1 col pad,
                                       width rounded up to a multiple of 8)
    xres_ref : (nb, TH, W*C)     f32   lane-dense identity for the residual add
    w1/w2    : (3C, 3C)          bf16  rows = (dy, cin), cols = (dx, cout)
    b1/b2    : (1, C)            f32
    o_ref    : (nb, TH, W*C)     f32   lane-dense output block
    act_ref  : (nb, TH+2, Wp, C) bf16  persistent VMEM scratch (conv2 input)
    """
    nb, th, _ = o_ref.shape
    C = xpad_ref.shape[-1]
    Wp = xpad_ref.shape[2]
    W = o_ref.shape[-1] // C
    t = pl.program_id(1)
    last_t = pl.num_programs(1) - 1

    # (TH+4)-row halo'd window of the padded input for this row tile.
    xwin = xpad_ref[:, pl.ds(t * th, th + 4), :, :]           # bf16

    def conv_dyfold(src, w_ref, b_ref, rows):
        # src: (nb, rows+2, Wp, C) bf16 (array or ref).  Fold the 3 dy taps
        # into K=3C, keep the 3 dx taps in the matmul output dim (N=3C) for
        # MXU column fill, then combine the dx partials with 1-column shifts.
        patch = jnp.concatenate(
            [src[:, dy:dy + rows, :, :] for dy in range(3)], axis=-1)
        patch = patch.reshape(nb * rows * Wp, 3 * C)          # bf16
        part = jnp.dot(patch, w_ref[...],
                       preferred_element_type=jnp.float32)    # (M, 3C) f32
        part = part.reshape(nb, rows, Wp, 3 * C)
        out = (part[:, :, 0:W,     0 * C:1 * C] +
               part[:, :, 1:W + 1, 1 * C:2 * C] +
               part[:, :, 2:W + 2, 2 * C:3 * C])
        return out + b_ref[...]                               # (nb, rows, W, C) f32

    # ---- conv1 + LeakyReLU(0.1) on TH+2 rows (1-row halo for conv2) ----
    c1 = conv_dyfold(xwin, w1_ref, b1_ref, th + 2)
    a1 = jnp.where(c1 > 0, c1, 0.1 * c1)                      # f32

    # ---- store bf16 activation into the W-padded persistent scratch ----
    act_ref[:, :, 1:W + 1, :] = a1.astype(jnp.bfloat16)
    # (re)zero the W perimeter every step: perimeter-sized, not area-sized.
    act_ref[:, :, 0:1, :] = jnp.zeros((nb, th + 2, 1, C), jnp.bfloat16)
    act_ref[:, :, W + 1:, :] = jnp.zeros((nb, th + 2, Wp - W - 1, C),
                                         jnp.bfloat16)
    # conv2 zero-pads conv1's output in H: halo rows outside [0, H) -> 0.
    zrow = jnp.zeros((nb, 1, Wp, C), jnp.bfloat16)

    @pl.when(t == 0)
    def _():
        act_ref[:, 0:1, :, :] = zrow

    @pl.when(t == last_t)
    def _():
        act_ref[:, th + 1:th + 2, :, :] = zrow

    # ---- conv2 ----
    c2 = conv_dyfold(act_ref, w2_ref, b2_ref, th)             # (nb, TH, W, C)

    # ---- residual add (f32) + lane-dense store ----
    out = xres_ref[...] + res_scale * c2.reshape(nb, th, W * C)
    o_ref[...] = out.astype(o_ref.dtype)


def _vmem_budget_bytes():
    """~80% of this generation's VMEM (v7x: 64 MiB phys, v5e/v6e: 128 MiB)."""
    try:
        cap = getattr(pltpu.get_tpu_info(), "vmem_capacity_bytes", None)
        if cap:
            return int(cap * 0.8)
    except Exception:
        pass
    return 48 * 1024 * 1024   # safe fallback on every generation


def _choose_tiling(N, H, W, Wp, C, budget):
    """Pick (images per step nb, output rows per step TH)."""
    cl = ((C + 127) // 128) * 128          # lane-padded channel count
    target_rows = 512                      # MXU row fill / grid-overhead amortization

    nb = 1
    for d in range(1, N + 1):              # smallest batch factor reaching the target
        if N % d:
            continue
        nb = d
        if d * H * Wp >= target_rows:
            break

    def step_bytes(th, nb_):
        px = nb_ * (th + 2) * Wp
        return (px * 3 * C * (2 + 4)                 # bf16 patch + f32 matmul result
                + nb_ * (th + 2) * Wp * cl * 2       # bf16 act scratch (lane-padded)
                + nb_ * th * W * C * 4 * 7)          # f32 epilogue + buffered row blocks

    def frame_bytes(nb_):
        return 2 * nb_ * (H + 4) * Wp * cl * 2       # resident bf16 frames (x2 buffers)

    # Row-tile candidates must satisfy the (8, 128) sublane rule on the
    # lane-dense (nb, TH, W*C) blocks: TH % 8 == 0 or TH == H.
    cands = [c for c in range(1, H + 1) if H % c == 0 and (c % 8 == 0 or c == H)]
    th = cands[0]
    for cand in cands[1:]:
        if step_bytes(cand, nb) + frame_bytes(nb) > budget:
            continue
        if (N // nb) * (H // cand) < 2 <= (N // nb) * (H // th):
            continue                       # keep >=2 grid steps (two v7x TCs)
        th = cand

    # Recover grid parallelism if the batch grouping collapsed it.
    while nb > 1 and (N // nb) * (H // th) < 2:
        nb = next(d for d in range(nb - 1, 0, -1) if N % d == 0)
    return nb, th


def residual_block_nobn(x_nchw, w1, w2, b1, b2, res_scale=1.0):
    """x_nchw: (N, C, H, W) f32.  w1/w2: (3,3,C,C) HWIO.  Returns NCHW f32."""
    N, C, H, W = x_nchw.shape

    # NCHW -> NHWC.
    x = jnp.transpose(x_nchw, (0, 2, 3, 1))
    x_res = x.reshape(N, H, W * C)                         # lane-dense identity (f32)

    # Zero-pad: 2 rows top/bottom (conv1+conv2 halo), 1 col left, and pad the
    # right so the padded width is a multiple of 8 (layout-trivial im2col
    # reshape).  Extra right columns never reach the output (discarded by the
    # dx-combine slices).  Ship in bf16 (matmul operand precision).
    Wp = ((W + 2 + 7) // 8) * 8
    x_pad = jnp.pad(x, ((0, 0), (2, 2), (1, Wp - W - 1), (0, 0))
                    ).astype(jnp.bfloat16)

    # dy-fold weight layout: rows = (dy, cin), cols = (dx, cout); bf16 operands.
    w1_k = jnp.transpose(w1, (0, 2, 1, 3)).reshape(3 * C, 3 * C).astype(jnp.bfloat16)
    w2_k = jnp.transpose(w2, (0, 2, 1, 3)).reshape(3 * C, 3 * C).astype(jnp.bfloat16)
    b1_2d = b1.reshape(1, C).astype(jnp.float32)
    b2_2d = b2.reshape(1, C).astype(jnp.float32)

    budget = _vmem_budget_bytes()
    nb, th = _choose_tiling(N, H, W, Wp, C, budget)
    n_groups, n_tiles = N // nb, H // th

    kernel = functools.partial(_resblock_kernel, res_scale=res_scale)

    # Note: pipeline_mode=pl.Buffered(1) on the (constant index map) weight /
    # bias specs would save one redundant VMEM copy; omitted for portability.
    out = pl.pallas_call(
        kernel,
        out_shape=jax.ShapeDtypeStruct((N, H, W * C), jnp.float32),
        grid_spec=pltpu.PrefetchScalarGridSpec(
            num_scalar_prefetch=0,
            grid=(n_groups, n_tiles),
            in_specs=[
                # Padded bf16 frame(s): fetched once per batch group (index map
                # ignores the row-tile axis); the halo'd row window is sliced
                # in-kernel.  For multi-megapixel frames this block should be
                # row-tiled too (pl.Element / manual DMA).
                pl.BlockSpec((nb, H + 4, Wp, C), lambda g, t: (g, 0, 0, 0)),
                pl.BlockSpec((nb, th, W * C), lambda g, t: (g, t, 0)),
                pl.BlockSpec((3 * C, 3 * C), lambda g, t: (0, 0)),
                pl.BlockSpec((3 * C, 3 * C), lambda g, t: (0, 0)),
                pl.BlockSpec((1, C), lambda g, t: (0, 0)),
                pl.BlockSpec((1, C), lambda g, t: (0, 0)),
            ],
            out_specs=pl.BlockSpec((nb, th, W * C), lambda g, t: (g, t, 0)),
            scratch_shapes=[pltpu.VMEM((nb, th + 2, Wp, C), jnp.bfloat16)],
        ),
        compiler_params=pltpu.CompilerParams(
            dimension_semantics=("parallel", "parallel"),
            vmem_limit_bytes=budget),
    )(x_pad, x_res, w1_k, w2_k, b1_2d, b2_2d)

    out = out.reshape(N, H, W, C)
    return jnp.transpose(out, (0, 3, 1, 2)).astype(x_nchw.dtype)


def _reference(x_nchw, w1, w2, b1, b2, res_scale=1.0):
    """Pure-JAX reference (lax.conv, f32) for correctness check."""
    x = jnp.transpose(x_nchw, (0, 2, 3, 1))  # NHWC
    dn = lax.conv_dimension_numbers(x.shape, w1.shape, ("NHWC", "HWIO", "NHWC"))
    c1 = lax.conv_general_dilated(x, w1, (1, 1), "SAME", dimension_numbers=dn)
    c1 = c1 + b1[None, None, None, :]
    c1 = jnp.where(c1 > 0, c1, 0.1 * c1)
    c2 = lax.conv_general_dilated(c1, w2, (1, 1), "SAME", dimension_numbers=dn)
    c2 = c2 + b2[None, None, None, :]
    out = x + res_scale * c2
    return jnp.transpose(out, (0, 3, 1, 2))


if __name__ == "__main__":
    # Module defaults: nf = 64, res_scale = 1.0.  Small spatial size; H=16 with
    # TH=8 exercises the row-tile halo / boundary-zeroing paths.
    N, C, H, W = 2, 64, 16, 16
    res_scale = 1.0

    key = jax.random.PRNGKey(0)
    kx, kw1, kw2 = jax.random.split(key, 3)

    x = jax.random.normal(kx, (N, C, H, W), dtype=jnp.float32)

    # Kaiming normal (fan_in, a=0): std = sqrt(2 / (Cin*3*3)), then scale 0.1.
    std = math.sqrt(2.0 / (C * 3 * 3)) * 0.1
    w1 = std * jax.random.normal(kw1, (3, 3, C, C), dtype=jnp.float32)
    w2 = std * jax.random.normal(kw2, (3, 3, C, C), dtype=jnp.float32)
    b1 = jnp.zeros((C,), dtype=jnp.float32)
    b2 = jnp.zeros((C,), dtype=jnp.float32)

    out = residual_block_nobn(x, w1, w2, b1, b2, res_scale)
    out = jax.block_until_ready(out)

    ref = _reference(x, w1, w2, b1, b2, res_scale)
    assert out.shape == (N, C, H, W)
    # bf16 matmul operands (f32 accumulation) -> loosened tolerance.
    err = jnp.max(jnp.abs(out - ref))
    assert jnp.allclose(out, ref, atol=2e-2, rtol=2e-2), f"max err {err}"

    print("KERNEL_OK")
</pallas_src>

<mosaic_0001>
module attributes {stable_mosaic.version = 11 : i64} {
  func.func @_resblock_kernel(%arg0: i32, %arg1: i32, %arg2: memref<2x20x24x64xbf16, #tpu.memory_space<vmem>>, %arg3: memref<2x8x1024xf32, #tpu.memory_space<vmem>>, %arg4: memref<192x192xbf16, #tpu.memory_space<vmem>>, %arg5: memref<192x192xbf16, #tpu.memory_space<vmem>>, %arg6: memref<1x64xf32, #tpu.memory_space<vmem>>, %arg7: memref<1x64xf32, #tpu.memory_space<vmem>>, %arg8: memref<2x8x1024xf32, #tpu.memory_space<vmem>>, %arg9: memref<2x10x24x64xbf16, #tpu.memory_space<vmem>>) attributes {dimension_semantics = [#tpu.dimension_semantics<parallel>, #tpu.dimension_semantics<parallel>], iteration_bounds = array<i64: 1, 2>, scalar_prefetch = 0 : i64, scratch_operands = 1 : i64, tpu.core_type = #tpu.core_type<tc>, window_params = [{transform_indices = @transform_0, window_bounds = array<i64: 2, 20, 24, 64>}, {transform_indices = @transform_1, window_bounds = array<i64: 2, 8, 1024>}, {pipeline_mode = #tpu.pipeline_mode<synchronous>, transform_indices = @transform_2, window_bounds = array<i64: 192, 192>}, {pipeline_mode = #tpu.pipeline_mode<synchronous>, transform_indices = @transform_3, window_bounds = array<i64: 192, 192>}, {pipeline_mode = #tpu.pipeline_mode<synchronous>, transform_indices = @transform_4, window_bounds = array<i64: 1, 64>}, {pipeline_mode = #tpu.pipeline_mode<synchronous>, transform_indices = @transform_5, window_bounds = array<i64: 1, 64>}, {transform_indices = @transform_6, window_bounds = array<i64: 2, 8, 1024>}]} {
    %c8_i32 = arith.constant 8 : i32
    %0 = arith.muli %arg1, %c8_i32 : i32
    %c0 = arith.constant 0 : index
    %1 = arith.index_cast %0 : i32 to index
    %c0_0 = arith.constant 0 : index
    %c0_1 = arith.constant 0 : index
    %2 = vector.load %arg2[%c0, %1, %c0_0, %c0_1] : memref<2x20x24x64xbf16, #tpu.memory_space<vmem>>, vector<2x12x24x64xbf16>
    %3 = vector.extract_strided_slice %2 {offsets = [0, 0, 0, 0], sizes = [2, 10, 24, 64], strides = [1, 1, 1, 1]} : vector<2x12x24x64xbf16> to vector<2x10x24x64xbf16>
    %4 = vector.extract_strided_slice %2 {offsets = [0, 1, 0, 0], sizes = [2, 10, 24, 64], strides = [1, 1, 1, 1]} : vector<2x12x24x64xbf16> to vector<2x10x24x64xbf16>
    %5 = vector.extract_strided_slice %2 {offsets = [0, 2, 0, 0], sizes = [2, 10, 24, 64], strides = [1, 1, 1, 1]} : vector<2x12x24x64xbf16> to vector<2x10x24x64xbf16>
    %6 = tpu.concatenate %3, %4, %5 in 3 : vector<2x10x24x64xbf16>, vector<2x10x24x64xbf16>, vector<2x10x24x64xbf16> -> vector<2x10x24x192xbf16>
    %7 = vector.shape_cast %6 : vector<2x10x24x192xbf16> to vector<480x192xbf16>
    %c0_2 = arith.constant 0 : index
    %c0_3 = arith.constant 0 : index
    %8 = vector.load %arg4[%c0_2, %c0_3] : memref<192x192xbf16, #tpu.memory_space<vmem>>, vector<192x192xbf16>
    %cst = arith.constant dense<0.000000e+00> : vector<480x192xf32>
    %9 = tpu.matmul %7, %8, %cst {dimension_numbers = #tpu.dot_dimension_numbers<[1], [0], [0], [1], [0, 0, 1, 1], [], []>} : vector<480x192xbf16>, vector<192x192xbf16>, vector<480x192xf32> -> vector<480x192xf32>
    %10 = vector.shape_cast %9 : vector<480x192xf32> to vector<2x10x24x192xf32>
    %11 = vector.extract_strided_slice %10 {offsets = [0, 0, 0, 0], sizes = [2, 10, 16, 64], strides = [1, 1, 1, 1]} : vector<2x10x24x192xf32> to vector<2x10x16x64xf32>
    %12 = vector.extract_strided_slice %10 {offsets = [0, 0, 1, 64], sizes = [2, 10, 16, 64], strides = [1, 1, 1, 1]} : vector<2x10x24x192xf32> to vector<2x10x16x64xf32>
    %13 = arith.addf %11, %12 : vector<2x10x16x64xf32>
    %14 = vector.extract_strided_slice %10 {offsets = [0, 0, 2, 128], sizes = [2, 10, 16, 64], strides = [1, 1, 1, 1]} : vector<2x10x24x192xf32> to vector<2x10x16x64xf32>
    %15 = arith.addf %13, %14 : vector<2x10x16x64xf32>
    %c0_4 = arith.constant 0 : index
    %c0_5 = arith.constant 0 : index
    %16 = vector.load %arg6[%c0_4, %c0_5] : memref<1x64xf32, #tpu.memory_space<vmem>>, vector<1x64xf32>
    %17 = vector.shape_cast %16 : vector<1x64xf32> to vector<1x1x1x64xf32>
    %18 = vector.broadcast %17 : vector<1x1x1x64xf32> to vector<2x10x16x64xf32>
    %19 = arith.addf %15, %18 : vector<2x10x16x64xf32>
    %cst_6 = arith.constant 0.000000e+00 : f32
    %20 = vector.broadcast %cst_6 : f32 to vector<2x10x16x64xf32>
    %21 = arith.cmpf ogt, %19, %20 : vector<2x10x16x64xf32>
    %cst_7 = arith.constant 1.000000e-01 : f32
    %22 = vector.broadcast %cst_7 : f32 to vector<2x10x16x64xf32>
    %23 = arith.mulf %22, %19 : vector<2x10x16x64xf32>
    %24 = arith.select %21, %19, %23 : vector<2x10x16x64xi1>, vector<2x10x16x64xf32>
    %25 = arith.truncf %24 : vector<2x10x16x64xf32> to vector<2x10x16x64xbf16>
    %c0_8 = arith.constant 0 : index
    %c0_9 = arith.constant 0 : index
    %c1 = arith.constant 1 : index
    %c0_10 = arith.constant 0 : index
    %26 = vector.load %arg9[%c0_8, %c0_9, %c1, %c0_10] : memref<2x10x24x64xbf16, #tpu.memory_space<vmem>>, vector<2x10x16x64xbf16>
    tpu.vector_store %arg9[%c0_8, %c0_9, %c1, %c0_10], %25 {strides = array<i32>} : memref<2x10x24x64xbf16, #tpu.memory_space<vmem>>, vector<2x10x16x64xbf16>,
    %cst_11 = arith.constant 0.000000e+00 : bf16
    %27 = vector.broadcast %cst_11 : bf16 to vector<2x10x1x64xbf16>
    %c0_12 = arith.constant 0 : index
    %c0_13 = arith.constant 0 : index
    %c0_14 = arith.constant 0 : index
    %c0_15 = arith.constant 0 : index
    %28 = vector.load %arg9[%c0_12, %c0_13, %c0_14, %c0_15] : memref<2x10x24x64xbf16, #tpu.memory_space<vmem>>, vector<2x10x1x64xbf16>
    tpu.vector_store %arg9[%c0_12, %c0_13, %c0_14, %c0_15], %27 {strides = array<i32>} : memref<2x10x24x64xbf16, #tpu.memory_space<vmem>>, vector<2x10x1x64xbf16>,
    %cst_16 = arith.constant 0.000000e+00 : bf16
    %29 = vector.broadcast %cst_16 : bf16 to vector<2x10x7x64xbf16>
    %c0_17 = arith.constant 0 : index
    %c0_18 = arith.constant 0 : index
    %c17 = arith.constant 17 : index
    %c0_19 = arith.constant 0 : index
    %30 = vector.load %arg9[%c0_17, %c0_18, %c17, %c0_19] : memref<2x10x24x64xbf16, #tpu.memory_space<vmem>>, vector<2x10x7x64xbf16>
    tpu.vector_store %arg9[%c0_17, %c0_18, %c17, %c0_19], %29 {strides = array<i32>} : memref<2x10x24x64xbf16, #tpu.memory_space<vmem>>, vector<2x10x7x64xbf16>,
    %cst_20 = arith.constant 0.000000e+00 : bf16
    %31 = vector.broadcast %cst_20 : bf16 to vector<2x1x24x64xbf16>
    %c0_i32 = arith.constant 0 : i32
    %32 = arith.cmpi eq, %arg1, %c0_i32 : i32
    %33 = arith.extui %32 : i1 to i32
    %c0_i32_21 = arith.constant 0 : i32
    %34 = arith.cmpi ne, %33, %c0_i32_21 : i32
    scf.if %34 {
      %c0_46 = arith.constant 0 : index
      %c0_47 = arith.constant 0 : index
      %c0_48 = arith.constant 0 : index
      %c0_49 = arith.constant 0 : index
      %61 = vector.load %arg9[%c0_46, %c0_47, %c0_48, %c0_49] : memref<2x10x24x64xbf16, #tpu.memory_space<vmem>>, vector<2x1x24x64xbf16>
      tpu.vector_store %arg9[%c0_46, %c0_47, %c0_48, %c0_49], %31 {strides = array<i32>} : memref<2x10x24x64xbf16, #tpu.memory_space<vmem>>, vector<2x1x24x64xbf16>,
    } else {
    }
    %c1_i32 = arith.constant 1 : i32
    %35 = arith.cmpi eq, %arg1, %c1_i32 : i32
    %36 = arith.extui %35 : i1 to i32
    %c0_i32_22 = arith.constant 0 : i32
    %37 = arith.cmpi ne, %36, %c0_i32_22 : i32
    scf.if %37 {
      %c0_46 = arith.constant 0 : index
      %c9 = arith.constant 9 : index
      %c0_47 = arith.constant 0 : index
      %c0_48 = arith.constant 0 : index
      %61 = vector.load %arg9[%c0_46, %c9, %c0_47, %c0_48] : memref<2x10x24x64xbf16, #tpu.memory_space<vmem>>, vector<2x1x24x64xbf16>
      tpu.vector_store %arg9[%c0_46, %c9, %c0_47, %c0_48], %31 {strides = array<i32>} : memref<2x10x24x64xbf16, #tpu.memory_space<vmem>>, vector<2x1x24x64xbf16>,
    } else {
    }
    %c0_23 = arith.constant 0 : index
    %c0_24 = arith.constant 0 : index
    %c0_25 = arith.constant 0 : index
    %c0_26 = arith.constant 0 : index
    %38 = vector.load %arg9[%c0_23, %c0_24, %c0_25, %c0_26] : memref<2x10x24x64xbf16, #tpu.memory_space<vmem>>, vector<2x8x24x64xbf16>
    %c0_27 = arith.constant 0 : index
    %c1_28 = arith.constant 1 : index
    %c0_29 = arith.constant 0 : index
    %c0_30 = arith.constant 0 : index
    %39 = vector.load %arg9[%c0_27, %c1_28, %c0_29, %c0_30] : memref<2x10x24x64xbf16, #tpu.memory_space<vmem>>, vector<2x8x24x64xbf16>
    %c0_31 = arith.constant 0 : index
    %c2 = arith.constant 2 : index
    %c0_32 = arith.constant 0 : index
    %c0_33 = arith.constant 0 : index
    %40 = vector.load %arg9[%c0_31, %c2, %c0_32, %c0_33] : memref<2x10x24x64xbf16, #tpu.memory_space<vmem>>, vector<2x8x24x64xbf16>
    %41 = tpu.concatenate %38, %39, %40 in 3 : vector<2x8x24x64xbf16>, vector<2x8x24x64xbf16>, vector<2x8x24x64xbf16> -> vector<2x8x24x192xbf16>
    %42 = vector.shape_cast %41 : vector<2x8x24x192xbf16> to vector<384x192xbf16>
    %c0_34 = arith.constant 0 : index
    %c0_35 = arith.constant 0 : index
    %43 = vector.load %arg5[%c0_34, %c0_35] : memref<192x192xbf16, #tpu.memory_space<vmem>>, vector<192x192xbf16>
    %cst_36 = arith.constant dense<0.000000e+00> : vector<384x192xf32>
    %44 = tpu.matmul %42, %43, %cst_36 {dimension_numbers = #tpu.dot_dimension_numbers<[1], [0], [0], [1], [0, 0, 1, 1], [], []>} : vector<384x192xbf16>, vector<192x192xbf16>, vector<384x192xf32> -> vector<384x192xf32>
    %45 = vector.shape_cast %44 : vector<384x192xf32> to vector<2x8x24x192xf32>
    %46 = vector.extract_strided_slice %45 {offsets = [0, 0, 0, 0], sizes = [2, 8, 16, 64], strides = [1, 1, 1, 1]} : vector<2x8x24x192xf32> to vector<2x8x16x64xf32>
    %47 = vector.extract_strided_slice %45 {offsets = [0, 0, 1, 64], sizes = [2, 8, 16, 64], strides = [1, 1, 1, 1]} : vector<2x8x24x192xf32> to vector<2x8x16x64xf32>
    %48 = arith.addf %46, %47 : vector<2x8x16x64xf32>
    %49 = vector.extract_strided_slice %45 {offsets = [0, 0, 2, 128], sizes = [2, 8, 16, 64], strides = [1, 1, 1, 1]} : vector<2x8x24x192xf32> to vector<2x8x16x64xf32>
    %50 = arith.addf %48, %49 : vector<2x8x16x64xf32>
    %c0_37 = arith.constant 0 : index
    %c0_38 = arith.constant 0 : index
    %51 = vector.load %arg7[%c0_37, %c0_38] : memref<1x64xf32, #tpu.memory_space<vmem>>, vector<1x64xf32>
    %52 = vector.shape_cast %51 : vector<1x64xf32> to vector<1x1x1x64xf32>
    %53 = vector.broadcast %52 : vector<1x1x1x64xf32> to vector<2x8x16x64xf32>
    %54 = arith.addf %50, %53 : vector<2x8x16x64xf32>
    %c0_39 = arith.constant 0 : index
    %c0_40 = arith.constant 0 : index
    %c0_41 = arith.constant 0 : index
    %55 = vector.load %arg3[%c0_39, %c0_40, %c0_41] : memref<2x8x1024xf32, #tpu.memory_space<vmem>>, vector<2x8x1024xf32>
    %56 = vector.shape_cast %54 : vector<2x8x16x64xf32> to vector<2x8x1024xf32>
    %cst_42 = arith.constant 1.000000e+00 : f32
    %57 = vector.broadcast %cst_42 : f32 to vector<2x8x1024xf32>
    %58 = arith.mulf %57, %56 : vector<2x8x1024xf32>
    %59 = arith.addf %55, %58 : vector<2x8x1024xf32>
    %c0_43 = arith.constant 0 : index
    %c0_44 = arith.constant 0 : index
    %c0_45 = arith.constant 0 : index
    %60 = vector.load %arg8[%c0_43, %c0_44, %c0_45] : memref<2x8x1024xf32, #tpu.memory_space<vmem>>, vector<2x8x1024xf32>
    tpu.vector_store %arg8[%c0_43, %c0_44, %c0_45], %59 {strides = array<i32>} : memref<2x8x1024xf32, #tpu.memory_space<vmem>>, vector<2x8x1024xf32>,
    return
  }
  func.func @transform_0(%arg0: i32, %arg1: i32) -> (i32, i32, i32, i32) {
    %c0_i32 = arith.constant 0 : i32
    %c0_i32_0 = arith.constant 0 : i32
    %c0_i32_1 = arith.constant 0 : i32
    %c0_i32_2 = arith.constant 0 : i32
    return %arg0, %c0_i32, %c0_i32_0, %c0_i32_1 : i32, i32, i32, i32
  }
  func.func @transform_1(%arg0: i32, %arg1: i32) -> (i32, i32, i32) {
    %c0_i32 = arith.constant 0 : i32
    %c0_i32_0 = arith.constant 0 : i32
    return %arg0, %arg1, %c0_i32 : i32, i32, i32
  }
  func.func @transform_2(%arg0: i32, %arg1: i32) -> (i32, i32) {
    %c0_i32 = arith.constant 0 : i32
    %c0_i32_0 = arith.constant 0 : i32
    %c0_i32_1 = arith.constant 0 : i32
    return %c0_i32, %c0_i32_0 : i32, i32
  }
  func.func @transform_3(%arg0: i32, %arg1: i32) -> (i32, i32) {
    %c0_i32 = arith.constant 0 : i32
    %c0_i32_0 = arith.constant 0 : i32
    %c0_i32_1 = arith.constant 0 : i32
    return %c0_i32, %c0_i32_0 : i32, i32
  }
  func.func @transform_4(%arg0: i32, %arg1: i32) -> (i32, i32) {
    %c0_i32 = arith.constant 0 : i32
    %c0_i32_0 = arith.constant 0 : i32
    %c0_i32_1 = arith.constant 0 : i32
    return %c0_i32, %c0_i32_0 : i32, i32
  }
  func.func @transform_5(%arg0: i32, %arg1: i32) -> (i32, i32) {
    %c0_i32 = arith.constant 0 : i32
    %c0_i32_0 = arith.constant 0 : i32
    %c0_i32_1 = arith.constant 0 : i32
    return %c0_i32, %c0_i32_0 : i32, i32
  }
  func.func @transform_6(%arg0: i32, %arg1: i32) -> (i32, i32, i32) {
    %c0_i32 = arith.constant 0 : i32
    %c0_i32_0 = arith.constant 0 : i32
    return %arg0, %arg1, %c0_i32 : i32, i32, i32
  }
}

</mosaic_0001>

<bundles_post_ra>
// kernel: tpu_custom_call.1
= control target key start
LH: loop header
LB: loop body
LE: loop exit
PB: predicated region body
PF: predicated region fallthrough
CT: control target
= control target key end

     0   :  { %s9022_s0 = inlined_call_operand.hbm [shape: bf16[2,20,24,64], index: 0, kind: input, shape index: {}]   ;;  %s9023_s1 = inlined_call_operand.hbm [shape: f32[2,16,1024], index: 1, kind: input, shape index: {}]   ;;  %s9024_s2 = inlined_call_operand.hbm [shape: bf16[192,192], index: 2, kind: input, shape index: {}]   ;;  %s9025_s3 = inlined_call_operand.hbm [shape: bf16[192,192], index: 3, kind: input, shape index: {}]   ;;  %s9026_s4 = inlined_call_operand.vmem [shape: f32[1,64], index: 4, kind: input, shape index: {}]   ;;  %s9027_s5 = inlined_call_operand.vmem [shape: f32[1,64], index: 5, kind: input, shape index: {}]   ;;  %s9028_s6 = inlined_call_operand.hbm [shape: f32[2,16,1024], index: 6, kind: output, shape index: {}]  }
   0x1   :  { %9069 = sst [smem:[#allocation40_spill]] %s9024_s2 }
   0x2   :  { %9070 = sst [smem:[#allocation41_spill]] %s9028_s6 }
   0x3   :  { %11 = vsyncpa [#allocation4], 0 }
   0x4   :  { %12 = vsyncpa [#allocation7], 0 }
   0x5   :  { %14 = vsyncpa [#allocation7 + $0x1], 0 }
   0x6   :  { %15 = vsyncpa [#allocation10], 0 }
   0x7   :  { %16 = vsyncpa [#allocation5], 0 }
   0x8   :  { %18 = vsyncpa [#allocation5 + $0x1], 0  ;;  %s6663_s21 = smov 0   ;;  %s6665_s22 = smov 0  }
   0x9   :  { %s6667_s23 = smov 0   ;;  %s6669_s24 = smov 0  }
   0xa   :  { %s6671_s25 = smov 0   ;;  %s6673_s26 = smov 0  }
   0xb LB: > { %9071 = sst [smem:[#allocation17_spill]] %s6588_s21  ;;  %s6694_s27 = sadd.s32 4294967295, %s6608_s26   ;;  %s6608_s26 = sphi %s6673_s26, %s24_s26   ;;  %s6604_s25 = sphi %s6671_s25, %s9199_s25   ;;  %s6600_s24 = sphi %s6669_s24, %s9198_s24   ;;  %s6596_s23 = sphi %s6667_s23, %s9197_s23   ;;  %s6592_s22 = sphi %s6665_s22, %s9196_s22   ;;  %s6588_s21 = sphi %s6663_s21, %s9195_s21  }
   0xc   : > { %s5687_s28 = sadd.s32 4294967294, %s6608_s26   ;;  %p78_p0 = scmp.ne.s32.totalorder %s6596_s23, %s6592_s22 }
   0xd   : > { %p79_p1 = scmp.eq.s32.totalorder %s6608_s26, 0  ;;  %p84_p2 = scmp.ne.s32.totalorder %s6592_s22, %s6588_s21 }
   0xe   : > { %p9029_p3 = scmp.eq.s32.totalorder %s6694_s27, 0  ;;  %p194_p4 = scmp.eq.s32.totalorder %s6694_s27, 1 }
   0xf   : > { %p6705_p5 = por %p79_p1, %p78_p0  ;;  %p200_p6 = scmp.eq.s32.totalorder %s5687_s28, 1 }
  0x10   : > { %p6711_p7 = por %p9029_p3, %p84_p2  ;;  %p6715_p8 = por %p194_p4, %p78_p0 }
  0x11   : > { %p6719_p9 = por %p200_p6, %p84_p2  ;;  %p5688_p10 = scmp.ge.s32.totalorder %s6608_s26, 1 }
  0x12   : > { %s9073_s7 = scalar_select %p6711_p7, 1, 0 }
  0x13   : > { %s9074_s8 = scalar_select %p6715_p8, 1, 0 }
  0x14   : > { %s9076_s9 = scalar_select %p6719_p9, 1, 0 }
  0x15   : > { %9075 = sst [smem:[#allocation18_spill]] %s9074_s8  ;;  %p207_p11 = scmp.lt.s32.totalorder %s6608_s26, 3 }
  0x16   : > { %9077 = sst [smem:[#allocation19_spill]] %s9076_s9  ;;  %s6610_s11 = smov [#allocation8]  }
  0x17   : > { %p6725_p12 = pnand %p5688_p10, %p207_p11  ;;  %s236_s12 = sshll.u32 %s6610_s11, 4  ;;  %s6729_s12 = int_to_ptr.vmem [resolvable:$true] %s236_s12 }
  0x18   : > { %p6106_p1 = scmp.lt.s32.totalorder %s6608_s26, 2  ;;  %s6611_s15 = smov [#allocation3]  }
  0x19   : > { %s9078_s10 = scalar_select %p6725_p12, 1, 0 }
  0x1a   : > { %p6085_p13 = pneg %p6725_p12  ;;  %p6743_p4 = pnand %p6106_p1, %p6705_p5 }
  0x1b   : > { %s223_s16 = sshll.u32 %s6611_s15, 4  ;;  %s9081_s2 = sld [smem:[#allocation40_spill]]  ;;  %s224_s16 = int_to_ptr.vmem [resolvable:$true] %s223_s16 }
  0x1c   : > { %p6737_p2 = pnand %p6085_p13, %p9029_p3 }
  0x1d   : > { %s9080_s14 = scalar_select %p6743_p4, 1, 0 }
  0x1e   : > { %p6755_p10 = pneg %p6737_p2 }
  0x21   : > { %s6400_s19 = scalar_lea.hbm %s9081_s2, 3072 }
  0x22   : > { %p6401_p6 = scmp.ne.s32.totalorder %s9081_s2, %s6400_s19  ;;  %p6407_p13 = scmp.lt.u32.totalorder %s6400_s19, %s9081_s2 }
  0x24   : > { %p6403_p5 = pnand %p6755_p10, %p6401_p6 }
  0x26   : > { %p6404_p11 = pneg %p6403_p5 }
  0x28   : > { %p6409_p1 = pnand %p6407_p13, %p6404_p11 }
  0x2a   : > { %6412 = shalt.err (!%p6409_p1)
}
  0x2b   : > { %s6413_s15 = scalar_lea.vmem %s6729_s12, 3072  ;;  %p6421_p8 = scmp.lt.s32.totalorder %s6729_s12, %s6729_s12 }
  0x2c   : > { %p6414_p0 = scmp.ne.s32.totalorder %s6729_s12, %s6413_s15  ;;  %p6422_p7 = scmp.lt.s32.totalorder %s6413_s15, %s6413_s15 }
  0x2e   : > { %p6416_p3 = pnand %p6414_p0, %p6755_p10  ;;  %p6423_p6 = por %p6422_p7, %p6421_p8 }
  0x30   : > { %p6417_p9 = pneg %p6416_p3 }
  0x32   : > { %p6424_p5 = pnand %p6423_p6, %p6417_p9 }
  0x34   : > { %6427 = shalt.err (!%p6424_p5)
}
  0x35   : > { %s9037_s17 = smov 128   ;;  %s9038_s29 = smov 8  }
  0x36   : > { %6091 = dma.hbm_to_vmem [thread:$0]  (!%p6737_p2), %s9081_s2, 3072, %s6729_s12, [#allocation7], %s9037_s17, %s9037_s17, %s9038_s29  }
  0x37   : > { %s6428_s30 = scalar_lea.hbm %s9022_s0, 7680 }
  0x38   : > { %p6429_p3 = scmp.ne.s32.totalorder %s9022_s0, %s6428_s30  ;;  %p6435_p9 = scmp.lt.u32.totalorder %s6428_s30, %s9022_s0 }
  0x3a   : > { %p6431_p7 = pnand %p6429_p3, %p6755_p10 }
  0x3c   : > { %p6432_p8 = pneg %p6431_p7 }
  0x3e   : > { %p6437_p0 = pnand %p6435_p9, %p6432_p8 }
  0x40   : > { %6440 = shalt.err (!%p6437_p0)
}
  0x41   : > { %s6441_s18 = scalar_lea.vmem %s224_s16, 7680  ;;  %p6449_p6 = scmp.lt.s32.totalorder %s224_s16, %s224_s16 }
  0x42   : > { %p6442_p11 = scmp.ne.s32.totalorder %s224_s16, %s6441_s18  ;;  %p6450_p5 = scmp.lt.s32.totalorder %s6441_s18, %s6441_s18 }
  0x44   : > { %p6444_p13 = pnand %p6442_p11, %p6755_p10  ;;  %p6451_p12 = por %p6450_p5, %p6449_p6 }
  0x46   : > { %p6445_p1 = pneg %p6444_p13 }
  0x48   : > { %p6452_p4 = pnand %p6451_p12, %p6445_p1 }
  0x4a   : > { %6455 = shalt.err (!%p6452_p4)
}
  0x4b   : > { %s6614_s9 = smov 64   ;;  %s6615_s12 = smov 4  }
  0x4c   : > { %6088 = dma.hbm_to_vmem [thread:$0]  (!%p6737_p2), %s9022_s0, 7680, %s224_s16, [#allocation4], %s6614_s9, %s6614_s9, %s6615_s12  }
  0x4d   : > { %s6616_s19 = smov [#allocation9]   ;;  %s33_s28 = sadd.s32 1, %s6604_s25 }
  0x4e   : > { %s249_s20 = sshll.u32 %s6616_s19, 4  ;;  %s6456_s18 = scalar_lea.hbm %s9025_s3, 3072  ;;  %s250_s20 = int_to_ptr.vmem [resolvable:$true] %s249_s20 }
  0x4f   : > { %p6457_p12 = scmp.ne.s32.totalorder %s9025_s3, %s6456_s18  ;;  %p6463_p7 = scmp.lt.u32.totalorder %s6456_s18, %s9025_s3 }
  0x51   : > { %p6459_p4 = pnand %p6457_p12, %p6755_p10 }
  0x53   : > { %p6460_p3 = pneg %p6459_p4 }
  0x55   : > { %p6465_p8 = pnand %p6463_p7, %p6460_p3 }
  0x57   : > { %6468 = shalt.err (!%p6465_p8)
}
  0x58   : > { %s6469_s16 = scalar_lea.vmem %s250_s20, 3072  ;;  %p6477_p13 = scmp.lt.s32.totalorder %s250_s20, %s250_s20 }
  0x59   : > { %p6470_p9 = scmp.ne.s32.totalorder %s250_s20, %s6469_s16  ;;  %p6478_p1 = scmp.lt.s32.totalorder %s6469_s16, %s6469_s16 }
  0x5b   : > { %p6472_p0 = pnand %p6470_p9, %p6755_p10  ;;  %p6479_p6 = por %p6478_p1, %p6477_p13 }
  0x5d   : > { %p6473_p11 = pneg %p6472_p0 }
  0x5f   : > { %p6480_p5 = pnand %p6479_p6, %p6473_p11 }
  0x61   : > { %6483 = shalt.err (!%p6480_p5)
}
  0x62   : > { %s9083_s17 = smov 8   ;;  %s9084_s29 = smov 128  }
  0x63   : > { %6094 = dma.hbm_to_vmem [thread:$0]  (!%p6737_p2), %s9025_s3, 3072, %s250_s20, [#allocation10], %s9084_s29, %s9084_s29, %s9083_s17  }
  0x64   : > { %p34_p10 = scmp.ge.s32.totalorder %s33_s28, 2  ;;  %s269_s11 = sand.u32 1, %s6608_s26  }
  0x65   : > { %s271_s12 = sand.u32 1, %s6596_s23   ;;  %s6026_s6 = sshll.u32 %s6604_s25, 10 }
  0x66   : > { %s9201_s28 = smov (%p34_p10, %s33_s28), 0  ;;  %s5693_s13 = sshll.u32 %s271_s12, 7 }
  0x67   : > { %s67_s21 = ssub.s32 %s6604_s25, %s9201_s28  ;;  %s6831_s15 = scalar_lea.hbm %s9023_s1, %s6026_s6 }
  0x68   : > { %p69_p12 = scmp.eq.s32.totalorder %s67_s21, 0  ;;  %s273_s20 = scalar_lea.vmem [#allocation6], %s5693_s13 }
  0x69   : > { %s283_s18 = sshll.u32 %s273_s20, 4  ;;  %s9085_s16 = sadd.s32 1, %s6596_s23  ;;  %s6838_s18 = int_to_ptr.vmem [resolvable:$true] %s283_s18 }
  0x6a   : > { %s6836_s17 = scalar_select %p69_p12, %s6596_s23, %s9085_s16  }
  0x6b   : > { %s6840_s29 = scalar_lea.sflag [#allocation7], %s269_s11  ;;  %s6484_s2 = scalar_lea.hbm %s6831_s15, 2048 }
  0x6c   : > { %p6485_p2 = scmp.ne.s32.totalorder %s6831_s15, %s6484_s2  ;;  %p9086_p4 = scmp.ne.s32.totalorder %s9080_s14, 0 }
  0x6d   : > { %s6489_s13 = scalar_lea.hbm %s9023_s1, 4096  ;;  %p6490_p9 = scmp.lt.u32.totalorder %s6831_s15, %s9023_s1 }
  0x6e   : > { %p6486_p3 = pneg %p9086_p4  ;;  %p6491_p0 = scmp.lt.u32.totalorder %s6489_s13, %s6484_s2 }
  0x6f   : > { %p6493_p13 = scmp.lt.u32.totalorder %s6484_s2, %s6831_s15 }
  0x70   : > { %p6487_p7 = pnand %p6486_p3, %p6485_p2  ;;  %p6492_p11 = por %p6491_p0, %p6490_p9 }
  0x72   : > { %p6488_p8 = pneg %p6487_p7  ;;  %p6494_p1 = por %p6493_p13, %p6492_p11 }
  0x74   : > { %p6495_p6 = pnand %p6494_p1, %p6488_p8 }
  0x76   : > { %6498 = shalt.err (!%p6495_p6)
}
  0x77   : > { %s6499_s11 = scalar_lea.vmem %s6838_s18, 2048  ;;  %s6617_s19 = smov [#allocation6]  }
  0x78   : > { %p6500_p5 = scmp.ne.s32.totalorder %s6838_s18, %s6499_s11  ;;  %s6504_s30 = sshll.u32 %s6617_s19, 4  ;;  %s6505_s30 = int_to_ptr.vmem [resolvable:$false] %s6504_s30 }
  0x79   : > { %s6506_s20 = scalar_lea.vmem %s6505_s30, 4096  ;;  %p6507_p2 = scmp.lt.s32.totalorder %s6838_s18, %s6505_s30 }
  0x7a   : > { %p6502_p10 = pnand %p6500_p5, %p6486_p3  ;;  %p6508_p7 = scmp.lt.s32.totalorder %s6506_s20, %s6499_s11 }
  0x7c   : > { %p6503_p12 = pneg %p6502_p10  ;;  %p6509_p9 = por %p6508_p7, %p6507_p2 }
  0x7e   : > { %p6510_p0 = pnand %p6509_p9, %p6503_p12 }
  0x80   : > { %6513 = shalt.err (!%p6510_p0)
}
  0x81   : > { %s6618_s16 = smov 2048   ;;  %s6619_s2 = smov 1024  }
  0x82   : > { %6098 = dma.hbm_to_vmem [thread:$0]  (!%p9086_p4), %s6831_s15, 2048, %s6838_s18, %s6840_s29, %s6618_s16, %s6619_s2, %s6614_s9  }
  0x83   : > { %p9087_p3 = scmp.ne.s32.totalorder %s9078_s10, 0 }
  0x85   : > { %295 = sbr.rel (%p9087_p3) target bundleno = 1684 (0x694), region = 44 }
  0x8c   : > { %p9088_p8 = scmp.eq.s32.totalorder %s6694_s27, 0 }
  0x8e   : > { %6567 = dma.done.wait (%p9088_p8), [#allocation4], 7680   ;;  %p9089_p11 = pmov %p9088_p8 }
  0x8f   : > { %s301_s8 = sand.u32 1, %s6694_s27   ;;  %s303_s12 = sand.u32 1, %s6592_s22  }
  0x90   : > { %6569 = vsyncadd (%p9089_p11), [#allocation4], 4294959616  ;;  %s6879_s13 = sshll.u32 %s303_s12, 7  ;;  %s302_s14 = scalar_lea.sflag [#allocation7], %s301_s8 }
  0x91   : > { %s6882_s9 = scalar_lea.vmem [#allocation6], %s6879_s13  ;;  %p9090_p4 = scmp.ne.s32.totalorder %s9073_s7, 0 }
  0x93   : > { %6571 = dma.done.wait (%p9090_p4), %s302_s14, 2048  }
  0x94   : > { %6573 = vsyncadd (%p9090_p4), %s302_s14, 4294965248  ;;  %p9091_p13 = pmov %p9088_p8 }
  0x95   : > { %p9092_p1 = pmov %p9088_p8 }
  0x96   : > { %6575 = dma.done.wait (%p9091_p13), [#allocation7], 3072  }
  0x97   : > { %6577 = vsyncadd (%p9092_p1), [#allocation7], 4294964224  ;;  %p9093_p6 = pmov %p9092_p1 }
  0x98   : > { %p9094_p5 = pmov %p9092_p1 }
  0x99   : > { %6579 = dma.done.wait (%p9093_p6), [#allocation10], 3072  }
  0x9a   : > { %6581 = vsyncadd (%p9094_p5), [#allocation10], 4294964224  ;;  %s6027_s10 = smul.u32 96, %s6600_s24  ;;  %vm690_vm0 = vcmask 523264   ;;  %s6620_s27 = smov 64   ;;  %vm1610_vm1 = vcmask 1046528  }
  0x9b   : > { %v6191_v20 = vld [vmem:[#allocation8 + $0x4] ss:$8 sps:$4 sm:$0xff]   ;;  %v6193_v21 = vld [vmem:[#allocation8] ss:$8 sps:$4 sm:$0xff]   ;;  %v6194_v22 = vld [vmem:[#allocation8 + $0x14] ss:$8 sps:$4 sm:$0xff]  }
  0x9c   : > { %s6897_s15 = scalar_lea.vmem [#allocation3], %s6027_s10  ;;  %1217 = vmatprep.subr.bf16.mxu0 %v6191_v20  ;;  %v6198_v25 = vld [vmem:[#allocation8 + $0x10] ss:$8 sps:$4 sm:$0xff]   ;;  %v6201_v30 = vld [vmem:[#allocation8 + $0x24] ss:$8 sps:$4 sm:$0xff]   ;;  %vm1931_vm2 = vcmask 1045504  }
  0x9d   : > { %v6900_v0 = vld [vmem:[%s6897_s15 + $0xc] sm:$0xff]   ;;  %v6903_v1 = vld [vmem:[%s6897_s15 + $0x18] sm:$0xff]   ;;  %v6908_v2 = vld [vmem:[%s6897_s15 + $0x20] sm:$0xf]  ;;  %1218 = vmatpush1.bf16.msra.mxu0 %v6193_v21  ;;  %vm2802_vm4 = vcmask 519168   ;;  %vm2810_vm9 = vcmask 516096  }
  0x9e   : > { %598 = vrot.lane.b32.xlu0 %v6900_v0, %s6620_s27  ;;  %v6911_v3 = vld [vmem:[%s6897_s15 + $0x14] ss:$0 sps:$4 sm:$0xff]   ;;  %602 = vrot.lane.b32.xlu1 %v6903_v1, %s6620_s27  ;;  %v6917_v4 = vcombine.low %v6908_v2, %v6908_v2  ;;  %v6920_v5 = vld [vmem:[%s6897_s15 + $0x24] sm:$0xf]  ;;  %v6203_v33 = vld [vmem:[#allocation8 + $0x20] ss:$8 sps:$4 sm:$0xff]  }
  0x9f   : > { %v6923_v6 = vld [vmem:[%s6897_s15 + $0x28] sm:$0xf]  ;;  %v6926_v7 = vld [vmem:[%s6897_s15 + $0x2c] sm:$0xf]  ;;  %5803 = vmatprep.mubr.msk.bf16.mxu0 %vm690_vm0, %v6903_v1  ;;  %v6935_v10 = vld [vmem:[%s6897_s15 + $0x38] sm:$0xf]  ;;  %1219 = vmatprep.subr.bf16.mxu0 %v6194_v22 }
  0xa0   : > { %v6938_v11 = vld [vmem:[%s6897_s15 + $0x3c] sm:$0xf]  ;;  %v6944_v12 = vcombine.low %v6920_v5, %v6923_v6  ;;  %v6947_v13 = vld [vmem:[%s6897_s15 + $0x40] sm:$0xf]  ;;  %v6952_v15 = vld [vmem:[%s6897_s15 + $0x44] sm:$0xf]  ;;  %v6958_v16 = vcombine.low %v6926_v7, %v6926_v7  ;;  %v6980_v26 = vcombine.low %v6935_v10, %v6935_v10 }
  0xa1   : > { %v6963_v18 = vld [vmem:[%s6897_s15 + $0x30] sm:$0xff]   ;;  %v6974_v24 = vld [vmem:[%s6897_s15 + $0x58] sm:$0xf]  ;;  %v6985_v28 = vld [vmem:[%s6897_s15 + $0x5c] sm:$0xf]  ;;  %v6993_v31 = vcombine.low %v6938_v11, %v6947_v13  ;;  %v6999_v32 = vcombine.low %v6952_v15, %v6952_v15  ;;  %1220 = vmatpush1.bf16.msra.mxu0 %v6198_v25  ;;  %s8115_s21 = scalar_lea.vmem [#allocation11], %s6879_s13 }
  0xa2   : > { %600 = vrot.lane.b32.xlu0 %v6911_v3, %s6620_s27  ;;  %604 = vrot.lane.b32.xlu1 %v6917_v4, %s6620_s27  ;;  %v6966_v19 = vld [vmem:[%s6897_s15 + $0x50] sm:$0xf]  ;;  %v6971_v23 = vld [vmem:[%s6897_s15 + $0x54] sm:$0xf]  ;;  %v6206_v34 = vld [vmem:[#allocation8 + $0x34] ss:$8 sps:$4 sm:$0xff]   ;;  %v7038_v46 = vcombine.low %v6985_v28, %v6985_v28 }
  0xa3   : > { %1221 = vmatprep.subr.bf16.mxu0 %v6201_v30  ;;  %v7004_v35 = vld [vmem:[%s6897_s15 + $0x48] sm:$0xff]   ;;  %v7010_v36 = vcombine.low %v6966_v19, %v6966_v19  ;;  %v6209_v39 = vld [vmem:[#allocation8 + $0x44] ss:$8 sps:$4 sm:$0xff]   ;;  %v7019_v41 = vld [vmem:[%s6897_s15 + $0x70] sm:$0xf]  ;;  %v7030_v44 = vcombine.low %v6971_v23, %v6974_v24  ;;  %p5874_p10 = scmp.ne.s32.totalorder %s6600_s24, 0 }
  0xa4   : > { %v6208_v37 = vld [vmem:[#allocation8 + $0x30] ss:$8 sps:$4 sm:$0xff]   ;;  %v7016_v40 = vld [vmem:[%s6897_s15 + $0x6c] sm:$0xf]  ;;  %v7024_v43 = vld [vmem:[%s6897_s15 + $0x74] sm:$0xf] }
  0xa5   : > { %1222 = vmatpush1.bf16.msra.mxu0 %v6203_v33  ;;  %v7013_v38 = vld [vmem:[%s6897_s15 + $0x68] sm:$0xf]  ;;  %v6211_v47 = vld [vmem:[#allocation8 + $0x40] ss:$8 sps:$4 sm:$0xff]   ;;  %v6212_v48 = vld [vmem:[#allocation8 + $0x54] ss:$8 sps:$4 sm:$0xff]   ;;  %v7055_v53 = vcombine.low %v7016_v40, %v7019_v41  ;;  %v7061_v56 = vcombine.low %v7024_v43, %v7024_v43 }
  0xa6   : > { %606 = vrot.lane.b32.xlu0 %v6944_v12, %s6620_s27  ;;  %608 = vrot.lane.b32.xlu1 %v6958_v16, %s6620_s27  ;;  %v7043_v49 = vld [vmem:[%s6897_s15 + $0x60] sm:$0xff]   ;;  %v7049_v50 = vcombine.low %v7013_v38, %v7013_v38  ;;  %v6215_v52 = vld [vmem:[#allocation8 + $0x64] ss:$8 sps:$4 sm:$0xff]   ;;  %v6217_v54 = vld [vmem:[#allocation8 + $0x60] ss:$8 sps:$4 sm:$0xff]  }
  0xa7   : > { %1223 = vmatprep.subr.bf16.mxu0 %v6206_v34  ;;  %v6214_v51 = vld [vmem:[#allocation8 + $0x50] ss:$8 sps:$4 sm:$0xff]   ;;  %v6218_v55 = vld [vmem:[#allocation8 + $0x74] ss:$8 sps:$4 sm:$0xff]   ;;  %v7067_v59 = vld [vmem:[%s6897_s15 + $0x78] sm:$0xff]  }
  0xa8   : > { %v7064_v57 = vld [vmem:[%s6897_s15 + $0x80] sm:$0xf]  ;;  %v7070_v60 = vld [vmem:[%s6897_s15 + $0x110] sm:$0xf]  ;;  %v7073_v61 = vld [vmem:[%s6897_s15 + $0x114] sm:$0xf] }
  0xa9   : > { %1224 = vmatpush1.bf16.msra.mxu0 %v6208_v37  ;;  %v6222_v58 = vld [vmem:[#allocation8 + $0x70] ss:$8 sps:$4 sm:$0xff]   ;;  %v7078_v62 = vld [vmem:[%s6897_s15 + $0x118] sm:$0xf]  ;;  %v7083_v20 = vld [vmem:[%s6897_s15 + $0x11c] sm:$0xf]  ;;  %v5746_v22 = vcombine.low %v7064_v57, %v7064_v57 }
  0xaa   : > { %610 = vrot.lane.b32.xlu0 %v6963_v18, %s6620_s27  ;;  %612 = vrot.lane.b32.xlu1 %v6980_v26, %s6620_s27  ;;  %v6225_v21 = vld [vmem:[#allocation8 + $0x84] ss:$8 sps:$4 sm:$0xff]   ;;  %v7095_v33 = vld [vmem:[%s6897_s15 + $0x128] sm:$0xf]  ;;  %v6227_v34 = vld [vmem:[#allocation8 + $0x80] ss:$8 sps:$4 sm:$0xff]  }
  0xab   : > { %1225 = vmatprep.subr.bf16.mxu0 %v6209_v39  ;;  %v7092_v30 = vld [vmem:[%s6897_s15 + $0xfc] sm:$0xff]   ;;  %v7098_v37 = vld [vmem:[%s6897_s15 + $0x104] ss:$0 sps:$4 sm:$0xff]   ;;  %v7148_v63 = vcombine.low %v7095_v33, %v7095_v33  ;;  %v7182_v29 = vld [vmem:[%s6897_s15 + $0x148] sm:$0xf] }
  0xac   : > { %v6231_v39 = vld [vmem:[#allocation8 + $0x94] ss:$8 sps:$4 sm:$0xff]   ;;  %v6233_v25 = vld [vmem:[#allocation8 + $0x90] ss:$8 sps:$4 sm:$0xff]   ;;  %9101 = vst [vmem:[#allocation26_spill] sm:$0xff] %v7182_v29 }
  0xad   : > { %1226 = vmatpush1.bf16.msra.mxu0 %v6211_v47  ;;  %v7103_v47 = vld [vmem:[%s6897_s15 + $0x12c] sm:$0xf]  ;;  %9095 = vst [vmem:[#allocation20_spill] sm:$0xff] %v7148_v63  ;;  %v7163_v45 = vld [vmem:[%s6897_s15 + $0x140] sm:$0xf] }
  0xae   : > { %614 = vrot.lane.b32.xlu0 %v6993_v31, %s6620_s27  ;;  %616 = vrot.lane.b32.xlu1 %v6999_v32, %s6620_s27  ;;  %9098 = vst [vmem:[#allocation23_spill] sm:$0xff] %v7163_v45  ;;  %v7179_v42 = vld [vmem:[%s6897_s15 + $0x144] sm:$0xf]  ;;  %v7185_v27 = vld [vmem:[%s6897_s15 + $0x14c] sm:$0xf] }
  0xaf   : > { %1227 = vmatprep.subr.bf16.mxu0 %v6212_v48  ;;  %v7106_v48 = vld [vmem:[%s6897_s15 + $0x130] sm:$0xf]  ;;  %9100 = vst [vmem:[#allocation25_spill] sm:$0xff] %v7179_v42  ;;  %9102 = vst [vmem:[#allocation27_spill] sm:$0xff] %v7185_v27  ;;  %v7191_v17 = vcombine.low %v7179_v42, %v7182_v29  ;;  %v7197_v9 = vcombine.low %v7185_v27, %v7185_v27  ;;  %v7220_v8 = vld [vmem:[%s6897_s15 + $0x15c] sm:$0xf] }
  0xb0   : > { %9108 = vst [vmem:[#allocation33_spill] sm:$0xff] %v7220_v8  ;;  %v7245_v42 = vld [vmem:[%s6897_s15 + $0x170] sm:$0xf]  ;;  %v6240_v29 = vld [vmem:[%s6897_s15] sm:$0xff]   ;;  %vm2803_vm5 = vsmask.f32 7938 }
  0xb1   : > { %1228 = vmatpush1.bf16.msra.mxu0 %v6214_v51  ;;  %v7109_v51 = vld [vmem:[%s6897_s15 + $0x134] sm:$0xf]  ;;  %9103 = vst [vmem:[#allocation28_spill] sm:$0xff] %v7191_v17  ;;  %9104 = vst [vmem:[#allocation29_spill] sm:$0xff] %v7197_v9  ;;  %vm2399_vm7 = vsmask.f32 256 }
  0xb2   : > { %618 = vrot.lane.b32.xlu0 %v7004_v35, %s6620_s27  ;;  %620 = vrot.lane.b32.xlu1 %v7010_v36, %s6620_s27  ;;  %9113 = vst [vmem:[#allocation38_spill] sm:$0xff] %v7245_v42  ;;  %vm7617_vm8 = vmand %vm2802_vm4, %vm2803_vm5  ;;  %vm2400_vm10 = vsmask.f32 4368 }
  0xb3   : > { %1229 = vmatprep.subr.bf16.mxu0 %v6215_v52  ;;  %v7142_v52 = vld [vmem:[%s6897_s15 + $0x120] sm:$0xff]   ;;  %vm7635_vm11 = vmand %vm2810_vm9, %vm2399_vm7 }
  0xb4   : > { %vm7645_vm12 = vmor %vm2399_vm7, %vm2400_vm10 }
  0xb5   : > { %1230 = vmatpush1.bf16.msra.mxu0 %v6217_v54  ;;  %v6236_v54 = vld [vmem:[#allocation8 + $0xa0] ss:$8 sps:$4 sm:$0xff]  }
  0xb6   : > { %622 = vrot.lane.b32.xlu0 %v7030_v44, %s6620_s27  ;;  %624 = vrot.lane.b32.xlu1 %v7038_v46, %s6620_s27 }
  0xb7   : > { %1231 = vmatprep.subr.bf16.mxu0 %v6218_v55  ;;  %v7119_v55 = vld [vmem:[%s6897_s15 + $0x108] sm:$0xff]  }
  0xb9   : > { %1232 = vmatpush1.bf16.msra.mxu0 %v6222_v58  ;;  %v7125_v58 = vcombine.low %v7070_v60, %v7070_v60 }
  0xba   : > { %626 = vrot.lane.b32.xlu0 %v7043_v49, %s6620_s27  ;;  %628 = vrot.lane.b32.xlu1 %v7049_v50, %s6620_s27 }
  0xbb   : > { %1233 = vmatprep.subr.bf16.mxu0 %v6225_v21  ;;  %v6234_v21 = vld [vmem:[#allocation8 + $0xa4] ss:$8 sps:$4 sm:$0xff]  }
  0xbd   : > { %1234 = vmatpush1.bf16.msra.mxu0 %v6227_v34  ;;  %v7137_v34 = vcombine.low %v7083_v20, %v7083_v20 }
  0xbe   : > { %630 = vrot.lane.b32.xlu0 %v7055_v53, %s6620_s27  ;;  %632 = vrot.lane.b32.xlu1 %v7061_v56, %s6620_s27 }
  0xbf   : > { %1235 = vmatprep.subr.bf16.mxu0 %v6231_v39  ;;  %v6237_v39 = vld [vmem:[#allocation8 + $0xb4] ss:$8 sps:$4 sm:$0xff]  }
  0xc1   : > { %1236 = vmatpush1.bf16.msra.mxu0 %v6233_v25  ;;  %v6239_v25 = vld [vmem:[#allocation8 + $0xb0] ss:$8 sps:$4 sm:$0xff]  }
  0xc2   : > { %634 = vrot.lane.b32.xlu0 %v7067_v59, %s6620_s27  ;;  %636 = vrot.lane.b32.xlu1 %v5746_v22, %s6620_s27  ;;  %v7131_v22 = vcombine.low %v7073_v61, %v7078_v62 }
  0xc3   : > { %1237 = vmatprep.subr.bf16.mxu0 %v6234_v21  ;;  %v7154_v21 = vcombine.low %v7103_v47, %v7106_v48 }
  0xc5   : > { %1238 = vmatpush1.bf16.msra.mxu0 %v6236_v54  ;;  %9096 = vst [vmem:[#allocation21_spill] sm:$0xff] %v7154_v21  ;;  %v7160_v54 = vcombine.low %v7109_v51, %v7109_v51 }
  0xc6   : > { %638 = vrot.lane.b32.xlu0 %v7092_v30, %s6620_s27  ;;  %640 = vrot.lane.b32.xlu1 %v7098_v37, %s6620_s27 }
  0xc7   : > { %1239 = vmatprep.subr.bf16.mxu0 %v6237_v39  ;;  %9097 = vst [vmem:[#allocation22_spill] sm:$0xff] %v7160_v54  ;;  %v7168_v39 = vld [vmem:[%s6897_s15 + $0x138] sm:$0xff]  }
  0xc9   : > { %1240 = vmatpush1.bf16.msra.mxu0 %v6239_v25  ;;  %v7174_v25 = vcombine.low %v7163_v45, %v7163_v45  ;;  %v5748_v45 = vcombine.low %v7245_v42, %v7245_v42  ;;  %v9115_v42 = vcombine.low %v6908_v2, %v6920_v5 }
  0xca   : > { %642 = vrot.lane.b32.xlu0 %v7119_v55, %s6620_s27  ;;  %644 = vrot.lane.b32.xlu1 %v7125_v58, %s6620_s27 }
  0xcb   : > { %9099 = vst [vmem:[#allocation24_spill] sm:$0xff] %v7174_v25 }
  0xce   : > { %646 = vrot.lane.b32.xlu0 %v7131_v22, %s6620_s27  ;;  %648 = vrot.lane.b32.xlu1 %v7137_v34, %s6620_s27 }
  0xd2   : > { %650 = vrot.lane.b32.xlu0 %v7142_v52, %s6620_s27  ;;  %652 = vrot.lane.b32.xlu1 %v7148_v63, %s6620_s27 }
  0xd6   : > { %654 = vrot.lane.b32.xlu0 %v7154_v21, %s6620_s27  ;;  %656 = vrot.lane.b32.xlu1 %v7160_v54, %s6620_s27  ;;  %v7213_v54 = vld [vmem:[%s6897_s15 + $0x150] sm:$0xff]   ;;  %v7250_v21 = vld [vmem:[%s6897_s15 + $0x168] sm:$0xff]  }
  0xd7   : > { %9107 = vst [vmem:[#allocation32_spill] sm:$0xff] %v7213_v54  ;;  %9114 = vst [vmem:[#allocation39_spill] sm:$0xff] %v7250_v21 }
  0xda   : > { %658 = vrot.lane.b32.xlu0 %v7168_v39, %s6620_s27  ;;  %660 = vrot.lane.b32.xlu1 %v7174_v25, %s6620_s27  ;;  %v7206_v25 = vld [vmem:[%s6897_s15 + $0x158] sm:$0xf] }
  0xdb   : > { %9105 = vst [vmem:[#allocation30_spill] sm:$0xff] %v7206_v25  ;;  %v7210_v14 = vcombine.low %v7206_v25, %v7206_v25 }
  0xdd   : > { %9106 = vst [vmem:[#allocation31_spill] sm:$0xff] %v7210_v14 }
  0xde   : > { %662 = vrot.lane.b32.xlu0 %v7191_v17, %s6620_s27  ;;  %664 = vrot.lane.b32.xlu1 %v7197_v9, %s6620_s27  ;;  %v7223_v17 = vld [vmem:[%s6897_s15 + $0x160] sm:$0xf]  ;;  %v7226_v9 = vld [vmem:[%s6897_s15 + $0x164] sm:$0xf] }
  0xdf   : > { %9109 = vst [vmem:[#allocation34_spill] sm:$0xff] %v7223_v17  ;;  %9110 = vst [vmem:[#allocation35_spill] sm:$0xff] %v7226_v9  ;;  %v7230_v27 = vcombine.low %v7220_v8, %v7223_v17  ;;  %v6242_v17 = vld [vmem:[%s6897_s15 + $0x8] ss:$0 sps:$4 sm:$0xff]  }
  0xe1   : > { %9111 = vst [vmem:[#allocation36_spill] sm:$0xff] %v7230_v27 }
  0xe2   : > { %668 = vrot.lane.b32.xlu1 %v7210_v14, %s6620_s27  ;;  %666 = vrot.lane.b32.xlu0 %v7213_v54, %s6620_s27  ;;  %v7236_v14 = vcombine.low %v7226_v9, %v7226_v9 }
  0xe4   : > { %9112 = vst [vmem:[#allocation37_spill] sm:$0xff] %v7236_v14 }
  0xe6   : > { %670 = vrot.lane.b32.xlu0 %v7230_v27, %s6620_s27  ;;  %672 = vrot.lane.b32.xlu1 %v7236_v14, %s6620_s27 }
  0xea   : > { %676 = vrot.lane.b32.xlu1 %v5748_v45, %s6620_s27  ;;  %674 = vrot.lane.b32.xlu0 %v7250_v21, %s6620_s27 }
 0x110   : > { %v599_v54 = vpop.permute.xlu0 %598  ;;  %v603_v9 = vpop.permute.xlu1 %602 }
 0x111   : > { %v693_v27 = vsel %vm690_vm0, %v6240_v29, %v599_v54  ;;  %v699_v14 = vsel %vm690_vm0, %v6900_v0, %v603_v9 }
 0x112   : > { %1250 = vmatmul.mubr.bf16.vlgmr.msra.gmra.mrb[0].mxu0 %v693_v27  ;;  %v9116_v27 = vcombine.low %v6923_v6, %v6926_v7  ;;  %v855_v0 = vunpack.c.h.b16 %v699_v14  ;;  %v9117_v7 = vcombine.low %v6935_v10, %v6938_v11 }
 0x113   : > { %5804 = vmatprep.mubr.msk.bf16.mxu0 %vm690_vm0, %v9115_v42 }
 0x114   : > { %v601_v8 = vpop.permute.xlu0 %600  ;;  %v605_v25 = vpop.permute.xlu1 %604 }
 0x115   : > { %v696_v45 = vsel %vm690_vm0, %v6242_v17, %v601_v8  ;;  %v702_v63 = vsel %vm690_vm0, %v6911_v3, %v605_v25 }
 0x116   : > { %v5749_v21 = vcombine.low %v696_v45, %v699_v14  ;;  %v856_v9 = vunpack.c.l.b16 %v702_v63 }
 0x118   : > { %v938_v29 = vpack.c.b16 %v856_v9, %v855_v0  ;;  %v607_v2 = vpop.permute.xlu0 %606  ;;  %v609_v8 = vpop.permute.xlu1 %608 }
 0x119   : > { %v705_v5 = vsel %vm690_vm0, %v6903_v1, %v607_v2  ;;  %v708_v3 = vsel %vm690_vm0, %v6917_v4, %v609_v8  ;;  %v9118_v1 = vcombine.low %v6947_v13, %v6952_v15  ;;  %v9119_v15 = vcombine.low %v6966_v19, %v6971_v23 }
 0x11a   : > { %1260 = vmatmul.mubr.bf16.gmra.mrb[4].mxu0 %v5749_v21  ;;  %v9121_v2 = vcombine.low %v7013_v38, %v7016_v40  ;;  %v383_v38 = vld [vmem:[%s6897_s15 + $0x84] sm:$0xf] }
 0x11b   : > { %5805 = vmatprep.mubr.msk.bf16.mxu0 %vm690_vm0, %v9116_v27 }
 0x11c   : > { %v611_v17 = vpop.permute.xlu0 %610  ;;  %v613_v14 = vpop.permute.xlu1 %612 }
 0x11d   : > { %v711_v6 = vsel %vm690_vm0, %v6944_v12, %v611_v17  ;;  %v714_v63 = vsel %vm690_vm0, %v6958_v16, %v613_v14  ;;  %v9122_v17 = vcombine.low %v7019_v41, %v7024_v43 }
 0x11e   : > { %v5752_v42 = vcombine.low %v708_v3, %v711_v6  ;;  %v862_v4 = vunpack.c.l.b16 %v714_v63  ;;  %v861_v21 = vunpack.c.h.b16 %v711_v6  ;;  %v5762_v6 = vcombine.low %v7064_v57, %v383_v38  ;;  %v6271_v63 = vld [vmem:[%s6897_s15 + $0x88] sm:$0xff]  }
 0x120   : > { %v943_v54 = vpack.c.b16 %v862_v4, %v861_v21  ;;  %v615_v10 = vpop.permute.xlu0 %614  ;;  %v617_v12 = vpop.permute.xlu1 %616  ;;  %v6272_v21 = vld [vmem:[%s6897_s15 + $0xf8] ss:$0 sps:$4 sm:$0xff]  }
 0x121   : > { %v717_v11 = vsel %vm690_vm0, %v6963_v18, %v615_v10  ;;  %v720_v16 = vsel %vm690_vm0, %v6980_v26, %v617_v12 }
 0x122   : > { %1270 = vmatmul.mubr.bf16.gmra.mrb[8].mxu0 %v938_v29 }
 0x123   : > { %5806 = vmatprep.mubr.msk.bf16.mxu0 %vm690_vm0, %v6963_v18  ;;  %v9120_v18 = vcombine.low %v6974_v24, %v6985_v28 }
 0x124   : > { %v619_v25 = vpop.permute.xlu0 %618  ;;  %v621_v45 = vpop.permute.xlu1 %620 }
 0x125   : > { %v723_v13 = vsel %vm690_vm0, %v6993_v31, %v619_v25  ;;  %v726_v0 = vsel %vm690_vm0, %v6999_v32, %v621_v45  ;;  %v9123_v25 = vcombine.low %v7070_v60, %v7073_v61  ;;  %v9124_v45 = vcombine.low %v7078_v62, %v7083_v20 }
 0x126   : > { %v5755_v27 = vcombine.low %v720_v16, %v723_v13  ;;  %v868_v26 = vunpack.c.l.b16 %v726_v0  ;;  %v867_v9 = vunpack.c.h.b16 %v723_v13  ;;  %v9125_v20 = vcombine.low %v7095_v33, %v7103_v47 }
 0x128   : > { %v948_v29 = vpack.c.b16 %v868_v26, %v867_v9  ;;  %v623_v19 = vpop.permute.xlu0 %622  ;;  %v625_v31 = vpop.permute.xlu1 %624 }
 0x129   : > { %v729_v23 = vsel %vm690_vm0, %v7004_v35, %v623_v19  ;;  %v732_v24 = vsel %vm690_vm0, %v7010_v36, %v625_v31 }
 0x12a   : > { %1280 = vmatmul.mubr.bf16.gmra.mrb[12].mxu0 %v705_v5 }
 0x12b   : > { %5807 = vmatprep.mubr.msk.bf16.mxu0 %vm690_vm0, %v9117_v7 }
 0x12c   : > { %v627_v32 = vpop.permute.xlu0 %626  ;;  %v629_v5 = vpop.permute.xlu1 %628 }
 0x12d   : > { %v735_v28 = vsel %vm690_vm0, %v7030_v44, %v627_v32 }
 0x12e   : > { %v5758_v8 = vcombine.low %v732_v24, %v735_v28  ;;  %v873_v3 = vunpack.c.h.b16 %v735_v28  ;;  %v9129_v28 = vld [vmem:[#allocation23_spill] sm:$0xff] }
 0x130   : > { %v631_v40 = vpop.permute.xlu0 %630  ;;  %v633_v7 = vpop.permute.xlu1 %632 }
 0x131   : > { %v744_v41 = vsel %vm690_vm0, %v7049_v50, %v633_v7  ;;  %v6273_v50 = vld [vmem:[%s6897_s15 + $0xf0] sm:$0xff]  }
 0x132   : > { %1290 = vmatmul.mubr.bf16.gmra.mrb[16].mxu0 %v5752_v42 }
 0x133   : > { %5808 = vmatprep.mubr.msk.bf16.mxu0 %vm690_vm0, %v9118_v1 }
 0x134   : > { %v635_v14 = vpop.permute.xlu0 %634 }
 0x135   : > { %v747_v43 = vsel %vm690_vm0, %v7055_v53, %v635_v14 }
 0x136   : > { %v5761_v42 = vcombine.low %v744_v41, %v747_v43  ;;  %v879_v1 = vunpack.c.h.b16 %v747_v43 }
 0x138   : > { %v639_v53 = vpop.permute.xlu0 %638 }
 0x13a   : > { %1300 = vmatmul.mubr.bf16.gmra.mrb[20].mxu0 %v943_v54  ;;  %v753_v54 = vsel %vm690_vm0, %v6273_v50, %v639_v53 }
 0x13b   : > { %5809 = vmatprep.mubr.msk.bf16.mxu0 %vm690_vm0, %v7004_v35  ;;  %v738_v35 = vsel %vm690_vm0, %v7038_v46, %v629_v5  ;;  %v741_v46 = vsel %vm690_vm0, %v7043_v49, %v631_v40 }
 0x13c   : > { %v874_v36 = vunpack.c.l.b16 %v738_v35 }
 0x13e   : > { %v953_v44 = vpack.c.b16 %v874_v36, %v873_v3  ;;  %v9134_v3 = vld [vmem:[#allocation27_spill] sm:$0xff] }
 0x142   : > { %1310 = vmatmul.mubr.bf16.gmra.mrb[24].mxu0 %v717_v11  ;;  %v643_v11 = vpop.permute.xlu0 %642 }
 0x143   : > { %5810 = vmatprep.mubr.msk.bf16.mxu0 %vm690_vm0, %v9119_v15  ;;  %v759_v12 = vsel %vm690_vm0, %v7092_v30, %v643_v11 }
 0x144   : > { %v885_v0 = vunpack.c.h.b16 %v759_v12 }
 0x146   : > { %v647_v60 = vpop.permute.xlu0 %646 }
 0x147   : > { %v765_v61 = vsel %vm690_vm0, %v7119_v55, %v647_v60 }
 0x14a   : > { %1320 = vmatmul.mubr.bf16.gmra.mrb[28].mxu0 %v5755_v27  ;;  %v651_v26 = vpop.permute.xlu0 %650 }
 0x14b   : > { %5811 = vmatprep.mubr.msk.bf16.mxu0 %vm690_vm0, %v9120_v18  ;;  %v771_v62 = vsel %vm690_vm0, %v7131_v22, %v651_v26 }
 0x14e   : > { %v655_v33 = vpop.permute.xlu0 %654 }
 0x14f   : > { %v777_v47 = vsel %vm690_vm0, %v7142_v52, %v655_v33 }
 0x152   : > { %1330 = vmatmul.mubr.bf16.gmra.mrb[32].mxu0 %v948_v29  ;;  %v659_v32 = vpop.permute.xlu0 %658 }
 0x153   : > { %5812 = vmatprep.mubr.msk.bf16.mxu0 %vm690_vm0, %v7043_v49 }
 0x156   : > { %v663_v7 = vpop.permute.xlu0 %662 }
 0x157   : > { %v789_v14 = vsel %vm690_vm0, %v7168_v39, %v663_v7 }
 0x15a   : > { %1340 = vmatmul.mubr.bf16.gmra.mrb[36].mxu0 %v729_v23  ;;  %v891_v23 = vunpack.c.h.b16 %v771_v62  ;;  %v667_v43 = vpop.permute.xlu0 %666 }
 0x15b   : > { %5813 = vmatprep.mubr.msk.bf16.mxu0 %vm690_vm0, %v9121_v2  ;;  %v9130_v2 = vld [vmem:[#allocation25_spill] sm:$0xff] }
 0x15c   : > { %v9131_v5 = vcombine.low %v9129_v28, %v9130_v2  ;;  %v6274_v28 = vld [vmem:[%s6897_s15 + $0x178] sm:$0xff]  }
 0x162   : > { %1350 = vmatmul.mubr.bf16.gmra.mrb[40].mxu0 %v5758_v8 }
 0x163   : > { %5814 = vmatprep.mubr.msk.bf16.mxu0 %vm690_vm0, %v9122_v17  ;;  %v9132_v17 = vld [vmem:[#allocation22_spill] sm:$0xff] }
 0x16a   : > { %1360 = vmatmul.mubr.bf16.gmra.mrb[44].mxu0 %v953_v44 }
 0x16b   : > { %5815 = vmatprep.mubr.msk.bf16.mxu0 %vm690_vm0, %v7067_v59  ;;  %v637_v59 = vpop.permute.xlu1 %636 }
 0x16c   : > { %v750_v57 = vsel %vm690_vm0, %v7061_v56, %v637_v59  ;;  %v9137_v59 = vld [vmem:[#allocation24_spill] sm:$0xff] }
 0x16d   : > { %v880_v49 = vunpack.c.l.b16 %v750_v57 }
 0x16f   : > { %v958_v4 = vpack.c.b16 %v880_v49, %v879_v1  ;;  %v641_v10 = vpop.permute.xlu1 %640  ;;  %v9139_v49 = vld [vmem:[#allocation30_spill] sm:$0xff]  ;;  %v9140_v1 = vld [vmem:[#allocation33_spill] sm:$0xff] }
 0x170   : > { %v756_v56 = vsel %vm690_vm0, %v6272_v21, %v641_v10  ;;  %v9142_v21 = vld [vmem:[#allocation29_spill] sm:$0xff]  ;;  %v9144_v10 = vld [vmem:[#allocation35_spill] sm:$0xff] }
 0x171   : > { %v5764_v13 = vcombine.low %v756_v56, %v759_v12 }
 0x172   : > { %1370 = vmatmul.mubr.bf16.gmra.mrb[48].mxu0 %v741_v46  ;;  %v9136_v46 = vld [vmem:[#allocation32_spill] sm:$0xff] }
 0x173   : > { %5816 = vmatprep.mubr.msk.bf16.mxu0 %vm690_vm0, %v5762_v6  ;;  %v645_v16 = vpop.permute.xlu1 %644 }
 0x174   : > { %v762_v15 = vsel %vm690_vm0, %v7098_v37, %v645_v16  ;;  %v9146_v16 = vld [vmem:[#allocation39_spill] sm:$0xff] }
 0x175   : > { %v886_v27 = vunpack.c.l.b16 %v762_v15  ;;  %v671_v15 = vpop.permute.xlu0 %670 }
 0x177   : > { %v963_v18 = vpack.c.b16 %v886_v27, %v885_v0  ;;  %v649_v30 = vpop.permute.xlu1 %648  ;;  %v9147_v0 = vld [vmem:[#allocation38_spill] sm:$0xff] }
 0x178   : > { %v768_v37 = vsel %vm690_vm0, %v7125_v58, %v649_v30  ;;  %v801_v30 = vsel %vm690_vm0, %v9136_v46, %v671_v15 }
 0x179   : > { %v5767_v29 = vcombine.low %v768_v37, %v771_v62 }
 0x17a   : > { %1380 = vmatmul.mubr.bf16.gmra.mrb[52].mxu0 %v5761_v42 }
 0x17b   : > { %5817 = vmatprep.mubr.msk.bf16.mxu0 %vm690_vm0, %v6271_v63  ;;  %v653_v9 = vpop.permute.xlu1 %652  ;;  %v9138_v63 = vld [vmem:[#allocation28_spill] sm:$0xff] }
 0x17c   : > { %v774_v19 = vsel %vm690_vm0, %v7137_v34, %v653_v9  ;;  %v9127_v34 = vld [vmem:[#allocation20_spill] sm:$0xff]  ;;  %v795_v57 = vsel %vm690_vm0, %v9138_v63, %v667_v43 }
 0x17d   : > { %v892_v58 = vunpack.c.l.b16 %v774_v19  ;;  %v903_v12 = vunpack.c.h.b16 %v795_v57 }
 0x17f   : > { %v968_v31 = vpack.c.b16 %v892_v58, %v891_v23  ;;  %v657_v22 = vpop.permute.xlu1 %656  ;;  %v9149_v23 = vld [vmem:[#allocation36_spill] sm:$0xff] }
 0x180   : > { %v780_v24 = vsel %vm690_vm0, %v9127_v34, %v657_v22 }
 0x182   : > { %1390 = vmatmul.mubr.bf16.gmra.mrb[56].mxu0 %v958_v4  ;;  %v9141_v4 = vcombine.low %v9139_v49, %v9140_v1 }
 0x183   : > { %5818 = vmatprep.mubr.msk.bf16.mxu0 %vm690_vm0, %v7119_v55  ;;  %v9126_v55 = vcombine.low %v7106_v48, %v7109_v51  ;;  %v9128_v48 = vld [vmem:[#allocation21_spill] sm:$0xff]  ;;  %v661_v8 = vpop.permute.xlu1 %660 }
 0x184   : > { %v783_v51 = vsel %vm690_vm0, %v9128_v48, %v659_v32  ;;  %v786_v36 = vsel %vm690_vm0, %v9132_v17, %v661_v8  ;;  %v9150_v8 = vld [vmem:[#allocation37_spill] sm:$0xff] }
 0x185   : > { %v5770_v35 = vcombine.low %v780_v24, %v783_v51  ;;  %v898_v38 = vunpack.c.l.b16 %v786_v36  ;;  %v897_v40 = vunpack.c.h.b16 %v783_v51 }
 0x187   : > { %v973_v6 = vpack.c.b16 %v898_v38, %v897_v40  ;;  %v665_v41 = vpop.permute.xlu1 %664 }
 0x188   : > { %v792_v42 = vsel %vm690_vm0, %v9137_v59, %v665_v41 }
 0x189   : > { %v5773_v53 = vcombine.low %v792_v42, %v795_v57 }
 0x18a   : > { %1400 = vmatmul.mubr.bf16.gmra.mrb[60].mxu0 %v753_v54  ;;  %v9143_v54 = vld [vmem:[#allocation34_spill] sm:$0xff] }
 0x18b   : > { %5819 = vmatprep.mubr.msk.bf16.mxu0 %vm690_vm0, %v9123_v25  ;;  %v669_v50 = vpop.permute.xlu1 %668  ;;  %v9145_v11 = vcombine.low %v9143_v54, %v9144_v10 }
 0x192   : > { %1410 = vmatmul.mubr.bf16.gmra.mrb[64].mxu0 %v5764_v13  ;;  %v419_v13 = vld [vmem:[%s6897_s15 + $0x174] sm:$0xf] }
 0x193   : > { %5820 = vmatprep.mubr.msk.bf16.mxu0 %vm690_vm0, %v9124_v45 }
 0x19a   : > { %1420 = vmatmul.mubr.bf16.gmra.mrb[68].mxu0 %v963_v18  ;;  %v5777_v18 = vcombine.low %v9147_v0, %v419_v13 }
 0x19b   : > { %5821 = vmatprep.mubr.msk.bf16.mxu0 %vm690_vm0, %v7142_v52  ;;  %v9133_v52 = vld [vmem:[#allocation26_spill] sm:$0xff] }
 0x19c   : > { %v9135_v44 = vcombine.low %v9133_v52, %v9134_v3 }
 0x1a2   : > { %1430 = vmatmul.mubr.bf16.gmra.mrb[72].mxu0 %v765_v61  ;;  %v673_v61 = vpop.permute.xlu1 %672 }
 0x1a3   : > { %5822 = vmatprep.mubr.msk.bf16.mxu0 %vm690_vm0, %v9125_v20  ;;  %v675_v20 = vpop.permute.xlu0 %674 }
 0x1a6   : > { %v677_v32 = vpop.permute.xlu1 %676 }
 0x1aa   : > { %1440 = vmatmul.mubr.bf16.gmra.mrb[76].mxu0 %v5767_v29 }
 0x1ab   : > { %5823 = vmatprep.mubr.msk.bf16.mxu0 %vm690_vm0, %v9126_v55  ;;  %v9148_v55 = vld [vmem:[#allocation31_spill] sm:$0xff] }
 0x1ac   : > { %v804_v58 = vsel %vm690_vm0, %v9148_v55, %v673_v61 }
 0x1b2   : > { %1450 = vmatmul.mubr.bf16.gmra.mrb[80].mxu0 %v968_v31  ;;  %v807_v31 = vsel %vm690_vm0, %v9149_v23, %v675_v20 }
 0x1b3   : > { %5824 = vmatprep.mubr.msk.bf16.mxu0 %vm690_vm0, %v7168_v39  ;;  %v798_v39 = vsel %vm690_vm0, %v9142_v21, %v669_v50  ;;  %v5776_v34 = vcombine.low %v804_v58, %v807_v31  ;;  %v909_v52 = vunpack.c.h.b16 %v807_v31 }
 0x1b4   : > { %v904_v56 = vunpack.c.l.b16 %v798_v39 }
 0x1b6   : > { %v978_v25 = vpack.c.b16 %v904_v56, %v903_v12 }
 0x1ba   : > { %1460 = vmatmul.mubr.bf16.gmra.mrb[84].mxu0 %v777_v47 }
 0x1bb   : > { %5825 = vmatprep.mubr.msk.bf16.mxu0 %vm690_vm0, %v9131_v5 }
 0x1c2   : > { %1470 = vmatmul.mubr.bf16.gmra.mrb[88].mxu0 %v5770_v35  ;;  %v810_v35 = vsel %vm690_vm0, %v9150_v8, %v677_v32 }
 0x1c3   : > { %5826 = vmatprep.mubr.msk.bf16.mxu0 %vm690_vm0, %v9135_v44  ;;  %v910_v36 = vunpack.c.l.b16 %v810_v35 }
 0x1c5   : > { %v983_v59 = vpack.c.b16 %v910_v36, %v909_v52 }
 0x1ca   : > { %1480 = vmatmul.mubr.bf16.gmra.mrb[92].mxu0 %v973_v6 }
 0x1cb   : > { %5827 = vmatprep.mubr.msk.bf16.mxu0 %vm690_vm0, %v9136_v46 }
 0x1d2   : > { %1490 = vmatmul.mubr.bf16.gmra.mrb[96].mxu0 %v789_v14 }
 0x1d3   : > { %5828 = vmatprep.mubr.msk.bf16.mxu0 %vm690_vm0, %v9141_v4 }
 0x1da   : > { %1500 = vmatmul.mubr.bf16.gmra.mrb[100].mxu0 %v5773_v53 }
 0x1db   : > { %5829 = vmatprep.mubr.msk.bf16.mxu0 %vm690_vm0, %v9145_v11 }
 0x1e2   : > { %1510 = vmatmul.mubr.bf16.gmra.mrb[104].mxu0 %v978_v25 }
 0x1e3   : > { %5830 = vmatprep.mubr.msk.bf16.mxu0 %vm690_vm0, %v9146_v16 }
 0x1e5   : > { %v7415_v45 = vpop.f32.mrb[0].mxu0 }
 0x1e6   : > { %v1253_v27 = vpop.f32.mrb[1].mxu0  ;;  %v1611_v26 = vrot.slane %v7415_v45, 1 }
 0x1e7   : > { %v7418_v60 = vpop.f32.mrb[2].mxu0  ;;  %v1932_v9 = vrot.slane %v1253_v27, 2 }
 0x1e8   : > { %v1612_v37 = vrot.slane %v7418_v60, 1  ;;  %v1257_v62 = vpop.f32.mrb[3].mxu0 }
 0x1e9   : > { %v1933_v29 = vrot.slane %v1257_v62, 2 }
 0x1ea   : > { %1520 = vmatmul.mubr.bf16.gmra.mrb[108].mxu0 %v801_v30  ;;  %v1613_v19 = vsel %vm1610_vm1, %v1611_v26, %v1612_v37 }
 0x1eb   : > { %1711 = vrot.lane.b32.xlu0 %v1613_v19, %s6620_s27  ;;  %5831 = vmatprep.mubr.msk.bf16.mxu0 %vm690_vm0, %v5777_v18  ;;  %v7432_v33 = vsel %vm1931_vm2, %v1932_v9, %v1933_v29 }
 0x1ed   : > { %v1261_v47 = vpop.f32.mrb[4].mxu0 }
 0x1ee   : > { %v1614_v22 = vrot.slane %v1261_v47, 1  ;;  %v1263_v24 = vpop.f32.mrb[5].mxu0 }
 0x1ef   : > { %v1935_v48 = vrot.slane %v1263_v24, 2  ;;  %v7434_v51 = vpop.f32.mrb[6].mxu0 }
 0x1f0   : > { %v1267_v2 = vpop.f32.mrb[7].mxu0  ;;  %v1615_v5 = vsel %vm1610_vm1, %v1612_v37, %v1614_v22  ;;  %v1616_v44 = vrot.slane %v7434_v51, 1 }
 0x1f1   : > { %1713 = vrot.lane.b32.xlu1 %v1615_v5, %s6620_s27  ;;  %v7442_v17 = vsel %vm1931_vm2, %v1933_v29, %v1935_v48  ;;  %v1937_v6 = vrot.slane %v1267_v2, 2 }
 0x1f2   : > { %1530 = vmatmul.mubr.bf16.gmra.mrb[112].mxu0 %v5776_v34 }
 0x1f3   : > { %5832 = vmatprep.mubr.msk.bf16.mxu0 %vm690_vm0, %v6274_v28 }
 0x1f5   : > { %v7445_v3 = vpop.f32.mrb[8].mxu0 }
 0x1f6   : > { %v1617_v38 = vrot.slane %v7445_v3, 1  ;;  %v1273_v40 = vpop.f32.mrb[9].mxu0 }
 0x1f7   : > { %v1938_v46 = vrot.slane %v1273_v40, 2  ;;  %v1275_v7 = vpop.f32.mrb[10].mxu0 }
 0x1f8   : > { %v1619_v14 = vrot.slane %v1275_v7, 1  ;;  %v1277_v41 = vpop.f32.mrb[11].mxu0  ;;  %v1618_v43 = vsel %vm1610_vm1, %v1616_v44, %v1617_v38 }
 0x1f9   : > { %v1940_v42 = vrot.slane %v1277_v41, 2  ;;  %1715 = vrot.lane.b32.xlu0 %v1618_v43, %s6620_s27  ;;  %v7452_v63 = vsel %vm1931_vm2, %v1937_v6, %v1938_v46 }
 0x1fa   : > { %1540 = vmatmul.mubr.bf16.gmra.mrb[116].mxu0 %v983_v59  ;;  %v1620_v57 = vsel %vm1610_vm1, %v1617_v38, %v1619_v14 }
 0x1fb   : > { %1717 = vrot.lane.b32.xlu1 %v1620_v57, %s6620_s27  ;;  %v7457_v49 = vsel %vm1931_vm2, %v1938_v46, %v1940_v42 }
 0x1fd   : > { %v7459_v1 = vpop.f32.mrb[12].mxu0 }
 0x1fe   : > { %v1283_v4 = vpop.f32.mrb[13].mxu0  ;;  %v1621_v53 = vrot.slane %v7459_v1, 1 }
 0x1ff   : > { %v7461_v50 = vpop.f32.mrb[14].mxu0  ;;  %v1942_v54 = vrot.slane %v1283_v4, 2 }
 0x200   : > { %v1622_v21 = vrot.slane %v7461_v50, 1  ;;  %v1287_v39 = vpop.f32.mrb[15].mxu0 }
 0x201   : > { %v1943_v10 = vrot.slane %v1287_v39, 2 }
 0x202   : > { %v1623_v11 = vsel %vm1610_vm1, %v1621_v53, %v1622_v21 }
 0x203   : > { %1719 = vrot.lane.b32.xlu0 %v1623_v11, %s6620_s27  ;;  %v7468_v56 = vsel %vm1931_vm2, %v1942_v54, %v1943_v10 }
 0x205   : > { %v1291_v12 = vpop.f32.mrb[16].mxu0 }
 0x206   : > { %v1624_v25 = vrot.slane %v1291_v12, 1  ;;  %v1293_v16 = vpop.f32.mrb[17].mxu0 }
 0x207   : > { %v1945_v13 = vrot.slane %v1293_v16, 2  ;;  %v7470_v15 = vpop.f32.mrb[18].mxu0 }
 0x208   : > { %v1297_v27 = vpop.f32.mrb[19].mxu0  ;;  %v1625_v0 = vsel %vm1610_vm1, %v1622_v21, %v1624_v25  ;;  %v1626_v30 = vrot.slane %v7470_v15, 1 }
 0x209   : > { %1721 = vrot.lane.b32.xlu1 %v1625_v0, %s6620_s27  ;;  %v7475_v18 = vsel %vm1931_vm2, %v1943_v10, %v1945_v13  ;;  %v1947_v62 = vrot.slane %v1297_v27, 2 }
 0x20d   : > { %v7477_v61 = vpop.f32.mrb[20].mxu0 }
 0x20e   : > { %v1627_v26 = vrot.slane %v7477_v61, 1  ;;  %v1303_v37 = vpop.f32.mrb[21].mxu0 }
 0x20f   : > { %v1948_v20 = vrot.slane %v1303_v37, 2  ;;  %v1305_v9 = vpop.f32.mrb[22].mxu0 }
 0x210   : > { %v1629_v29 = vrot.slane %v1305_v9, 1  ;;  %v1307_v19 = vpop.f32.mrb[23].mxu0  ;;  %v1628_v55 = vsel %vm1610_vm1, %v1626_v30, %v1627_v26 }
 0x211   : > { %v1950_v58 = vrot.slane %v1307_v19, 2  ;;  %1723 = vrot.lane.b32.xlu0 %v1628_v55, %s6620_s27  ;;  %v7484_v23 = vsel %vm1931_vm2, %v1947_v62, %v1948_v20 }
 0x212   : > { %v1630_v31 = vsel %vm1610_vm1, %v1627_v26, %v1629_v29 }
 0x213   : > { %1725 = vrot.lane.b32.xlu1 %v1630_v31, %s6620_s27  ;;  %v7489_v47 = vsel %vm1931_vm2, %v1948_v20, %v1950_v58 }
 0x215   : > { %v7491_v22 = vpop.f32.mrb[24].mxu0 }
 0x216   : > { %v1313_v32 = vpop.f32.mrb[25].mxu0  ;;  %v1631_v24 = vrot.slane %v7491_v22, 1 }
 0x217   : > { %v7493_v34 = vpop.f32.mrb[26].mxu0  ;;  %v1952_v2 = vrot.slane %v1313_v32, 2 }
 0x218   : > { %v1632_v48 = vrot.slane %v7493_v34, 1  ;;  %v1317_v28 = vpop.f32.mrb[27].mxu0 }
 0x219   : > { %v1953_v5 = vrot.slane %v1317_v28, 2 }
 0x21a   : > { %v1633_v8 = vsel %vm1610_vm1, %v1631_v24, %v1632_v48 }
 0x21b   : > { %1727 = vrot.lane.b32.xlu0 %v1633_v8, %s6620_s27  ;;  %v7500_v35 = vsel %vm1931_vm2, %v1952_v2, %v1953_v5 }
 0x21d   : > { %v1321_v36 = vpop.f32.mrb[28].mxu0 }
 0x21e   : > { %v1634_v52 = vrot.slane %v1321_v36, 1  ;;  %v1323_v44 = vpop.f32.mrb[29].mxu0 }
 0x21f   : > { %v1955_v38 = vrot.slane %v1323_v44, 2  ;;  %v7502_v40 = vpop.f32.mrb[30].mxu0 }
 0x220   : > { %v1327_v6 = vpop.f32.mrb[31].mxu0  ;;  %v1635_v46 = vsel %vm1610_vm1, %v1632_v48, %v1634_v52  ;;  %v1636_v41 = vrot.slane %v7502_v40, 1 }
 0x221   : > { %1729 = vrot.lane.b32.xlu1 %v1635_v46, %s6620_s27  ;;  %v7507_v7 = vsel %vm1931_vm2, %v1953_v5, %v1955_v38  ;;  %v1957_v42 = vrot.slane %v1327_v6, 2 }
 0x225   : > { %v7509_v14 = vpop.f32.mrb[32].mxu0 }
 0x226   : > { %v1637_v43 = vrot.slane %v7509_v14, 1  ;;  %v1333_v59 = vpop.f32.mrb[33].mxu0 }
 0x227   : > { %v1958_v57 = vrot.slane %v1333_v59, 2  ;;  %v1335_v4 = vpop.f32.mrb[34].mxu0 }
 0x228   : > { %v1639_v53 = vrot.slane %v1335_v4, 1  ;;  %v1337_v21 = vpop.f32.mrb[35].mxu0  ;;  %v1638_v39 = vsel %vm1610_vm1, %v1636_v41, %v1637_v43 }
 0x229   : > { %v1960_v54 = vrot.slane %v1337_v21, 2  ;;  %1731 = vrot.lane.b32.xlu0 %v1638_v39, %s6620_s27  ;;  %v7516_v10 = vsel %vm1931_vm2, %v1957_v42, %v1958_v57 }
 0x22a   : > { %v1640_v11 = vsel %vm1610_vm1, %v1637_v43, %v1639_v53 }
 0x22b   : > { %1733 = vrot.lane.b32.xlu1 %v1640_v11, %s6620_s27  ;;  %v7521_v12 = vsel %vm1931_vm2, %v1958_v57, %v1960_v54 }
 0x22d   : > { %v7523_v25 = vpop.f32.mrb[36].mxu0 }
 0x22e   : > { %v1343_v16 = vpop.f32.mrb[37].mxu0  ;;  %v1641_v27 = vrot.slane %v7523_v25, 1 }
 0x22f   : > { %v7525_v13 = vpop.f32.mrb[38].mxu0  ;;  %v1962_v26 = vrot.slane %v1343_v16, 2 }
 0x230   : > { %v1642_v0 = vrot.slane %v7525_v13, 1  ;;  %v1347_v30 = vpop.f32.mrb[39].mxu0 }
 0x231   : > { %v1963_v37 = vrot.slane %v1347_v30, 2 }
 0x232   : > { %v1643_v62 = vsel %vm1610_vm1, %v1641_v27, %v1642_v0 }
 0x233   : > { %1735 = vrot.lane.b32.xlu0 %v1643_v62, %s6620_s27  ;;  %v7532_v20 = vsel %vm1931_vm2, %v1962_v26, %v1963_v37 }
 0x235   : > { %v1351_v9 = vpop.f32.mrb[40].mxu0 }
 0x236   : > { %v1644_v29 = vrot.slane %v1351_v9, 1  ;;  %v1353_v19 = vpop.f32.mrb[41].mxu0 }
 0x237   : > { %v1965_v55 = vrot.slane %v1353_v19, 2  ;;  %v7534_v58 = vpop.f32.mrb[42].mxu0 }
 0x238   : > { %v1357_v31 = vpop.f32.mrb[43].mxu0  ;;  %v1645_v32 = vsel %vm1610_vm1, %v1642_v0, %v1644_v29  ;;  %v1646_v28 = vrot.slane %v7534_v58, 1 }
 0x239   : > { %1737 = vrot.lane.b32.xlu1 %v1645_v32, %s6620_s27  ;;  %v7539_v24 = vsel %vm1931_vm2, %v1963_v37, %v1965_v55  ;;  %v1967_v8 = vrot.slane %v1357_v31, 2 }
 0x23d   : > { %v7541_v48 = vpop.f32.mrb[44].mxu0 }
 0x23e   : > { %v1647_v2 = vrot.slane %v7541_v48, 1  ;;  %v1363_v5 = vpop.f32.mrb[45].mxu0 }
 0x23f   : > { %v1968_v36 = vrot.slane %v1363_v5, 2  ;;  %v1365_v52 = vpop.f32.mrb[46].mxu0 }
 0x240   : > { %v1649_v44 = vrot.slane %v1365_v52, 1  ;;  %v1367_v38 = vpop.f32.mrb[47].mxu0  ;;  %v1648_v6 = vsel %vm1610_vm1, %v1646_v28, %v1647_v2 }
 0x241   : > { %v1970_v46 = vrot.slane %v1367_v38, 2  ;;  %1739 = vrot.lane.b32.xlu0 %v1648_v6, %s6620_s27  ;;  %v7548_v41 = vsel %vm1931_vm2, %v1967_v8, %v1968_v36 }
 0x242   : > { %v1650_v43 = vsel %vm1610_vm1, %v1647_v2, %v1649_v44 }
 0x243   : > { %1741 = vrot.lane.b32.xlu1 %v1650_v43, %s6620_s27  ;;  %v7553_v59 = vsel %vm1931_vm2, %v1968_v36, %v1970_v46 }
 0x245   : > { %v7555_v42 = vpop.f32.mrb[48].mxu0 }
 0x246   : > { %v1373_v57 = vpop.f32.mrb[49].mxu0  ;;  %v1651_v53 = vrot.slane %v7555_v42, 1 }
 0x247   : > { %v7557_v4 = vpop.f32.mrb[50].mxu0  ;;  %v1972_v54 = vrot.slane %v1373_v57, 2 }
 0x248   : > { %v1652_v21 = vrot.slane %v7557_v4, 1  ;;  %v1377_v39 = vpop.f32.mrb[51].mxu0 }
 0x249   : > { %v1973_v11 = vrot.slane %v1377_v39, 2 }
 0x24a   : > { %v1653_v16 = vsel %vm1610_vm1, %v1651_v53, %v1652_v21 }
 0x24b   : > { %1743 = vrot.lane.b32.xlu0 %v1653_v16, %s6620_s27  ;;  %v7564_v27 = vsel %vm1931_vm2, %v1972_v54, %v1973_v11  ;;  %v7593_v54 = vld [vmem:[%s9026_s4] ss:$0 sm:$0xff] }
 0x24d   : > { %v1381_v0 = vpop.f32.mrb[52].mxu0 }
 0x24e   : > { %v1654_v30 = vrot.slane %v1381_v0, 1  ;;  %v1383_v26 = vpop.f32.mrb[53].mxu0 }
 0x24f   : > { %v1975_v37 = vrot.slane %v1383_v26, 2  ;;  %v7566_v62 = vpop.f32.mrb[54].mxu0 }
 0x250   : > { %v1387_v9 = vpop.f32.mrb[55].mxu0  ;;  %v1655_v29 = vsel %vm1610_vm1, %v1652_v21, %v1654_v30  ;;  %v1656_v31 = vrot.slane %v7566_v62, 1 }
 0x251   : > { %1745 = vrot.lane.b32.xlu1 %v1655_v29, %s6620_s27  ;;  %v7571_v19 = vsel %vm1931_vm2, %v1973_v11, %v1975_v37  ;;  %v1977_v2 = vrot.slane %v1387_v9, 2 }
 0x255   : > { %v7573_v55 = vpop.f32.mrb[56].mxu0 }
 0x256   : > { %v1657_v32 = vrot.slane %v7573_v55, 1  ;;  %v1393_v28 = vpop.f32.mrb[57].mxu0 }
 0x257   : > { %v1978_v5 = vrot.slane %v1393_v28, 2  ;;  %v1395_v8 = vpop.f32.mrb[58].mxu0 }
 0x258   : > { %v1659_v36 = vrot.slane %v1395_v8, 1  ;;  %v1397_v52 = vpop.f32.mrb[59].mxu0  ;;  %v1658_v44 = vsel %vm1610_vm1, %v1656_v31, %v1657_v32 }
 0x259   : > { %v1980_v38 = vrot.slane %v1397_v52, 2  ;;  %1747 = vrot.lane.b32.xlu0 %v1658_v44, %s6620_s27  ;;  %v7580_v6 = vsel %vm1931_vm2, %v1977_v2, %v1978_v5 }
 0x25a   : > { %v1660_v46 = vsel %vm1610_vm1, %v1657_v32, %v1659_v36 }
 0x25b   : > { %1749 = vrot.lane.b32.xlu1 %v1660_v46, %s6620_s27  ;;  %v7585_v43 = vsel %vm1931_vm2, %v1978_v5, %v1980_v38 }
 0x25d   : > { %v1712_v57 = vpop.permute.xlu0 %1711  ;;  %v7587_v53 = vpop.f32.mrb[60].mxu0 }
 0x25e   : > { %v1831_v21 = vadd.f32 %v1712_v57, %v7415_v45  ;;  %v1403_v39 = vpop.f32.mrb[61].mxu0  ;;  %v1661_v0 = vrot.slane %v7587_v53, 1 }
 0x25f   : > { %v7595_v11 = vpop.f32.mrb[62].mxu0  ;;  %v1982_v37 = vrot.slane %v1403_v39, 2 }
 0x260   : > { %v2072_v16 = vadd.f32 %v7432_v33, %v1831_v21  ;;  %v1662_v30 = vrot.slane %v7595_v11, 1  ;;  %v1407_v26 = vpop.f32.mrb[63].mxu0 }
 0x261   : > { %v1983_v9 = vrot.slane %v1407_v26, 2 }
 0x262   : > { %v2119_v29 = vadd.f32 %v7593_v54, %v2072_v16  ;;  %v1663_v45 = vsel %vm1610_vm1, %v1661_v0, %v1662_v30 }
 0x263   : > { %v1714_v31 = vpop.permute.xlu1 %1713  ;;  %1751 = vrot.lane.b32.xlu0 %v1663_v45, %s6620_s27  ;;  %v7604_v32 = vsel %vm1931_vm2, %v1982_v37, %v1983_v9 }
 0x264   : > { %vm2159_vm3 = vcmp.gt.f32.partialorder %v2119_v29, 0.0  ;;  %v2199_v28 = vmul.f32 0.1, %v2119_v29  ;;  %v1832_v33 = vadd.f32 %v1714_v31, %v7418_v60 }
 0x265   : > { %v1411_v2 = vpop.f32.mrb[64].mxu0 }
 0x266   : > { %v2239_v5 = vsel %vm2159_vm3, %v2119_v29, %v2199_v28  ;;  %v2073_v8 = vadd.f32 %v7442_v17, %v1832_v33  ;;  %v1664_v36 = vrot.slane %v1411_v2, 1  ;;  %v1413_v52 = vpop.f32.mrb[65].mxu0 }
 0x267   : > { %v6028_v44 = vpack.c.bf16 %v2239_v5, %v2239_v5  ;;  %v1985_v38 = vrot.slane %v1413_v52, 2  ;;  %v7608_v46 = vpop.f32.mrb[66].mxu0 }
 0x268   : > { %v2120_v57 = vadd.f32 %v7593_v54, %v2073_v8  ;;  %v1417_v21 = vpop.f32.mrb[67].mxu0  ;;  %v1665_v39 = vsel %vm1610_vm1, %v1662_v30, %v1664_v36  ;;  %v2805_v30 = vld [vmem:[#allocation2] sm:$0xf]  ;;  %v1666_v5 = vrot.slane %v7608_v46, 1 }
 0x269   : > { %v2403_v16 = vshrl.u32 %v6028_v44, 16  ;;  %1753 = vrot.lane.b32.xlu1 %v1665_v39, %s6620_s27  ;;  %v7614_v60 = vsel %vm1931_vm2, %v1983_v9, %v1985_v38  ;;  %v2406_v26 = vshll.u32 %v6028_v44, 16 }
 0x26a   : > { %vm2160_vm6 = vcmp.gt.f32.partialorder %v2120_v57, 0.0  ;;  %v2200_v17 = vmul.f32 0.1, %v2120_v57 }
 0x26b   : > { %v2405_v0 = vrot.slane %v2403_v16, 7  ;;  %v1716_v37 = vpop.permute.xlu0 %1715 }
 0x26c   : > { %v2240_v45 = vsel %vm2160_vm6, %v2120_v57, %v2200_v17  ;;  %v1833_v31 = vadd.f32 %v1716_v37, %v7434_v51  ;;  %v1987_v57 = vrot.slane %v1417_v21, 2 }
 0x26d   : > { %v2408_v28 = vor.u32 %v2406_v26, %v2405_v0  ;;  %v6029_v9 = vpack.c.bf16 %v2240_v45, %v2240_v45  ;;  %v1718_v33 = vpop.permute.xlu1 %1717  ;;  %v7622_v2 = vpop.f32.mrb[68].mxu0 }
 0x26e   : > { %9153 = vst [vmem:[#allocation20_spill] sm:$0xff] %v7622_v2  ;;  %v2074_v8 = vadd.f32 %v7452_v63, %v1833_v31  ;;  %v1834_v36 = vadd.f32 %v1718_v33, %v7445_v3  ;;  %v1667_v52 = vrot.slane %v7622_v2, 1  ;;  %v1423_v44 = vpop.f32.mrb[69].mxu0  ;;  %v2812_v33 = vld [vmem:[#allocation2 + $0x8] sm:$0x1] }
 0x26f   : > { %v2806_v38 = vsel %vm7617_vm8, %v2408_v28, %v2805_v30  ;;  %v2411_v51 = vshrl.u32 %v6029_v9, 16  ;;  %v1988_v39 = vrot.slane %v1423_v44, 2  ;;  %v1425_v16 = vpop.f32.mrb[70].mxu0  ;;  %v2414_v31 = vshll.u32 %v6029_v9, 16 }
 0x270   : > { %2807 = vst [vmem:[#allocation2] sm:$0xf] %v2806_v38  ;;  %v2121_v17 = vadd.f32 %v7593_v54, %v2074_v8  ;;  %v2075_v26 = vadd.f32 %v7457_v49, %v1834_v36  ;;  %v1669_v37 = vrot.slane %v1425_v16, 1  ;;  %v1427_v45 = vpop.f32.mrb[71].mxu0  ;;  %v1668_v63 = vsel %vm1610_vm1, %v1666_v5, %v1667_v52 }
 0x271   : > { %v2413_v30 = vrot.slane %v2411_v51, 7  ;;  %v1990_v21 = vrot.slane %v1427_v45, 2  ;;  %1755 = vrot.lane.b32.xlu0 %v1668_v63, %s6620_s27  ;;  %v7641_v28 = vsel %vm1931_vm2, %v1987_v57, %v1988_v39  ;;  %v2409_v9 = vrot.slane %v2405_v0, 4 }
 0x272   : > { %vm2161_vm13 = vcmp.gt.f32.partialorder %v2121_v17, 0.0  ;;  %v2201_v5 = vmul.f32 0.1, %v2121_v17  ;;  %v2122_v8 = vadd.f32 %v7593_v54, %v2075_v26  ;;  %v1670_v36 = vsel %vm1610_vm1, %v1667_v52, %v1669_v37 }
 0x273   : > { %v2416_v44 = vor.u32 %v2414_v31, %v2413_v30  ;;  %v2418_v38 = vrot.slane %v2413_v30, 4  ;;  %1757 = vrot.lane.b32.xlu1 %v1670_v36, %s6620_s27  ;;  %v7653_v51 = vsel %vm1931_vm2, %v1988_v39, %v1990_v21  ;;  %v6621_v49 = vmov (!%p5874_p10), 0  }
 0x274   : > { %9158 = vst [vmem:[#allocation21_spill] sm:$0xff] %v7653_v51  ;;  %v2241_v57 = vsel %vm2161_vm13, %v2121_v17, %v2201_v5  ;;  %vm2162_vm14 = vcmp.gt.f32.partialorder %v2122_v8, 0.0  ;;  %v2202_v16 = vmul.f32 0.1, %v2122_v8 }
 0x275   : > { %v2417_v45 = vsel %vm7645_vm12, %v2409_v9, %v2416_v44  ;;  %v2813_v63 = vsel %vm7635_vm11, %v2418_v38, %v2812_v33  ;;  %v6030_v26 = vpack.c.bf16 %v2241_v57, %v2241_v57  ;;  %v1720_v2 = vpop.permute.xlu0 %1719  ;;  %v7659_v52 = vpop.f32.mrb[72].mxu0 }
 0x276   : > { %9159 = vst [vmem:[#allocation23_spill] sm:$0xff] %v7659_v52  ;;  %2809 = vst.msk [vmem:[#allocation2 + $0x4] sm:$0xf] %vm2802_vm4, %v2417_v45  ;;  %v2242_v0 = vsel %vm2162_vm14, %v2122_v8, %v2202_v16  ;;  %v1835_v39 = vadd.f32 %v1720_v2, %v7459_v1  ;;  %v1433_v37 = vpop.f32.mrb[73].mxu0  ;;  %v1671_v21 = vrot.slane %v7659_v52, 1 }
 0x277   : > { %2814 = vst [vmem:[#allocation2 + $0x8] sm:$0x1] %v2813_v63  ;;  %v2948_v17 = vld [vmem:[#allocation2] sm:$0x1]  ;;  %v2420_v30 = vshrl.u32 %v6030_v26, 16  ;;  %v6031_v31 = vpack.c.bf16 %v2242_v0, %v2242_v0  ;;  %v7664_v5 = vpop.f32.mrb[74].mxu0 }
 0x278   : > { %9160 = vst [vmem:[#allocation25_spill] sm:$0xff] %v7664_v5  ;;  %v2949_v33 = vsel %vm7635_vm11, 0, %v2948_v17  ;;  %v2423_v36 = vshll.u32 %v6030_v26, 16  ;;  %v2076_v9 = vadd.f32 %v7468_v56, %v1835_v39  ;;  %v1672_v44 = vrot.slane %v7664_v5, 1  ;;  %v1437_v38 = vpop.f32.mrb[75].mxu0 }
 0x279   : > { %2950 = vst [vmem:[#allocation2] sm:$0x1] %v2949_v33  ;;  %v2422_v8 = vrot.slane %v2420_v30, 7  ;;  %v2428_v1 = vshrl.u32 %v6031_v31, 16  ;;  %v1992_v2 = vrot.slane %v1433_v37, 2  ;;  %v1993_v57 = vrot.slane %v1437_v38, 2 }
 0x27a   : > { %v2815_v16 = vld [vmem:[#allocation2 + $0xc] sm:$0xf]  ;;  %v2123_v45 = vadd.f32 %v7593_v54, %v2076_v9  ;;  %v1673_v63 = vsel %vm1610_vm1, %v1671_v21, %v1672_v44  ;;  %v2431_v51 = vshll.u32 %v6031_v31, 16  ;;  %v2819_v26 = vld [vmem:[#allocation2 + $0x14] sm:$0x1] }
 0x27b   : > { %v2425_v0 = vor.u32 %v2423_v36, %v2422_v8  ;;  %v2430_v52 = vrot.slane %v2428_v1, 7  ;;  %v1722_v17 = vpop.permute.xlu1 %1721  ;;  %1759 = vrot.lane.b32.xlu0 %v1673_v63, %s6620_s27  ;;  %v7674_v56 = vsel %vm1931_vm2, %v1992_v2, %v1993_v57  ;;  %v2426_v33 = vrot.slane %v2422_v8, 4  ;;  %3072 = vst.msk [vmem:[#allocation2] sm:$0xf] (!%p5874_p10), %vm2802_vm4, %v6621_v49  ;;  %3073 = vst.msk [vmem:[#allocation2 + $0x4] sm:$0xf] (!%p5874_p10), %vm2802_vm4, %v6621_v49 }
 0x27c   : > { %vm2163_vm15 = vcmp.gt.f32.partialorder %v2123_v45, 0.0  ;;  %v2203_v39 = vmul.f32 0.1, %v2123_v45  ;;  %v1836_v37 = vadd.f32 %v1722_v17, %v7461_v50 }
 0x27d   : > { %v2816_v9 = vsel %vm7617_vm8, %v2425_v0, %v2815_v16  ;;  %v2433_v21 = vor.u32 %v2431_v51, %v2430_v52  ;;  %v2435_v36 = vrot.slane %v2430_v52, 4  ;;  %v1441_v38 = vpop.f32.mrb[76].mxu0 }
 0x27e   : > { %v3008_v30 = vld [vmem:[#allocation2 + $0x8] sm:$0xf]  ;;  %2817 = vst [vmem:[#allocation2 + $0xc] sm:$0xf] %v2816_v9  ;;  %v2243_v1 = vsel %vm2163_vm15, %v2123_v45, %v2203_v39  ;;  %v2077_v2 = vadd.f32 %v7475_v18, %v1836_v37  ;;  %v1674_v63 = vrot.slane %v1441_v38, 1  ;;  %v1443_v5 = vpop.f32.mrb[77].mxu0 }
 0x27f   : > { %v3009_v31 = vsel %vm7617_vm8, 0, %v3008_v30  ;;  %v2434_v50 = vsel %vm7645_vm12, %v2426_v33, %v2433_v21  ;;  %v2820_v8 = vsel %vm7635_vm11, %v2435_v36, %v2819_v26  ;;  %v6032_v16 = vpack.c.bf16 %v2243_v1, %v2243_v1  ;;  %v7686_v52 = vpop.f32.mrb[78].mxu0  ;;  %v2822_v33 = vld [vmem:[#allocation2 + $0x18] sm:$0xf] }
 0x280   : > { %3010 = vst [vmem:[#allocation2 + $0x8] sm:$0xf] %v3009_v31  ;;  %v1995_v51 = vrot.slane %v1443_v5, 2  ;;  %2818 = vst.msk [vmem:[#allocation2 + $0x10] sm:$0xf] %vm2802_vm4, %v2434_v50  ;;  %v2124_v45 = vadd.f32 %v7593_v54, %v2077_v2  ;;  %v1447_v0 = vpop.f32.mrb[79].mxu0  ;;  %v1675_v18 = vsel %vm1610_vm1, %v1672_v44, %v1674_v63 }
 0x281   : > { %2821 = vst [vmem:[#allocation2 + $0x14] sm:$0x1] %v2820_v8  ;;  %v2437_v17 = vshrl.u32 %v6032_v16, 16  ;;  %1761 = vrot.lane.b32.xlu1 %v1675_v18, %s6620_s27  ;;  %v2440_v5 = vshll.u32 %v6032_v16, 16  ;;  %v1676_v44 = vrot.slane %v7686_v52, 1  ;;  %v1997_v1 = vrot.slane %v1447_v0, 2 }
 0x282   : > { %v7693_v39 = vsel %vm1931_vm2, %v1993_v57, %v1995_v51  ;;  %vm2164_vm3 = vcmp.gt.f32.partialorder %v2124_v45, 0.0  ;;  %v2204_v26 = vmul.f32 0.1, %v2124_v45  ;;  %3074 = vst.msk [vmem:[#allocation2 + $0x8] sm:$0xf] (!%p5874_p10), %vm2802_vm4, %v6621_v49 }
 0x283   : > { %v2439_v37 = vrot.slane %v2437_v17, 7  ;;  %v1724_v30 = vpop.permute.xlu0 %1723 }
 0x284   : > { %v2244_v9 = vsel %vm2164_vm3, %v2124_v45, %v2204_v26  ;;  %v1837_v21 = vadd.f32 %v1724_v30, %v7470_v15 }
 0x285   : > { %v2951_v36 = vld [vmem:[#allocation2 + $0xc] sm:$0x1]  ;;  %v2442_v38 = vor.u32 %v2440_v5, %v2439_v37  ;;  %v6033_v31 = vpack.c.bf16 %v2244_v9, %v2244_v9  ;;  %v1726_v2 = vpop.permute.xlu1 %1725  ;;  %v7697_v63 = vpop.f32.mrb[80].mxu0 }
 0x286   : > { %v2952_v57 = vsel %vm7635_vm11, 0, %v2951_v36  ;;  %v2078_v50 = vadd.f32 %v7484_v23, %v1837_v21  ;;  %v1838_v8 = vadd.f32 %v1726_v2, %v7477_v61  ;;  %v1677_v16 = vrot.slane %v7697_v63, 1  ;;  %v1453_v51 = vpop.f32.mrb[81].mxu0 }
 0x287   : > { %2953 = vst [vmem:[#allocation2 + $0xc] sm:$0x1] %v2952_v57  ;;  %v2823_v45 = vsel %vm7617_vm8, %v2442_v38, %v2822_v33  ;;  %v2445_v18 = vshrl.u32 %v6033_v31, 16  ;;  %v2448_v0 = vshll.u32 %v6033_v31, 16  ;;  %v1998_v17 = vrot.slane %v1453_v51, 2  ;;  %v1455_v26 = vpop.f32.mrb[82].mxu0 }
 0x288   : > { %v3011_v15 = vld [vmem:[#allocation2 + $0x14] sm:$0xf]  ;;  %2824 = vst [vmem:[#allocation2 + $0x18] sm:$0xf] %v2823_v45  ;;  %v2125_v23 = vadd.f32 %v7593_v54, %v2078_v50  ;;  %v2079_v61 = vadd.f32 %v7489_v47, %v1838_v8  ;;  %v1679_v30 = vrot.slane %v1455_v26, 1  ;;  %v1457_v9 = vpop.f32.mrb[83].mxu0  ;;  %v1678_v2 = vsel %vm1610_vm1, %v1676_v44, %v1677_v16 }
 0x289   : > { %v3012_v5 = vsel %vm7617_vm8, 0, %v3011_v15  ;;  %v2447_v21 = vrot.slane %v2445_v18, 7  ;;  %v2000_v36 = vrot.slane %v1457_v9, 2  ;;  %v7712_v33 = vsel %vm1931_vm2, %v1997_v1, %v1998_v17  ;;  %v2826_v38 = vld [vmem:[#allocation2 + $0x20] sm:$0x1]  ;;  %1763 = vrot.lane.b32.xlu0 %v1678_v2, %s6620_s27 }
 0x28a   : > { %3013 = vst [vmem:[#allocation2 + $0x14] sm:$0xf] %v3012_v5  ;;  %vm2165_vm5 = vcmp.gt.f32.partialorder %v2125_v23, 0.0  ;;  %v2205_v31 = vmul.f32 0.1, %v2125_v23  ;;  %v2126_v57 = vadd.f32 %v7593_v54, %v2079_v61  ;;  %v1680_v50 = vsel %vm1610_vm1, %v1677_v16, %v1679_v30 }
 0x28b   : > { %v2443_v47 = vrot.slane %v2439_v37, 4  ;;  %v2450_v8 = vor.u32 %v2448_v0, %v2447_v21  ;;  %v2452_v51 = vrot.slane %v2447_v21, 4  ;;  %1765 = vrot.lane.b32.xlu1 %v1680_v50, %s6620_s27  ;;  %v7719_v15 = vsel %vm1931_vm2, %v1998_v17, %v2000_v36 }
 0x28c   : > { %v2245_v44 = vsel %vm2165_vm5, %v2125_v23, %v2205_v31  ;;  %vm2166_vm6 = vcmp.gt.f32.partialorder %v2126_v57, 0.0  ;;  %v2206_v1 = vmul.f32 0.1, %v2126_v57 }
 0x28d   : > { %v2451_v45 = vsel %vm7645_vm12, %v2443_v47, %v2450_v8  ;;  %v2827_v18 = vsel %vm7635_vm11, %v2452_v51, %v2826_v38  ;;  %v6034_v26 = vpack.c.bf16 %v2245_v44, %v2245_v44  ;;  %v1728_v5 = vpop.permute.xlu0 %1727  ;;  %v7725_v16 = vpop.f32.mrb[84].mxu0  ;;  %v2829_v51 = vld [vmem:[#allocation2 + $0x24] sm:$0xf] }
 0x28e   : > { %2825 = vst.msk [vmem:[#allocation2 + $0x1c] sm:$0xf] %vm2802_vm4, %v2451_v45  ;;  %2828 = vst [vmem:[#allocation2 + $0x20] sm:$0x1] %v2827_v18  ;;  %v2246_v37 = vsel %vm2166_vm6, %v2126_v57, %v2206_v1  ;;  %v1839_v0 = vadd.f32 %v1728_v5, %v7491_v22  ;;  %v1463_v17 = vpop.f32.mrb[85].mxu0  ;;  %v1681_v9 = vrot.slane %v7725_v16, 1 }
 0x28f   : > { %v2954_v23 = vld [vmem:[#allocation2 + $0x18] sm:$0x1]  ;;  %v2454_v61 = vshrl.u32 %v6034_v26, 16  ;;  %v6035_v30 = vpack.c.bf16 %v2246_v37, %v2246_v37  ;;  %v7730_v21 = vpop.f32.mrb[86].mxu0  ;;  %v2457_v2 = vshll.u32 %v6034_v26, 16  ;;  %v2002_v47 = vrot.slane %v1463_v17, 2 }
 0x290   : > { %v2955_v36 = vsel %vm7635_vm11, 0, %v2954_v23  ;;  %v2080_v38 = vadd.f32 %v7500_v35, %v1839_v0  ;;  %v1682_v31 = vrot.slane %v7730_v21, 1  ;;  %v1467_v50 = vpop.f32.mrb[87].mxu0  ;;  %v2833_v26 = vld [vmem:[#allocation2 + $0x2c] sm:$0x1] }
 0x291   : > { %2956 = vst [vmem:[#allocation2 + $0x18] sm:$0x1] %v2955_v36  ;;  %v2456_v57 = vrot.slane %v2454_v61, 7  ;;  %v2462_v22 = vshrl.u32 %v6035_v30, 16  ;;  %v2003_v8 = vrot.slane %v1467_v50, 2  ;;  %v2465_v5 = vshll.u32 %v6035_v30, 16 }
 0x292   : > { %v2127_v44 = vadd.f32 %v7593_v54, %v2080_v38  ;;  %v1683_v1 = vsel %vm1610_vm1, %v1681_v9, %v1682_v31 }
 0x293   : > { %v2459_v45 = vor.u32 %v2457_v2, %v2456_v57  ;;  %v2464_v18 = vrot.slane %v2462_v22, 7  ;;  %v1730_v37 = vpop.permute.xlu1 %1729  ;;  %1767 = vrot.lane.b32.xlu0 %v1683_v1, %s6620_s27  ;;  %v7740_v35 = vsel %vm1931_vm2, %v2002_v47, %v2003_v8  ;;  %v2460_v61 = vrot.slane %v2456_v57, 4 }
 0x294   : > { %vm2167_vm7 = vcmp.gt.f32.partialorder %v2127_v44, 0.0  ;;  %v2207_v0 = vmul.f32 0.1, %v2127_v44  ;;  %v1840_v17 = vadd.f32 %v1730_v37, %v7493_v34 }
 0x295   : > { %v3014_v23 = vld [vmem:[#allocation2 + $0x20] sm:$0xf]  ;;  %v2830_v36 = vsel %vm7617_vm8, %v2459_v45, %v2829_v51  ;;  %v2467_v9 = vor.u32 %v2465_v5, %v2464_v18  ;;  %v2469_v2 = vrot.slane %v2464_v18, 4  ;;  %v1471_v38 = vpop.f32.mrb[88].mxu0 }
 0x296   : > { %v3015_v30 = vsel %vm7617_vm8, 0, %v3014_v23  ;;  %2831 = vst [vmem:[#allocation2 + $0x24] sm:$0xf] %v2830_v36  ;;  %v2247_v50 = vsel %vm2167_vm7, %v2127_v44, %v2207_v0  ;;  %v2081_v22 = vadd.f32 %v7507_v7, %v1840_v17  ;;  %v1684_v47 = vrot.slane %v1471_v38, 1  ;;  %v1473_v1 = vpop.f32.mrb[89].mxu0 }
 0x297   : > { %3016 = vst [vmem:[#allocation2 + $0x20] sm:$0xf] %v3015_v30  ;;  %v2468_v34 = vsel %vm7645_vm12, %v2460_v61, %v2467_v9  ;;  %v2834_v57 = vsel %vm7635_vm11, %v2469_v2, %v2833_v26  ;;  %v6036_v51 = vpack.c.bf16 %v2247_v50, %v2247_v50  ;;  %v2005_v45 = vrot.slane %v1473_v1, 2  ;;  %v7752_v18 = vpop.f32.mrb[90].mxu0  ;;  %v2836_v36 = vld [vmem:[#allocation2 + $0x30] sm:$0xf] }
 0x298   : > { %2832 = vst.msk [vmem:[#allocation2 + $0x28] sm:$0xf] %vm2802_vm4, %v2468_v34  ;;  %2835 = vst [vmem:[#allocation2 + $0x2c] sm:$0x1] %v2834_v57  ;;  %v2128_v44 = vadd.f32 %v7593_v54, %v2081_v22  ;;  %v1477_v5 = vpop.f32.mrb[91].mxu0  ;;  %v1685_v7 = vsel %vm1610_vm1, %v1682_v31, %v1684_v47  ;;  %v1686_v31 = vrot.slane %v7752_v18, 1 }
 0x299   : > { %v2471_v37 = vshrl.u32 %v6036_v51, 16  ;;  %1769 = vrot.lane.b32.xlu1 %v1685_v7, %s6620_s27  ;;  %v7759_v0 = vsel %vm1931_vm2, %v2003_v8, %v2005_v45  ;;  %v2474_v23 = vshll.u32 %v6036_v51, 16  ;;  %v2007_v22 = vrot.slane %v1477_v5, 2 }
 0x29a   : > { %vm2168_vm9 = vcmp.gt.f32.partialorder %v2128_v44, 0.0  ;;  %v2208_v26 = vmul.f32 0.1, %v2128_v44 }
 0x29b   : > { %v2473_v17 = vrot.slane %v2471_v37, 7  ;;  %v1732_v61 = vpop.permute.xlu0 %1731 }
 0x29c   : > { %v2248_v9 = vsel %vm2168_vm9, %v2128_v44, %v2208_v26  ;;  %v1841_v2 = vadd.f32 %v1732_v61, %v7502_v40 }
 0x29d   : > { %v2957_v38 = vld [vmem:[#allocation2 + $0x24] sm:$0x1]  ;;  %v2476_v30 = vor.u32 %v2474_v23, %v2473_v17  ;;  %v6037_v50 = vpack.c.bf16 %v2248_v9, %v2248_v9  ;;  %v1734_v47 = vpop.permute.xlu1 %1733  ;;  %v7763_v1 = vpop.f32.mrb[92].mxu0 }
 0x29e   : > { %v2958_v8 = vsel %vm7635_vm11, 0, %v2957_v38  ;;  %v2082_v34 = vadd.f32 %v7516_v10, %v1841_v2  ;;  %v1842_v57 = vadd.f32 %v1734_v47, %v7509_v14  ;;  %v1687_v51 = vrot.slane %v7763_v1, 1  ;;  %v1483_v45 = vpop.f32.mrb[93].mxu0 }
 0x29f   : > { %2959 = vst [vmem:[#allocation2 + $0x24] sm:$0x1] %v2958_v8  ;;  %v3017_v40 = vld [vmem:[#allocation2 + $0x2c] sm:$0xf]  ;;  %v2837_v44 = vsel %vm7617_vm8, %v2476_v30, %v2836_v36  ;;  %v2479_v7 = vshrl.u32 %v6037_v50, 16  ;;  %v2482_v5 = vshll.u32 %v6037_v50, 16 }
 0x2a0   : > { %v2008_v37 = vrot.slane %v1483_v45, 2  ;;  %v1485_v26 = vpop.f32.mrb[94].mxu0  ;;  %v3018_v23 = vsel %vm7617_vm8, 0, %v3017_v40  ;;  %2838 = vst [vmem:[#allocation2 + $0x30] sm:$0xf] %v2837_v44  ;;  %v2129_v10 = vadd.f32 %v7593_v54, %v2082_v34  ;;  %v2083_v14 = vadd.f32 %v7521_v12, %v1842_v57 }
 0x2a1   : > { %v1689_v61 = vrot.slane %v1485_v26, 1  ;;  %v1487_v9 = vpop.f32.mrb[95].mxu0  ;;  %3019 = vst [vmem:[#allocation2 + $0x2c] sm:$0xf] %v3018_v23  ;;  %v2481_v2 = vrot.slane %v2479_v7, 7  ;;  %v1688_v47 = vsel %vm1610_vm1, %v1686_v31, %v1687_v51  ;;  %v2477_v12 = vrot.slane %v2473_v17, 4 }
 0x2a2   : > { %v2010_v38 = vrot.slane %v1487_v9, 2  ;;  %v7778_v36 = vsel %vm1931_vm2, %v2007_v22, %v2008_v37  ;;  %v2840_v30 = vld [vmem:[#allocation2 + $0x38] sm:$0x1]  ;;  %vm2169_vm10 = vcmp.gt.f32.partialorder %v2129_v10, 0.0  ;;  %v2209_v50 = vmul.f32 0.1, %v2129_v10  ;;  %1771 = vrot.lane.b32.xlu0 %v1688_v47, %s6620_s27 }
 0x2a3   : > { %v2130_v8 = vadd.f32 %v7593_v54, %v2083_v14  ;;  %v1690_v34 = vsel %vm1610_vm1, %v1687_v51, %v1689_v61  ;;  %v2484_v57 = vor.u32 %v2482_v5, %v2481_v2  ;;  %v2486_v45 = vrot.slane %v2481_v2, 4 }
 0x2a4   : > { %1773 = vrot.lane.b32.xlu1 %v1690_v34, %s6620_s27  ;;  %v7785_v40 = vsel %vm1931_vm2, %v2008_v37, %v2010_v38  ;;  %v2249_v31 = vsel %vm2169_vm10, %v2129_v10, %v2209_v50 }
 0x2a5   : > { %vm2170_vm13 = vcmp.gt.f32.partialorder %v2130_v8, 0.0  ;;  %v2210_v22 = vmul.f32 0.1, %v2130_v8  ;;  %v2485_v44 = vsel %vm7645_vm12, %v2477_v12, %v2484_v57  ;;  %v2841_v7 = vsel %vm7635_vm11, %v2486_v45, %v2840_v30  ;;  %v1736_v23 = vpop.permute.xlu0 %1735  ;;  %v7791_v51 = vpop.f32.mrb[96].mxu0  ;;  %v2843_v45 = vld [vmem:[#allocation2 + $0x3c] sm:$0xf] }
 0x2a6   : > { %v6038_v26 = vpack.c.bf16 %v2249_v31, %v2249_v31  ;;  %2839 = vst.msk [vmem:[#allocation2 + $0x34] sm:$0xf] %vm2802_vm4, %v2485_v44  ;;  %2842 = vst [vmem:[#allocation2 + $0x38] sm:$0x1] %v2841_v7  ;;  %v1843_v5 = vadd.f32 %v1736_v23, %v7523_v25  ;;  %v1493_v37 = vpop.f32.mrb[97].mxu0  ;;  %v1691_v9 = vrot.slane %v7791_v51, 1 }
 0x2a7   : > { %v2250_v17 = vsel %vm2170_vm13, %v2130_v8, %v2210_v22  ;;  %v2960_v10 = vld [vmem:[#allocation2 + $0x30] sm:$0x1]  ;;  %v7796_v2 = vpop.f32.mrb[98].mxu0  ;;  %v2012_v12 = vrot.slane %v1493_v37, 2 }
 0x2a8   : > { %v2488_v14 = vshrl.u32 %v6038_v26, 16  ;;  %v6039_v61 = vpack.c.bf16 %v2250_v17, %v2250_v17  ;;  %v2961_v38 = vsel %vm7635_vm11, 0, %v2960_v10  ;;  %v2491_v47 = vshll.u32 %v6038_v26, 16  ;;  %v1497_v34 = vpop.f32.mrb[99].mxu0  ;;  %v2847_v26 = vld [vmem:[#allocation2 + $0x44] sm:$0x1] }
 0x2a9   : > { %v2084_v30 = vadd.f32 %v7532_v20, %v1843_v5  ;;  %v1692_v50 = vrot.slane %v7796_v2, 1  ;;  %2962 = vst [vmem:[#allocation2 + $0x30] sm:$0x1] %v2961_v38  ;;  %v2013_v57 = vrot.slane %v1497_v34, 2 }
 0x2aa   : > { %v2490_v8 = vrot.slane %v2488_v14, 7  ;;  %v2496_v25 = vshrl.u32 %v6039_v61, 16  ;;  %v2499_v23 = vshll.u32 %v6039_v61, 16 }
 0x2ab   : > { %v2131_v31 = vadd.f32 %v7593_v54, %v2084_v30  ;;  %v1693_v22 = vsel %vm1610_vm1, %v1691_v9, %v1692_v50  ;;  %v1738_v17 = vpop.permute.xlu1 %1737  ;;  %v7806_v20 = vsel %vm1931_vm2, %v2012_v12, %v2013_v57 }
 0x2ac   : > { %v2493_v44 = vor.u32 %v2491_v47, %v2490_v8  ;;  %v2498_v7 = vrot.slane %v2496_v25, 7  ;;  %1775 = vrot.lane.b32.xlu0 %v1693_v22, %s6620_s27  ;;  %v1844_v37 = vadd.f32 %v1738_v17, %v7525_v13  ;;  %v2494_v14 = vrot.slane %v2490_v8, 4 }
 0x2ad   : > { %vm2171_vm14 = vcmp.gt.f32.partialorder %v2131_v31, 0.0  ;;  %v2211_v5 = vmul.f32 0.1, %v2131_v31  ;;  %v3020_v10 = vld [vmem:[#allocation2 + $0x38] sm:$0xf]  ;;  %v1501_v30 = vpop.f32.mrb[100].mxu0 }
 0x2ae   : > { %v2844_v38 = vsel %vm7617_vm8, %v2493_v44, %v2843_v45  ;;  %v2501_v9 = vor.u32 %v2499_v23, %v2498_v7  ;;  %v2503_v47 = vrot.slane %v2498_v7, 4  ;;  %v3021_v61 = vsel %vm7617_vm8, 0, %v3020_v10  ;;  %v1503_v22 = vpop.f32.mrb[101].mxu0 }
 0x2af   : > { %2845 = vst [vmem:[#allocation2 + $0x3c] sm:$0xf] %v2844_v38  ;;  %v2251_v34 = vsel %vm2171_vm14, %v2131_v31, %v2211_v5  ;;  %v2085_v25 = vadd.f32 %v7539_v24, %v1844_v37  ;;  %v1694_v12 = vrot.slane %v1501_v30, 1  ;;  %3022 = vst [vmem:[#allocation2 + $0x38] sm:$0xf] %v3021_v61  ;;  %v2015_v44 = vrot.slane %v1503_v22, 2 }
 0x2b0   : > { %v2502_v13 = vsel %vm7645_vm12, %v2494_v14, %v2501_v9  ;;  %v2848_v8 = vsel %vm7635_vm11, %v2503_v47, %v2847_v26  ;;  %v6040_v45 = vpack.c.bf16 %v2251_v34, %v2251_v34  ;;  %v7818_v7 = vpop.f32.mrb[102].mxu0  ;;  %v2850_v38 = vld [vmem:[#allocation2 + $0x48] sm:$0xf] }
 0x2b1   : > { %2846 = vst.msk [vmem:[#allocation2 + $0x40] sm:$0xf] %vm2802_vm4, %v2502_v13  ;;  %2849 = vst [vmem:[#allocation2 + $0x44] sm:$0x1] %v2848_v8  ;;  %v2132_v31 = vadd.f32 %v7593_v54, %v2085_v25  ;;  %v1507_v23 = vpop.f32.mrb[103].mxu0  ;;  %v1695_v24 = vsel %vm1610_vm1, %v1692_v50, %v1694_v12  ;;  %v7825_v5 = vsel %vm1931_vm2, %v2013_v57, %v2015_v44  ;;  %v1696_v50 = vrot.slane %v7818_v7, 1 }
 0x2b2   : > { %v2505_v17 = vshrl.u32 %v6040_v45, 16  ;;  %1777 = vrot.lane.b32.xlu1 %v1695_v24, %s6620_s27  ;;  %v2508_v10 = vshll.u32 %v6040_v45, 16  ;;  %v2017_v25 = vrot.slane %v1507_v23, 2 }
 0x2b3   : > { %vm2172_vm15 = vcmp.gt.f32.partialorder %v2132_v31, 0.0  ;;  %v2212_v26 = vmul.f32 0.1, %v2132_v31  ;;  %v1740_v14 = vpop.permute.xlu0 %1739 }
 0x2b4   : > { %v2507_v37 = vrot.slane %v2505_v17, 7  ;;  %v1845_v47 = vadd.f32 %v1740_v14, %v7534_v58 }
 0x2b5   : > { %v2252_v9 = vsel %vm2172_vm15, %v2132_v31, %v2212_v26  ;;  %v1742_v12 = vpop.permute.xlu1 %1741  ;;  %v7829_v22 = vpop.f32.mrb[104].mxu0 }
 0x2b6   : > { %v2963_v30 = vld [vmem:[#allocation2 + $0x3c] sm:$0x1]  ;;  %v2510_v61 = vor.u32 %v2508_v10, %v2507_v37  ;;  %v6041_v34 = vpack.c.bf16 %v2252_v9, %v2252_v9  ;;  %v2086_v13 = vadd.f32 %v7548_v41, %v1845_v47  ;;  %v1846_v8 = vadd.f32 %v1742_v12, %v7541_v48  ;;  %v1513_v44 = vpop.f32.mrb[105].mxu0 }
 0x2b7   : > { %v2964_v57 = vsel %vm7635_vm11, 0, %v2963_v30  ;;  %v1697_v45 = vrot.slane %v7829_v22, 1  ;;  %v2018_v17 = vrot.slane %v1513_v44, 2  ;;  %v1515_v26 = vpop.f32.mrb[106].mxu0 }
 0x2b8   : > { %2965 = vst [vmem:[#allocation2 + $0x3c] sm:$0x1] %v2964_v57  ;;  %v3023_v58 = vld [vmem:[#allocation2 + $0x44] sm:$0xf]  ;;  %v2851_v31 = vsel %vm7617_vm8, %v2510_v61, %v2850_v38  ;;  %v2513_v24 = vshrl.u32 %v6041_v34, 16  ;;  %v2516_v23 = vshll.u32 %v6041_v34, 16  ;;  %v2133_v41 = vadd.f32 %v7593_v54, %v2086_v13 }
 0x2b9   : > { %v3024_v10 = vsel %vm7617_vm8, 0, %v3023_v58  ;;  %2852 = vst [vmem:[#allocation2 + $0x48] sm:$0xf] %v2851_v31  ;;  %v2087_v48 = vadd.f32 %v7553_v59, %v1846_v8  ;;  %v1699_v14 = vrot.slane %v1515_v26, 1  ;;  %v1517_v9 = vpop.f32.mrb[107].mxu0  ;;  %v1698_v12 = vsel %vm1610_vm1, %v1696_v50, %v1697_v45 }
 0x2ba   : > { %3025 = vst [vmem:[#allocation2 + $0x44] sm:$0xf] %v3024_v10  ;;  %v2515_v47 = vrot.slane %v2513_v24, 7  ;;  %v2020_v30 = vrot.slane %v1517_v9, 2  ;;  %v7844_v38 = vsel %vm1931_vm2, %v2017_v25, %v2018_v17  ;;  %v2854_v61 = vld [vmem:[#allocation2 + $0x50] sm:$0x1]  ;;  %1779 = vrot.lane.b32.xlu0 %v1698_v12, %s6620_s27 }
 0x2bb   : > { %vm2173_vm3 = vcmp.gt.f32.partialorder %v2133_v41, 0.0  ;;  %v2213_v34 = vmul.f32 0.1, %v2133_v41  ;;  %v2134_v57 = vadd.f32 %v7593_v54, %v2087_v48  ;;  %v1700_v13 = vsel %vm1610_vm1, %v1697_v45, %v1699_v14 }
 0x2bc   : > { %v2511_v59 = vrot.slane %v2507_v37, 4  ;;  %v2518_v8 = vor.u32 %v2516_v23, %v2515_v47  ;;  %v2520_v44 = vrot.slane %v2515_v47, 4  ;;  %1781 = vrot.lane.b32.xlu1 %v1700_v13, %s6620_s27  ;;  %v7851_v58 = vsel %vm1931_vm2, %v2018_v17, %v2020_v30 }
 0x2bd   : > { %v2253_v50 = vsel %vm2173_vm3, %v2133_v41, %v2213_v34  ;;  %vm2174_vm5 = vcmp.gt.f32.partialorder %v2134_v57, 0.0  ;;  %v2214_v25 = vmul.f32 0.1, %v2134_v57  ;;  %v1744_v10 = vpop.permute.xlu0 %1743  ;;  %v7857_v45 = vpop.f32.mrb[108].mxu0 }
 0x2be   : > { %v2519_v31 = vsel %vm7645_vm12, %v2511_v59, %v2518_v8  ;;  %v2855_v24 = vsel %vm7635_vm11, %v2520_v44, %v2854_v61  ;;  %v6042_v26 = vpack.c.bf16 %v2253_v50, %v2253_v50  ;;  %v1847_v23 = vadd.f32 %v1744_v10, %v7555_v42  ;;  %v1523_v17 = vpop.f32.mrb[109].mxu0  ;;  %v2857_v44 = vld [vmem:[#allocation2 + $0x54] sm:$0xf] }
 0x2bf   : > { %2853 = vst.msk [vmem:[#allocation2 + $0x4c] sm:$0xf] %vm2802_vm4, %v2519_v31  ;;  %2856 = vst [vmem:[#allocation2 + $0x50] sm:$0x1] %v2855_v24  ;;  %v2254_v37 = vsel %vm2174_vm5, %v2134_v57, %v2214_v25  ;;  %v1701_v9 = vrot.slane %v7857_v45, 1  ;;  %v7862_v47 = vpop.f32.mrb[110].mxu0 }
 0x2c0   : > { %v2966_v41 = vld [vmem:[#allocation2 + $0x48] sm:$0x1]  ;;  %v2522_v48 = vshrl.u32 %v6042_v26, 16  ;;  %v6043_v14 = vpack.c.bf16 %v2254_v37, %v2254_v37  ;;  %v2525_v12 = vshll.u32 %v6042_v26, 16  ;;  %v2088_v61 = vadd.f32 %v7564_v27, %v1847_v23  ;;  %v1527_v13 = vpop.f32.mrb[111].mxu0 }
 0x2c1   : > { %v2967_v30 = vsel %vm7635_vm11, 0, %v2966_v41  ;;  %v1702_v34 = vrot.slane %v7862_v47, 1  ;;  %v2022_v59 = vrot.slane %v1523_v17, 2  ;;  %v2023_v8 = vrot.slane %v1527_v13, 2  ;;  %v2861_v26 = vld [vmem:[#allocation2 + $0x5c] sm:$0x1] }
 0x2c2   : > { %2968 = vst [vmem:[#allocation2 + $0x48] sm:$0x1] %v2967_v30  ;;  %v2524_v57 = vrot.slane %v2522_v48, 7  ;;  %v2530_v42 = vshrl.u32 %v6043_v14, 16  ;;  %v2135_v50 = vadd.f32 %v7593_v54, %v2088_v61  ;;  %v2533_v10 = vshll.u32 %v6043_v14, 16 }
 0x2c3   : > { %v1703_v25 = vsel %vm1610_vm1, %v1701_v9, %v1702_v34  ;;  %v1746_v37 = vpop.permute.xlu1 %1745  ;;  %v7872_v27 = vsel %vm1931_vm2, %v2022_v59, %v2023_v8 }
 0x2c4   : > { %v2527_v31 = vor.u32 %v2525_v12, %v2524_v57  ;;  %v2532_v24 = vrot.slane %v2530_v42, 7  ;;  %1783 = vrot.lane.b32.xlu0 %v1703_v25, %s6620_s27  ;;  %vm2175_vm6 = vcmp.gt.f32.partialorder %v2135_v50, 0.0  ;;  %v2215_v23 = vmul.f32 0.1, %v2135_v50 }
 0x2c5   : > { %v1848_v17 = vadd.f32 %v1746_v37, %v7557_v4  ;;  %v2528_v48 = vrot.slane %v2524_v57, 4  ;;  %v1531_v61 = vpop.f32.mrb[112].mxu0 }
 0x2c6   : > { %v3026_v41 = vld [vmem:[#allocation2 + $0x50] sm:$0xf]  ;;  %v2858_v30 = vsel %vm7617_vm8, %v2527_v31, %v2857_v44  ;;  %v2535_v9 = vor.u32 %v2533_v10, %v2532_v24  ;;  %v2537_v12 = vrot.slane %v2532_v24, 4  ;;  %v2255_v13 = vsel %vm2175_vm6, %v2135_v50, %v2215_v23  ;;  %v1533_v25 = vpop.f32.mrb[113].mxu0 }
 0x2c7   : > { %v3027_v14 = vsel %vm7617_vm8, 0, %v3026_v41  ;;  %2859 = vst [vmem:[#allocation2 + $0x54] sm:$0xf] %v2858_v30  ;;  %v2089_v42 = vadd.f32 %v7571_v19, %v1848_v17  ;;  %v1704_v59 = vrot.slane %v1531_v61, 1  ;;  %v6044_v44 = vpack.c.bf16 %v2255_v13, %v2255_v13  ;;  %v7884_v24 = vpop.f32.mrb[114].mxu0 }
 0x2c8   : > { %3028 = vst [vmem:[#allocation2 + $0x50] sm:$0xf] %v3027_v14  ;;  %v2536_v4 = vsel %vm7645_vm12, %v2528_v48, %v2535_v9  ;;  %v2862_v57 = vsel %vm7635_vm11, %v2537_v12, %v2861_v26  ;;  %v2025_v31 = vrot.slane %v1533_v25, 2  ;;  %v1537_v10 = vpop.f32.mrb[115].mxu0  ;;  %v2864_v30 = vld [vmem:[#allocation2 + $0x60] sm:$0xf] }
 0x2c9   : > { %2860 = vst.msk [vmem:[#allocation2 + $0x58] sm:$0xf] %vm2802_vm4, %v2536_v4  ;;  %2863 = vst [vmem:[#allocation2 + $0x5c] sm:$0x1] %v2862_v57  ;;  %v2136_v50 = vadd.f32 %v7593_v54, %v2089_v42  ;;  %v1705_v19 = vsel %vm1610_vm1, %v1702_v34, %v1704_v59  ;;  %v2539_v37 = vshrl.u32 %v6044_v44, 16  ;;  %v2542_v41 = vshll.u32 %v6044_v44, 16 }
 0x2ca   : > { %1785 = vrot.lane.b32.xlu1 %v1705_v19, %s6620_s27  ;;  %v7891_v23 = vsel %vm1931_vm2, %v2023_v8, %v2025_v31  ;;  %v1706_v34 = vrot.slane %v7884_v24, 1  ;;  %v2027_v13 = vrot.slane %v1537_v10, 2 }
 0x2cb   : > { %vm2176_vm7 = vcmp.gt.f32.partialorder %v2136_v50, 0.0  ;;  %v2216_v26 = vmul.f32 0.1, %v2136_v50  ;;  %v2541_v17 = vrot.slane %v2539_v37, 7  ;;  %v1748_v48 = vpop.permute.xlu0 %1747 }
 0x2cc   : > { %v1849_v12 = vadd.f32 %v1748_v48, %v7566_v62 }
 0x2cd   : > { %v2256_v9 = vsel %vm2176_vm7, %v2136_v50, %v2216_v26  ;;  %v2544_v54 = vor.u32 %v2542_v41, %v2541_v17  ;;  %v1750_v42 = vpop.permute.xlu1 %1749  ;;  %v7895_v59 = vpop.f32.mrb[116].mxu0 }
 0x2ce   : > { %v2969_v61 = vld [vmem:[#allocation2 + $0x54] sm:$0x1]  ;;  %v6045_v14 = vpack.c.bf16 %v2256_v9, %v2256_v9  ;;  %v2090_v25 = vadd.f32 %v7580_v6, %v1849_v12  ;;  %v1850_v4 = vadd.f32 %v1750_v42, %v7573_v55  ;;  %v1707_v57 = vrot.slane %v7895_v59, 1  ;;  %v1543_v44 = vpop.f32.mrb[117].mxu0  ;;  %v7909_v55 = vld [vmem:[%s9026_s4] ss:$0 sm:$0xff] }
 0x2cf   : > { %v2970_v8 = vsel %vm7635_vm11, 0, %v2969_v61  ;;  %v2865_v31 = vsel %vm7617_vm8, %v2544_v54, %v2864_v30  ;;  %v2028_v19 = vrot.slane %v1543_v44, 2  ;;  %v1545_v37 = vpop.f32.mrb[118].mxu0 }
 0x2d0   : > { %2971 = vst [vmem:[#allocation2 + $0x54] sm:$0x1] %v2970_v8  ;;  %v3029_v62 = vld [vmem:[#allocation2 + $0x5c] sm:$0xf]  ;;  %v2547_v50 = vshrl.u32 %v6045_v14, 16  ;;  %v2550_v10 = vshll.u32 %v6045_v14, 16  ;;  %v2137_v6 = vadd.f32 %v7909_v55, %v2090_v25  ;;  %v2091_v41 = vadd.f32 %v7585_v43, %v1850_v4 }
 0x2d1   : > { %v3030_v26 = vsel %vm7617_vm8, 0, %v3029_v62  ;;  %2866 = vst [vmem:[#allocation2 + $0x60] sm:$0xf] %v2865_v31  ;;  %v1709_v48 = vrot.slane %v1545_v37, 1  ;;  %v1547_v9 = vpop.f32.mrb[119].mxu0  ;;  %v1708_v61 = vsel %vm1610_vm1, %v1706_v34, %v1707_v57  ;;  %v7915_v54 = vsel %vm1931_vm2, %v2027_v13, %v2028_v19 }
 0x2d2   : > { %3031 = vst [vmem:[#allocation2 + $0x5c] sm:$0xf] %v3030_v26  ;;  %v2549_v30 = vrot.slane %v2547_v50, 7  ;;  %v2030_v12 = vrot.slane %v1547_v9, 2  ;;  %v2868_v14 = vld [vmem:[#allocation2 + $0x68] sm:$0x1]  ;;  %v2138_v8 = vadd.f32 %v7909_v55, %v2091_v41  ;;  %1787 = vrot.lane.b32.xlu0 %v1708_v61, %s6620_s27 }
 0x2d3   : > { %vm2177_vm9 = vcmp.gt.f32.partialorder %v2137_v6, 0.0  ;;  %v2217_v42 = vmul.f32 0.1, %v2137_v6  ;;  %v1710_v25 = vsel %vm1610_vm1, %v1707_v57, %v1709_v48  ;;  %v2545_v43 = vrot.slane %v2541_v17, 4  ;;  %v2871_v61 = vld [vmem:[#allocation2 + $0x6c] sm:$0xf] }
 0x2d4   : > { %v2552_v4 = vor.u32 %v2550_v10, %v2549_v30  ;;  %v2554_v44 = vrot.slane %v2549_v30, 4  ;;  %1789 = vrot.lane.b32.xlu1 %v1710_v25, %s6620_s27  ;;  %v7922_v62 = vsel %vm1931_vm2, %v2028_v19, %v2030_v12  ;;  %vm2178_vm10 = vcmp.gt.f32.partialorder %v2138_v8, 0.0 }
 0x2d5   : > { %v2257_v34 = vsel %vm2177_vm9, %v2137_v6, %v2217_v42  ;;  %v2218_v13 = vmul.f32 0.1, %v2138_v8  ;;  %v1752_v26 = vpop.permute.xlu0 %1751 }
 0x2d6   : > { %v2553_v31 = vsel %vm7645_vm12, %v2545_v43, %v2552_v4  ;;  %v2869_v50 = vsel %vm7635_vm11, %v2554_v44, %v2868_v14  ;;  %v6046_v37 = vpack.c.bf16 %v2257_v34, %v2257_v34  ;;  %v1851_v57 = vadd.f32 %v1752_v26, %v7587_v53  ;;  %v2875_v53 = vld [vmem:[#allocation2 + $0x74] sm:$0x1] }
 0x2d7   : > { %2867 = vst.msk [vmem:[#allocation2 + $0x64] sm:$0xf] %vm2802_vm4, %v2553_v31  ;;  %2870 = vst [vmem:[#allocation2 + $0x68] sm:$0x1] %v2869_v50  ;;  %v2258_v17 = vsel %vm2178_vm10, %v2138_v8, %v2218_v13 }
 0x2d8   : > { %v2972_v10 = vld [vmem:[#allocation2 + $0x60] sm:$0x1]  ;;  %v2556_v19 = vshrl.u32 %v6046_v37, 16  ;;  %v6047_v41 = vpack.c.bf16 %v2258_v17, %v2258_v17  ;;  %v2092_v48 = vadd.f32 %v7604_v32, %v1851_v57  ;;  %v2559_v30 = vshll.u32 %v6046_v37, 16 }
 0x2d9   : > { %v2973_v6 = vsel %vm7635_vm11, 0, %v2972_v10 }
 0x2da   : > { %2974 = vst [vmem:[#allocation2 + $0x60] sm:$0x1] %v2973_v6  ;;  %v2558_v9 = vrot.slane %v2556_v19, 7  ;;  %v2564_v12 = vshrl.u32 %v6047_v41, 16  ;;  %v2139_v14 = vadd.f32 %v7909_v55, %v2092_v48  ;;  %v2567_v8 = vshll.u32 %v6047_v41, 16 }
 0x2db   : > { %v1754_v43 = vpop.permute.xlu1 %1753 }
 0x2dc   : > { %v2561_v42 = vor.u32 %v2559_v30, %v2558_v9  ;;  %v2566_v25 = vrot.slane %v2564_v12, 7  ;;  %vm2179_vm13 = vcmp.gt.f32.partialorder %v2139_v14, 0.0  ;;  %v2219_v4 = vmul.f32 0.1, %v2139_v14 }
 0x2dd   : > { %v1852_v44 = vadd.f32 %v1754_v43, %v7595_v11  ;;  %v2562_v13 = vrot.slane %v2558_v9, 4 }
 0x2de   : > { %v3032_v34 = vld [vmem:[#allocation2 + $0x68] sm:$0xf]  ;;  %v2872_v32 = vsel %vm7617_vm8, %v2561_v42, %v2871_v61  ;;  %v2569_v31 = vor.u32 %v2567_v8, %v2566_v25  ;;  %v2571_v50 = vrot.slane %v2566_v25, 4  ;;  %v2259_v26 = vsel %vm2179_vm13, %v2139_v14, %v2219_v4  ;;  %v9161_v4 = vld [vmem:[#allocation20_spill] sm:$0xff] }
 0x2df   : > { %v3033_v37 = vsel %vm7617_vm8, 0, %v3032_v34  ;;  %2873 = vst [vmem:[#allocation2 + $0x6c] sm:$0xf] %v2872_v32  ;;  %v2093_v17 = vadd.f32 %v7614_v60, %v1852_v44  ;;  %v6048_v10 = vpack.c.bf16 %v2259_v26, %v2259_v26  ;;  %v2878_v60 = vld [vmem:[#allocation2 + $0x78] sm:$0xf] }
 0x2e0   : > { %3034 = vst [vmem:[#allocation2 + $0x68] sm:$0xf] %v3033_v37  ;;  %v2570_v57 = vsel %vm7645_vm12, %v2562_v13, %v2569_v31  ;;  %v2876_v11 = vsel %vm7635_vm11, %v2571_v50, %v2875_v53  ;;  %v9162_v50 = vld [vmem:[#allocation21_spill] sm:$0xff] }
 0x2e1   : > { %2874 = vst.msk [vmem:[#allocation2 + $0x70] sm:$0xf] %vm2802_vm4, %v2570_v57  ;;  %2877 = vst [vmem:[#allocation2 + $0x74] sm:$0x1] %v2876_v11  ;;  %v2140_v19 = vadd.f32 %v7909_v55, %v2093_v17  ;;  %v2573_v41 = vshrl.u32 %v6048_v10, 16  ;;  %v2576_v9 = vshll.u32 %v6048_v10, 16 }
 0x2e3   : > { %vm2180_vm14 = vcmp.gt.f32.partialorder %v2140_v19, 0.0  ;;  %v2220_v6 = vmul.f32 0.1, %v2140_v19  ;;  %v2575_v48 = vrot.slane %v2573_v41, 7  ;;  %v1756_v30 = vpop.permute.xlu0 %1755 }
 0x2e4   : > { %v1853_v61 = vadd.f32 %v1756_v30, %v7608_v46 }
 0x2e5   : > { %v2260_v12 = vsel %vm2180_vm14, %v2140_v19, %v2220_v6  ;;  %v2578_v42 = vor.u32 %v2576_v9, %v2575_v48  ;;  %v1758_v8 = vpop.permute.xlu1 %1757  ;;  %v2579_v10 = vrot.slane %v2575_v48, 4 }
 0x2e6   : > { %v2975_v14 = vld [vmem:[#allocation2 + $0x6c] sm:$0x1]  ;;  %v6049_v25 = vpack.c.bf16 %v2260_v12, %v2260_v12  ;;  %v2094_v53 = vadd.f32 %v7641_v28, %v1853_v61  ;;  %v1854_v44 = vadd.f32 %v1758_v8, %v9161_v4  ;;  %v2882_v28 = vld [vmem:[#allocation2 + $0x80] sm:$0x1] }
 0x2e7   : > { %v2976_v43 = vsel %vm7635_vm11, 0, %v2975_v14  ;;  %v2879_v13 = vsel %vm7617_vm8, %v2578_v42, %v2878_v60  ;;  %v9163_v42 = vld [vmem:[#allocation23_spill] sm:$0xff] }
 0x2e8   : > { %2977 = vst [vmem:[#allocation2 + $0x6c] sm:$0x1] %v2976_v43  ;;  %v3035_v34 = vld [vmem:[#allocation2 + $0x74] sm:$0xf]  ;;  %v2581_v32 = vshrl.u32 %v6049_v25, 16  ;;  %v2141_v31 = vadd.f32 %v7909_v55, %v2094_v53  ;;  %v2095_v37 = vadd.f32 %v9162_v50, %v1854_v44  ;;  %v2584_v17 = vshll.u32 %v6049_v25, 16 }
 0x2e9   : > { %v3036_v46 = vsel %vm7617_vm8, 0, %v3035_v34  ;;  %2880 = vst [vmem:[#allocation2 + $0x78] sm:$0xf] %v2879_v13 }
 0x2ea   : > { %3037 = vst [vmem:[#allocation2 + $0x74] sm:$0xf] %v3036_v46  ;;  %v2583_v26 = vrot.slane %v2581_v32, 7  ;;  %vm2181_vm15 = vcmp.gt.f32.partialorder %v2141_v31, 0.0  ;;  %v2221_v57 = vmul.f32 0.1, %v2141_v31  ;;  %v2142_v11 = vadd.f32 %v7909_v55, %v2095_v37 }
 0x2eb   : > { %v2885_v32 = vld [vmem:[#allocation2 + $0x84] sm:$0xf] }
 0x2ec   : > { %v2586_v19 = vor.u32 %v2584_v17, %v2583_v26  ;;  %v2588_v41 = vrot.slane %v2583_v26, 4  ;;  %v2261_v6 = vsel %vm2181_vm15, %v2141_v31, %v2221_v57  ;;  %vm2182_vm3 = vcmp.gt.f32.partialorder %v2142_v11, 0.0  ;;  %v2889_v17 = vld [vmem:[#allocation2 + $0x8c] sm:$0x1]  ;;  %v9164_v57 = vld [vmem:[#allocation25_spill] sm:$0xff] }
 0x2ed   : > { %v2222_v9 = vmul.f32 0.1, %v2142_v11  ;;  %v6050_v12 = vpack.c.bf16 %v2261_v6, %v2261_v6  ;;  %v1760_v61 = vpop.permute.xlu0 %1759 }
 0x2ee   : > { %v2587_v30 = vsel %vm7645_vm12, %v2579_v10, %v2586_v19  ;;  %v2883_v60 = vsel %vm7635_vm11, %v2588_v41, %v2882_v28  ;;  %v1855_v25 = vadd.f32 %v1760_v61, %v9163_v42 }
 0x2ef   : > { %2881 = vst.msk [vmem:[#allocation2 + $0x7c] sm:$0xf] %vm2802_vm4, %v2587_v30  ;;  %2884 = vst [vmem:[#allocation2 + $0x80] sm:$0x1] %v2883_v60  ;;  %v2262_v14 = vsel %vm2182_vm3, %v2142_v11, %v2222_v9  ;;  %v2590_v8 = vshrl.u32 %v6050_v12, 16  ;;  %v2593_v34 = vshll.u32 %v6050_v12, 16 }
 0x2f0   : > { %v2978_v48 = vld [vmem:[#allocation2 + $0x78] sm:$0x1]  ;;  %v6051_v43 = vpack.c.bf16 %v2262_v14, %v2262_v14  ;;  %v2096_v4 = vadd.f32 %v7674_v56, %v1855_v25  ;;  %3076 = vst.msk [vmem:[#allocation2 + $0x7c] sm:$0xf] (!%p5874_p10), %vm2802_vm4, %v6621_v49 }
 0x2f1   : > { %v2979_v53 = vsel %vm7635_vm11, 0, %v2978_v48  ;;  %v2592_v44 = vrot.slane %v2590_v8, 7 }
 0x2f2   : > { %2980 = vst [vmem:[#allocation2 + $0x78] sm:$0x1] %v2979_v53  ;;  %v2598_v13 = vshrl.u32 %v6051_v43, 16  ;;  %v2143_v46 = vadd.f32 %v7909_v55, %v2096_v4  ;;  %v2601_v37 = vshll.u32 %v6051_v43, 16  ;;  %v2892_v53 = vld [vmem:[#allocation2 + $0x90] sm:$0xf] }
 0x2f3   : > { %v2595_v31 = vor.u32 %v2593_v34, %v2592_v44  ;;  %v1762_v26 = vpop.permute.xlu1 %1761  ;;  %v2596_v19 = vrot.slane %v2592_v44, 4  ;;  %3075 = vst.msk [vmem:[#allocation2 + $0x78] sm:$0xf] (!%p5874_p10), %vm2802_vm4, %v6621_v49 }
 0x2f4   : > { %v2600_v50 = vrot.slane %v2598_v13, 7  ;;  %vm2183_vm5 = vcmp.gt.f32.partialorder %v2143_v46, 0.0  ;;  %v2223_v28 = vmul.f32 0.1, %v2143_v46  ;;  %v1856_v11 = vadd.f32 %v1762_v26, %v9164_v57 }
 0x2f5   : > { %v2886_v56 = vsel %vm7617_vm8, %v2595_v31, %v2885_v32 }
 0x2f6   : > { %v3038_v10 = vld [vmem:[#allocation2 + $0x80] sm:$0xf]  ;;  %v2603_v41 = vor.u32 %v2601_v37, %v2600_v50  ;;  %v2605_v6 = vrot.slane %v2600_v50, 4  ;;  %2887 = vst [vmem:[#allocation2 + $0x84] sm:$0xf] %v2886_v56  ;;  %v2263_v30 = vsel %vm2183_vm5, %v2143_v46, %v2223_v28  ;;  %v2097_v60 = vadd.f32 %v7693_v39, %v1856_v11 }
 0x2f7   : > { %v3039_v9 = vsel %vm7617_vm8, 0, %v3038_v10  ;;  %v6052_v14 = vpack.c.bf16 %v2263_v30, %v2263_v30  ;;  %v2896_v56 = vld [vmem:[#allocation2 + $0x98] sm:$0x1] }
 0x2f8   : > { %3040 = vst [vmem:[#allocation2 + $0x80] sm:$0xf] %v3039_v9  ;;  %v2604_v12 = vsel %vm7645_vm12, %v2596_v19, %v2603_v41  ;;  %v2890_v61 = vsel %vm7635_vm11, %v2605_v6, %v2889_v17  ;;  %v2144_v42 = vadd.f32 %v7909_v55, %v2097_v60 }
 0x2f9   : > { %2888 = vst.msk [vmem:[#allocation2 + $0x88] sm:$0xf] %vm2802_vm4, %v2604_v12  ;;  %2891 = vst [vmem:[#allocation2 + $0x8c] sm:$0x1] %v2890_v61  ;;  %v2607_v25 = vshrl.u32 %v6052_v14, 16  ;;  %v2610_v43 = vshll.u32 %v6052_v14, 16 }
 0x2fa   : > { %vm2184_vm6 = vcmp.gt.f32.partialorder %v2144_v42, 0.0  ;;  %v2224_v48 = vmul.f32 0.1, %v2144_v42  ;;  %3077 = vst.msk [vmem:[#allocation2 + $0x80] sm:$0xf] (!%p5874_p10), %vm2802_vm4, %v6621_v49 }
 0x2fb   : > { %v2609_v8 = vrot.slane %v2607_v25, 7  ;;  %v1764_v4 = vpop.permute.xlu0 %1763 }
 0x2fc   : > { %v2264_v39 = vsel %vm2184_vm6, %v2144_v42, %v2224_v48  ;;  %v1857_v32 = vadd.f32 %v1764_v4, %v7686_v52 }
 0x2fd   : > { %v2981_v44 = vld [vmem:[#allocation2 + $0x84] sm:$0x1]  ;;  %v2612_v34 = vor.u32 %v2610_v43, %v2609_v8  ;;  %v6053_v13 = vpack.c.bf16 %v2264_v39, %v2264_v39  ;;  %v1766_v46 = vpop.permute.xlu1 %1765 }
 0x2fe   : > { %v2982_v31 = vsel %vm7635_vm11, 0, %v2981_v44  ;;  %v1858_v50 = vadd.f32 %v1766_v46, %v7697_v63  ;;  %v2098_v28 = vadd.f32 %v7712_v33, %v1857_v32  ;;  %v2613_v63 = vrot.slane %v2609_v8, 4  ;;  %v2899_v32 = vld [vmem:[#allocation2 + $0x9c] sm:$0xf] }
 0x2ff   : > { %2983 = vst [vmem:[#allocation2 + $0x84] sm:$0x1] %v2982_v31  ;;  %v2893_v26 = vsel %vm7617_vm8, %v2612_v34, %v2892_v53  ;;  %v2615_v17 = vshrl.u32 %v6053_v13, 16  ;;  %v2618_v10 = vshll.u32 %v6053_v13, 16 }
 0x300   : > { %v3041_v37 = vld [vmem:[#allocation2 + $0x8c] sm:$0xf]  ;;  %2894 = vst [vmem:[#allocation2 + $0x90] sm:$0xf] %v2893_v26  ;;  %v2099_v52 = vadd.f32 %v7719_v15, %v1858_v50  ;;  %v2145_v19 = vadd.f32 %v7909_v55, %v2098_v28 }
 0x301   : > { %v3042_v57 = vsel %vm7617_vm8, 0, %v3041_v37  ;;  %v2617_v11 = vrot.slane %v2615_v17, 7 }
 0x302   : > { %3043 = vst [vmem:[#allocation2 + $0x8c] sm:$0xf] %v3042_v57  ;;  %v2146_v41 = vadd.f32 %v7909_v55, %v2099_v52  ;;  %vm2185_vm7 = vcmp.gt.f32.partialorder %v2145_v19, 0.0  ;;  %v2225_v30 = vmul.f32 0.1, %v2145_v19 }
 0x303   : > { %v2620_v6 = vor.u32 %v2618_v10, %v2617_v11  ;;  %v2622_v9 = vrot.slane %v2617_v11, 4 }
 0x304   : > { %vm2186_vm9 = vcmp.gt.f32.partialorder %v2146_v41, 0.0  ;;  %v2226_v33 = vmul.f32 0.1, %v2146_v41  ;;  %v2265_v12 = vsel %vm2185_vm7, %v2145_v19, %v2225_v30 }
 0x305   : > { %v2621_v60 = vsel %vm7645_vm12, %v2613_v63, %v2620_v6  ;;  %v2897_v15 = vsel %vm7635_vm11, %v2622_v9, %v2896_v56  ;;  %v1768_v61 = vpop.permute.xlu0 %1767  ;;  %v6054_v14 = vpack.c.bf16 %v2265_v12, %v2265_v12 }
 0x306   : > { %2895 = vst.msk [vmem:[#allocation2 + $0x94] sm:$0xf] %vm2802_vm4, %v2621_v60  ;;  %2898 = vst [vmem:[#allocation2 + $0x98] sm:$0x1] %v2897_v15  ;;  %v2266_v42 = vsel %vm2186_vm9, %v2146_v41, %v2226_v33  ;;  %v1859_v25 = vadd.f32 %v1768_v61, %v7725_v16  ;;  %v2903_v16 = vld [vmem:[#allocation2 + $0xa4] sm:$0x1] }
 0x307   : > { %v2984_v48 = vld [vmem:[#allocation2 + $0x90] sm:$0x1]  ;;  %v6055_v8 = vpack.c.bf16 %v2266_v42, %v2266_v42  ;;  %v2624_v53 = vshrl.u32 %v6054_v14, 16  ;;  %v2627_v34 = vshll.u32 %v6054_v14, 16  ;;  %v2906_v15 = vld [vmem:[#allocation2 + $0xa8] sm:$0xf] }
 0x308   : > { %v2985_v43 = vsel %vm7635_vm11, 0, %v2984_v48  ;;  %v2100_v39 = vadd.f32 %v7740_v35, %v1859_v25 }
 0x309   : > { %2986 = vst [vmem:[#allocation2 + $0x90] sm:$0x1] %v2985_v43  ;;  %v2632_v4 = vshrl.u32 %v6055_v8, 16  ;;  %v2626_v44 = vrot.slane %v2624_v53, 7  ;;  %v2635_v31 = vshll.u32 %v6055_v8, 16 }
 0x30a   : > { %v2147_v13 = vadd.f32 %v7909_v55, %v2100_v39 }
 0x30b   : > { %v2634_v46 = vrot.slane %v2632_v4, 7  ;;  %v1770_v50 = vpop.permute.xlu1 %1769  ;;  %v2629_v37 = vor.u32 %v2627_v34, %v2626_v44  ;;  %v2630_v28 = vrot.slane %v2626_v44, 4 }
 0x30c   : > { %vm2187_vm10 = vcmp.gt.f32.partialorder %v2147_v13, 0.0  ;;  %v2227_v26 = vmul.f32 0.1, %v2147_v13  ;;  %v1860_v35 = vadd.f32 %v1770_v50, %v7730_v21  ;;  %v2910_v50 = vld [vmem:[#allocation2 + $0xb0] sm:$0x1] }
 0x30d   : > { %v3044_v17 = vld [vmem:[#allocation2 + $0x98] sm:$0xf]  ;;  %v2637_v57 = vor.u32 %v2635_v31, %v2634_v46  ;;  %v2639_v52 = vrot.slane %v2634_v46, 4  ;;  %v2900_v10 = vsel %vm7617_vm8, %v2629_v37, %v2899_v32 }
 0x30e   : > { %v3045_v11 = vsel %vm7617_vm8, 0, %v3044_v17  ;;  %v2267_v19 = vsel %vm2187_vm10, %v2147_v13, %v2227_v26  ;;  %2901 = vst [vmem:[#allocation2 + $0x9c] sm:$0xf] %v2900_v10  ;;  %v2101_v6 = vadd.f32 %v7759_v0, %v1860_v35 }
 0x30f   : > { %3046 = vst [vmem:[#allocation2 + $0x98] sm:$0xf] %v3045_v11  ;;  %v2638_v63 = vsel %vm7645_vm12, %v2630_v28, %v2637_v57  ;;  %v2904_v56 = vsel %vm7635_vm11, %v2639_v52, %v2903_v16  ;;  %v6056_v41 = vpack.c.bf16 %v2267_v19, %v2267_v19 }
 0x310   : > { %2902 = vst.msk [vmem:[#allocation2 + $0xa0] sm:$0xf] %vm2802_vm4, %v2638_v63  ;;  %2905 = vst [vmem:[#allocation2 + $0xa4] sm:$0x1] %v2904_v56  ;;  %v2148_v9 = vadd.f32 %v7909_v55, %v2101_v6 }
 0x311   : > { %v2641_v21 = vshrl.u32 %v6056_v41, 16  ;;  %v2644_v33 = vshll.u32 %v6056_v41, 16 }
 0x312   : > { %vm2188_vm13 = vcmp.gt.f32.partialorder %v2148_v9, 0.0  ;;  %v2228_v60 = vmul.f32 0.1, %v2148_v9 }
 0x313   : > { %v2643_v30 = vrot.slane %v2641_v21, 7 }
 0x314   : > { %v1772_v12 = vpop.permute.xlu0 %1771  ;;  %v2268_v14 = vsel %vm2188_vm13, %v2148_v9, %v2228_v60 }
 0x315   : > { %v2646_v61 = vor.u32 %v2644_v33, %v2643_v30  ;;  %v1861_v42 = vadd.f32 %v1772_v12, %v7752_v18  ;;  %v2987_v48 = vld [vmem:[#allocation2 + $0x9c] sm:$0x1]  ;;  %v6057_v8 = vpack.c.bf16 %v2268_v14, %v2268_v14  ;;  %v2647_v31 = vrot.slane %v2643_v30, 4  ;;  %v2913_v30 = vld [vmem:[#allocation2 + $0xb4] sm:$0xf] }
 0x316   : > { %v1774_v25 = vpop.permute.xlu1 %1773  ;;  %v2988_v43 = vsel %vm7635_vm11, 0, %v2987_v48 }
 0x317   : > { %v1862_v0 = vadd.f32 %v1774_v25, %v7763_v1  ;;  %v3047_v53 = vld [vmem:[#allocation2 + $0xa4] sm:$0xf]  ;;  %v2907_v39 = vsel %vm7617_vm8, %v2646_v61, %v2906_v15  ;;  %v2102_v4 = vadd.f32 %v7778_v36, %v1861_v42  ;;  %2989 = vst [vmem:[#allocation2 + $0x9c] sm:$0x1] %v2988_v43  ;;  %v2649_v18 = vshrl.u32 %v6057_v8, 16 }
 0x318   : > { %v3048_v44 = vsel %vm7617_vm8, 0, %v3047_v53  ;;  %2908 = vst [vmem:[#allocation2 + $0xa8] sm:$0xf] %v2907_v39  ;;  %v2652_v32 = vshll.u32 %v6057_v8, 16  ;;  %v2917_v42 = vld [vmem:[#allocation2 + $0xbc] sm:$0x1] }
 0x319   : > { %v2103_v34 = vadd.f32 %v7785_v40, %v1862_v0  ;;  %3049 = vst [vmem:[#allocation2 + $0xa4] sm:$0xf] %v3048_v44  ;;  %v2149_v1 = vadd.f32 %v7909_v55, %v2102_v4  ;;  %v2651_v13 = vrot.slane %v2649_v18, 7 }
 0x31b   : > { %v2150_v46 = vadd.f32 %v7909_v55, %v2103_v34  ;;  %vm2189_vm14 = vcmp.gt.f32.partialorder %v2149_v1, 0.0  ;;  %v2229_v37 = vmul.f32 0.1, %v2149_v1  ;;  %v2654_v36 = vor.u32 %v2652_v32, %v2651_v13 }
 0x31c   : > { %v2656_v16 = vrot.slane %v2651_v13, 4 }
 0x31d   : > { %vm2190_vm15 = vcmp.gt.f32.partialorder %v2150_v46, 0.0  ;;  %v2230_v26 = vmul.f32 0.1, %v2150_v46  ;;  %v2269_v17 = vsel %vm2189_vm14, %v2149_v1, %v2229_v37  ;;  %v2655_v40 = vsel %vm7645_vm12, %v2647_v31, %v2654_v36  ;;  %v2920_v31 = vld [vmem:[#allocation2 + $0xc0] sm:$0xf] }
 0x31e   : > { %v1776_v28 = vpop.permute.xlu0 %1775  ;;  %v2911_v57 = vsel %vm7635_vm11, %v2656_v16, %v2910_v50  ;;  %v6058_v52 = vpack.c.bf16 %v2269_v17, %v2269_v17  ;;  %2909 = vst.msk [vmem:[#allocation2 + $0xac] sm:$0xf] %vm2802_vm4, %v2655_v40 }
 0x31f   : > { %v2270_v35 = vsel %vm2190_vm15, %v2150_v46, %v2230_v26  ;;  %v2990_v11 = vld [vmem:[#allocation2 + $0xa8] sm:$0x1]  ;;  %2912 = vst [vmem:[#allocation2 + $0xb0] sm:$0x1] %v2911_v57  ;;  %v1863_v19 = vadd.f32 %v1776_v28, %v7791_v51 }
 0x320   : > { %v6059_v10 = vpack.c.bf16 %v2270_v35, %v2270_v35  ;;  %v2991_v63 = vsel %vm7635_vm11, 0, %v2990_v11  ;;  %v2658_v56 = vshrl.u32 %v6058_v52, 16  ;;  %v2661_v9 = vshll.u32 %v6058_v52, 16 }
 0x321   : > { %2992 = vst [vmem:[#allocation2 + $0xa8] sm:$0x1] %v2991_v63  ;;  %v2104_v6 = vadd.f32 %v7806_v20, %v1863_v19 }
 0x322   : > { %v2666_v41 = vshrl.u32 %v6059_v10, 16  ;;  %v2660_v21 = vrot.slane %v2658_v56, 7  ;;  %v2669_v60 = vshll.u32 %v6059_v10, 16  ;;  %v2924_v56 = vld [vmem:[#allocation2 + $0xc8] sm:$0x1] }
 0x323   : > { %v2151_v15 = vadd.f32 %v7909_v55, %v2104_v6 }
 0x324   : > { %v2668_v33 = vrot.slane %v2666_v41, 7  ;;  %v1778_v12 = vpop.permute.xlu1 %1777  ;;  %v2663_v61 = vor.u32 %v2661_v9, %v2660_v21  ;;  %v2664_v14 = vrot.slane %v2660_v21, 4 }
 0x325   : > { %v1864_v51 = vadd.f32 %v1778_v12, %v7796_v2  ;;  %vm2191_vm3 = vcmp.gt.f32.partialorder %v2151_v15, 0.0  ;;  %v2231_v8 = vmul.f32 0.1, %v2151_v15 }
 0x326   : > { %v2671_v25 = vor.u32 %v2669_v60, %v2668_v33  ;;  %v2673_v48 = vrot.slane %v2668_v33, 4  ;;  %v3050_v0 = vld [vmem:[#allocation2 + $0xb0] sm:$0xf]  ;;  %v2914_v20 = vsel %vm7617_vm8, %v2663_v61, %v2913_v30 }
 0x327   : > { %v2105_v43 = vadd.f32 %v7825_v5, %v1864_v51  ;;  %v3051_v53 = vsel %vm7617_vm8, 0, %v3050_v0  ;;  %2915 = vst [vmem:[#allocation2 + $0xb4] sm:$0xf] %v2914_v20  ;;  %v2271_v4 = vsel %vm2191_vm3, %v2151_v15, %v2231_v8 }
 0x328   : > { %v2672_v39 = vsel %vm7645_vm12, %v2664_v14, %v2671_v25  ;;  %v2918_v2 = vsel %vm7635_vm11, %v2673_v48, %v2917_v42  ;;  %3052 = vst [vmem:[#allocation2 + $0xb0] sm:$0xf] %v3051_v53  ;;  %v6060_v44 = vpack.c.bf16 %v2271_v4, %v2271_v4  ;;  %v2927_v53 = vld [vmem:[#allocation2 + $0xcc] sm:$0xf] }
 0x329   : > { %2916 = vst.msk [vmem:[#allocation2 + $0xb8] sm:$0xf] %vm2802_vm4, %v2672_v39  ;;  %2919 = vst [vmem:[#allocation2 + $0xbc] sm:$0x1] %v2918_v2  ;;  %v2152_v18 = vadd.f32 %v7909_v55, %v2105_v43 }
 0x32a   : > { %v2675_v34 = vshrl.u32 %v6060_v44, 16  ;;  %v2678_v13 = vshll.u32 %v6060_v44, 16 }
 0x32b   : > { %vm2192_vm5 = vcmp.gt.f32.partialorder %v2152_v18, 0.0  ;;  %v2232_v5 = vmul.f32 0.1, %v2152_v18 }
 0x32c   : > { %v2677_v1 = vrot.slane %v2675_v34, 7  ;;  %v1780_v46 = vpop.permute.xlu0 %1779 }
 0x32d   : > { %v2272_v32 = vsel %vm2192_vm5, %v2152_v18, %v2232_v5  ;;  %v1865_v37 = vadd.f32 %v1780_v46, %v7818_v7 }
 0x32e   : > { %v6061_v50 = vpack.c.bf16 %v2272_v32, %v2272_v32  ;;  %v1782_v36 = vpop.permute.xlu1 %1781  ;;  %v2993_v16 = vld [vmem:[#allocation2 + $0xb4] sm:$0x1]  ;;  %v2680_v26 = vor.u32 %v2678_v13, %v2677_v1  ;;  %v2681_v63 = vrot.slane %v2677_v1, 4 }
 0x32f   : > { %v1866_v17 = vadd.f32 %v1782_v36, %v7829_v22  ;;  %v2994_v28 = vsel %vm7635_vm11, 0, %v2993_v16  ;;  %v2106_v52 = vadd.f32 %v7844_v38, %v1865_v37 }
 0x330   : > { %v3053_v40 = vld [vmem:[#allocation2 + $0xbc] sm:$0xf]  ;;  %v2683_v57 = vshrl.u32 %v6061_v50, 16  ;;  %2995 = vst [vmem:[#allocation2 + $0xb4] sm:$0x1] %v2994_v28  ;;  %v2921_v11 = vsel %vm7617_vm8, %v2680_v26, %v2920_v31  ;;  %v2686_v22 = vshll.u32 %v6061_v50, 16 }
 0x331   : > { %v3054_v35 = vsel %vm7617_vm8, 0, %v3053_v40  ;;  %v2107_v7 = vadd.f32 %v7851_v58, %v1866_v17  ;;  %2922 = vst [vmem:[#allocation2 + $0xc0] sm:$0xf] %v2921_v11  ;;  %v2153_v19 = vadd.f32 %v7909_v55, %v2106_v52 }
 0x332   : > { %3055 = vst [vmem:[#allocation2 + $0xbc] sm:$0xf] %v3054_v35  ;;  %v2685_v10 = vrot.slane %v2683_v57, 7  ;;  %v2934_v57 = vld [vmem:[#allocation2 + $0xd8] sm:$0xf] }
 0x333   : > { %v2154_v41 = vadd.f32 %v7909_v55, %v2107_v7  ;;  %vm2193_vm6 = vcmp.gt.f32.partialorder %v2153_v19, 0.0  ;;  %v2233_v21 = vmul.f32 0.1, %v2153_v19 }
 0x334   : > { %v2688_v38 = vor.u32 %v2686_v22, %v2685_v10  ;;  %v2690_v6 = vrot.slane %v2685_v10, 4 }
 0x335   : > { %vm2194_vm7 = vcmp.gt.f32.partialorder %v2154_v41, 0.0  ;;  %v2234_v9 = vmul.f32 0.1, %v2154_v41  ;;  %v2273_v33 = vsel %vm2193_vm6, %v2153_v19, %v2233_v21 }
 0x336   : > { %v2689_v30 = vsel %vm7645_vm12, %v2681_v63, %v2688_v38  ;;  %v2925_v58 = vsel %vm7635_vm11, %v2690_v6, %v2924_v56  ;;  %v1784_v60 = vpop.permute.xlu0 %1783  ;;  %v6062_v15 = vpack.c.bf16 %v2273_v33, %v2273_v33 }
 0x337   : > { %2923 = vst.msk [vmem:[#allocation2 + $0xc4] sm:$0xf] %vm2802_vm4, %v2689_v30  ;;  %2926 = vst [vmem:[#allocation2 + $0xc8] sm:$0x1] %v2925_v58  ;;  %v2274_v12 = vsel %vm2194_vm7, %v2154_v41, %v2234_v9  ;;  %v1867_v61 = vadd.f32 %v1784_v60, %v7857_v45  ;;  %v2931_v45 = vld [vmem:[#allocation2 + $0xd4] sm:$0x1] }
 0x338   : > { %v6063_v14 = vpack.c.bf16 %v2274_v12, %v2274_v12  ;;  %v2996_v42 = vld [vmem:[#allocation2 + $0xc0] sm:$0x1]  ;;  %v2692_v51 = vshrl.u32 %v6062_v15, 16  ;;  %v2695_v20 = vshll.u32 %v6062_v15, 16 }
 0x339   : > { %v2108_v25 = vadd.f32 %v7872_v27, %v1867_v61  ;;  %v2997_v48 = vsel %vm7635_vm11, 0, %v2996_v42  ;;  %v2938_v60 = vld [vmem:[#allocation2 + $0xe0] sm:$0x1] }
 0x33a   : > { %v2700_v8 = vshrl.u32 %v6063_v14, 16  ;;  %2998 = vst [vmem:[#allocation2 + $0xc0] sm:$0x1] %v2997_v48  ;;  %v2694_v0 = vrot.slane %v2692_v51, 7  ;;  %v2703_v2 = vshll.u32 %v6063_v14, 16 }
 0x33b   : > { %v2155_v43 = vadd.f32 %v7909_v55, %v2108_v25 }
 0x33c   : > { %v2702_v39 = vrot.slane %v2700_v8, 7  ;;  %v1786_v4 = vpop.permute.xlu1 %1785  ;;  %v2697_v44 = vor.u32 %v2695_v20, %v2694_v0  ;;  %v2698_v5 = vrot.slane %v2694_v0, 4 }
 0x33d   : > { %vm2195_vm9 = vcmp.gt.f32.partialorder %v2155_v43, 0.0  ;;  %v2235_v18 = vmul.f32 0.1, %v2155_v43  ;;  %v1868_v13 = vadd.f32 %v1786_v4, %v7862_v47 }
 0x33e   : > { %v3056_v34 = vld [vmem:[#allocation2 + $0xc8] sm:$0xf]  ;;  %v2705_v27 = vor.u32 %v2703_v2, %v2702_v39  ;;  %v2707_v1 = vrot.slane %v2702_v39, 4  ;;  %v2928_v46 = vsel %vm7617_vm8, %v2697_v44, %v2927_v53  ;;  %v2941_v39 = vld [vmem:[#allocation2 + $0xe4] sm:$0xf] }
 0x33f   : > { %v3057_v32 = vsel %vm7617_vm8, 0, %v3056_v34  ;;  %v2275_v31 = vsel %vm2195_vm9, %v2155_v43, %v2235_v18  ;;  %2929 = vst [vmem:[#allocation2 + $0xcc] sm:$0xf] %v2928_v46  ;;  %v2109_v16 = vadd.f32 %v7891_v23, %v1868_v13 }
 0x340   : > { %3058 = vst [vmem:[#allocation2 + $0xc8] sm:$0xf] %v3057_v32  ;;  %v2706_v50 = vsel %vm7645_vm12, %v2698_v5, %v2705_v27  ;;  %v2932_v37 = vsel %vm7635_vm11, %v2707_v1, %v2931_v45  ;;  %v6064_v36 = vpack.c.bf16 %v2275_v31, %v2275_v31  ;;  %v2945_v45 = vld [vmem:[#allocation2 + $0xec] sm:$0x1] }
 0x341   : > { %2930 = vst.msk [vmem:[#allocation2 + $0xd0] sm:$0xf] %vm2802_vm4, %v2706_v50  ;;  %2933 = vst [vmem:[#allocation2 + $0xd4] sm:$0x1] %v2932_v37  ;;  %v2156_v26 = vadd.f32 %v7909_v55, %v2109_v16 }
 0x342   : > { %v2709_v47 = vshrl.u32 %v6064_v36, 16  ;;  %v2712_v28 = vshll.u32 %v6064_v36, 16 }
 0x343   : > { %vm2196_vm10 = vcmp.gt.f32.partialorder %v2156_v26, 0.0  ;;  %v2236_v40 = vmul.f32 0.1, %v2156_v26 }
 0x344   : > { %v2711_v17 = vrot.slane %v2709_v47, 7  ;;  %v1788_v52 = vpop.permute.xlu0 %1787 }
 0x345   : > { %v2276_v11 = vsel %vm2196_vm10, %v2156_v26, %v2236_v40  ;;  %v1869_v7 = vadd.f32 %v1788_v52, %v7884_v24 }
 0x346   : > { %v2714_v35 = vor.u32 %v2712_v28, %v2711_v17  ;;  %v1790_v10 = vpop.permute.xlu1 %1789  ;;  %v2999_v22 = vld [vmem:[#allocation2 + $0xcc] sm:$0x1]  ;;  %v6065_v19 = vpack.c.bf16 %v2276_v11, %v2276_v11  ;;  %v2715_v33 = vrot.slane %v2711_v17, 4 }
 0x347   : > { %v1870_v23 = vadd.f32 %v1790_v10, %v7895_v59  ;;  %v3000_v63 = vsel %vm7635_vm11, 0, %v2999_v22  ;;  %v2110_v38 = vadd.f32 %v7915_v54, %v1869_v7 }
 0x348   : > { %v3059_v56 = vld [vmem:[#allocation2 + $0xd4] sm:$0xf]  ;;  %v2935_v41 = vsel %vm7617_vm8, %v2714_v35, %v2934_v57  ;;  %3001 = vst [vmem:[#allocation2 + $0xcc] sm:$0x1] %v3000_v63  ;;  %v2717_v24 = vshrl.u32 %v6065_v19, 16  ;;  %v2720_v30 = vshll.u32 %v6065_v19, 16 }
 0x349   : > { %v3060_v6 = vsel %vm7617_vm8, 0, %v3059_v56  ;;  %2936 = vst [vmem:[#allocation2 + $0xd8] sm:$0xf] %v2935_v41  ;;  %v2111_v21 = vadd.f32 %v7922_v62, %v1870_v23  ;;  %v2157_v59 = vadd.f32 %v7909_v55, %v2110_v38 }
 0x34a   : > { %3061 = vst [vmem:[#allocation2 + $0xd4] sm:$0xf] %v3060_v6  ;;  %v2719_v9 = vrot.slane %v2717_v24, 7 }
 0x34b   : > { %v2158_v58 = vadd.f32 %v7909_v55, %v2111_v21  ;;  %vm2197_vm13 = vcmp.gt.f32.partialorder %v2157_v59, 0.0  ;;  %v2237_v15 = vmul.f32 0.1, %v2157_v59 }
 0x34c   : > { %v2722_v54 = vor.u32 %v2720_v30, %v2719_v9  ;;  %v2724_v12 = vrot.slane %v2719_v9, 4 }
 0x34d   : > { %vm2198_vm14 = vcmp.gt.f32.partialorder %v2158_v58, 0.0  ;;  %v2238_v61 = vmul.f32 0.1, %v2158_v58  ;;  %v2277_v14 = vsel %vm2197_vm13, %v2157_v59, %v2237_v15 }
 0x34e   : > { %v2723_v42 = vsel %vm7645_vm12, %v2715_v33, %v2722_v54  ;;  %v2939_v62 = vsel %vm7635_vm11, %v2724_v12, %v2938_v60  ;;  %v6066_v51 = vpack.c.bf16 %v2277_v14, %v2277_v14 }
 0x34f   : > { %v2278_v25 = vsel %vm2198_vm14, %v2158_v58, %v2238_v61  ;;  %2937 = vst.msk [vmem:[#allocation2 + $0xdc] sm:$0xf] %vm2802_vm4, %v2723_v42  ;;  %2940 = vst [vmem:[#allocation2 + $0xe0] sm:$0x1] %v2939_v62 }
 0x350   : > { %v3002_v48 = vld [vmem:[#allocation2 + $0xd8] sm:$0x1]  ;;  %v6067_v55 = vpack.c.bf16 %v2278_v25, %v2278_v25  ;;  %v2726_v0 = vshrl.u32 %v6066_v51, 16  ;;  %v2729_v53 = vshll.u32 %v6066_v51, 16 }
 0x351   : > { %v3003_v8 = vsel %vm7635_vm11, 0, %v3002_v48 }
 0x352   : > { %3004 = vst [vmem:[#allocation2 + $0xd8] sm:$0x1] %v3003_v8  ;;  %v2734_v20 = vshrl.u32 %v6067_v55, 16  ;;  %v2728_v43 = vrot.slane %v2726_v0, 7  ;;  %v2737_v4 = vshll.u32 %v6067_v55, 16 }
 0x354   : > { %v2736_v2 = vrot.slane %v2734_v20, 7  ;;  %v2731_v44 = vor.u32 %v2729_v53, %v2728_v43  ;;  %v2732_v18 = vrot.slane %v2728_v43, 4 }
 0x356   : > { %v2739_v34 = vor.u32 %v2737_v4, %v2736_v2  ;;  %v2741_v5 = vrot.slane %v2736_v2, 4  ;;  %v3062_v27 = vld [vmem:[#allocation2 + $0xe0] sm:$0xf]  ;;  %v2942_v1 = vsel %vm7617_vm8, %v2731_v44, %v2941_v39 }
 0x357   : > { %v3063_v13 = vsel %vm7617_vm8, 0, %v3062_v27  ;;  %2943 = vst [vmem:[#allocation2 + $0xe4] sm:$0xf] %v2942_v1 }
 0x358   : > { %v2740_v32 = vsel %vm7645_vm12, %v2732_v18, %v2739_v34  ;;  %v2946_v46 = vsel %vm7635_vm11, %v2741_v5, %v2945_v45  ;;  %3064 = vst [vmem:[#allocation2 + $0xe0] sm:$0xf] %v3063_v13 }
 0x359   : > { %2944 = vst.msk [vmem:[#allocation2 + $0xe8] sm:$0xf] %vm2802_vm4, %v2740_v32  ;;  %2947 = vst [vmem:[#allocation2 + $0xec] sm:$0x1] %v2946_v46 }
 0x35c   : > { %3071 = sbr.rel (%p5874_p10) target bundleno = 867 (0x363), region = 64 }
 0x35e   : > { %v3005_v31 = vld [vmem:[#allocation2 + $0xe4] sm:$0x1] }
 0x35f   : > { %v3006_v50 = vsel %vm7635_vm11, 0, %v3005_v31 }
 0x360   : > { %v3065_v37 = vld [vmem:[#allocation2 + $0xec] sm:$0xf]  ;;  %3007 = vst [vmem:[#allocation2 + $0xe4] sm:$0x1] %v3006_v50 }
 0x361   : > { %v3066_v36 = vsel %vm7617_vm8, 0, %v3065_v37 }
 0x362   : > { %3067 = vst [vmem:[#allocation2 + $0xec] sm:$0xf] %v3066_v36 }
 0x363 PF: > { %p5875_p12 = scmp.ne.s32.totalorder %s6600_s24, 1 }
 0x364   : > { %v6622_v29 = vmov (!%p5875_p12), 0  }
 0x365   : > { %3081 = sbr.rel (%p5875_p12) target bundleno = 876 (0x36c), region = 68  ;;  %3083 = vst.msk [vmem:[#allocation2 + $0x6c] sm:$0xf] (!%p5875_p12), %vm2802_vm4, %v6622_v29  ;;  %3084 = vst.msk [vmem:[#allocation2 + $0x70] sm:$0xf] (!%p5875_p12), %vm2802_vm4, %v6622_v29 }
 0x366   : > { %3085 = vst.msk [vmem:[#allocation2 + $0x74] sm:$0xf] (!%p5875_p12), %vm2802_vm4, %v6622_v29  ;;  %3086 = vst.msk [vmem:[#allocation2 + $0xe4] sm:$0xf] (!%p5875_p12), %vm2802_vm4, %v6622_v29 }
 0x367   : > { %3087 = vst.msk [vmem:[#allocation2 + $0xe8] sm:$0xf] (!%p5875_p12), %vm2802_vm4, %v6622_v29  ;;  %3088 = vst.msk [vmem:[#allocation2 + $0xec] sm:$0xf] (!%p5875_p12), %vm2802_vm4, %v6622_v29 }
 0x36c PF: > { %v6276_v3 = vld [vmem:[#allocation2 + $0xc] sm:$0xff]   ;;  %v6277_v16 = vld [vmem:[#allocation2 + $0x18] sm:$0xff]   ;;  %v6278_v47 = vld [vmem:[#allocation2 + $0x20] ss:$0 sps:$4 sm:$0xff]   ;;  %s9188_s30 = sld [smem:[#allocation18_spill]]  ;;  %s6068_s20 = sshll.u32 %s6600_s24, 10 }
 0x36d   : > { %3491 = vrot.lane.b32.xlu0 %v6276_v3, %s6620_s27  ;;  %3495 = vrot.lane.b32.xlu1 %v6277_v16, %s6620_s27  ;;  %v6279_v26 = vld [vmem:[#allocation2 + $0x14] ss:$0 sps:$4 sm:$0xff]   ;;  %v6280_v17 = vld [vmem:[#allocation2 + $0x24] sm:$0xff]   ;;  %v6281_v28 = vld [vmem:[#allocation2 + $0x2c] ss:$0 sps:$4 sm:$0xff]   ;;  %s5564_s16 = sshll.u32 %s8115_s21, 4  ;;  %s8969_s16 = int_to_ptr.vmem [resolvable:$true] %s5564_s16 }
 0x36e   : > { %v6282_v40 = vld [vmem:[#allocation2 + $0x38] ss:$0 sps:$4 sm:$0xff]   ;;  %v6283_v57 = vld [vmem:[#allocation2 + $0x30] sm:$0xff]   ;;  %v6291_v11 = vld [vmem:[#allocation9 + $0x14] ss:$8 sps:$4 sm:$0xff]   ;;  %s9189_s13 = sld [smem:[#allocation41_spill]] }
 0x36f   : > { %v6288_v52 = vld [vmem:[#allocation9 + $0x4] ss:$8 sps:$4 sm:$0xff]   ;;  %v6290_v35 = vld [vmem:[#allocation9] ss:$8 sps:$4 sm:$0xff]   ;;  %v6294_v7 = vld [vmem:[#allocation9 + $0x10] ss:$8 sps:$4 sm:$0xff]  }
 0x370   : > { %4115 = vmatprep.subr.bf16.mxu1 %v6288_v52  ;;  %v6284_v10 = vld [vmem:[#allocation2 + $0x3c] sm:$0xff]   ;;  %v6285_v22 = vld [vmem:[#allocation2 + $0x44] ss:$0 sps:$4 sm:$0xff]   ;;  %v6298_v23 = vld [vmem:[#allocation9 + $0x20] ss:$8 sps:$4 sm:$0xff]   ;;  %s8974_s24 = scalar_lea.sflag [#allocation5], %s303_s12 }
 0x371   : > { %3493 = vrot.lane.b32.xlu0 %v6279_v26, %s6620_s27  ;;  %3497 = vrot.lane.b32.xlu1 %v6278_v47, %s6620_s27  ;;  %v6296_v19 = vld [vmem:[#allocation9 + $0x24] ss:$8 sps:$4 sm:$0xff]   ;;  %v6287_v63 = vld [vmem:[#allocation2 + $0x48] sm:$0xff]   ;;  %v6286_v41 = vld [vmem:[#allocation2 + $0x50] ss:$0 sps:$4 sm:$0xff]   ;;  %s6625_s10 = smov [#allocation11]  }
 0x372   : > { %4116 = vmatpush1.bf16.msra.mxu1 %v6290_v35  ;;  %v6301_v56 = vld [vmem:[#allocation9 + $0x34] ss:$8 sps:$4 sm:$0xff]   ;;  %v6303_v38 = vld [vmem:[#allocation9 + $0x30] ss:$8 sps:$4 sm:$0xff]   ;;  %v6293_v6 = vld [vmem:[#allocation2 + $0x54] sm:$0xff]   ;;  %p9190_p7 = scmp.ne.s32.totalorder %s9188_s30, 0 }
 0x373   : > { %4117 = vmatprep.subr.bf16.mxu1 %v6291_v11  ;;  %v6304_v24 = vld [vmem:[#allocation9 + $0x44] ss:$8 sps:$4 sm:$0xff]   ;;  %v6306_v59 = vld [vmem:[#allocation9 + $0x40] ss:$8 sps:$4 sm:$0xff]   ;;  %v6300_v9 = vld [vmem:[#allocation2 + $0x60] sm:$0xff]   ;;  %s6518_s15 = sshll.u32 %s6625_s10, 4  ;;  %s6519_s15 = int_to_ptr.vmem [resolvable:$false] %s6518_s15 }
 0x374   : > { %v6295_v21 = vld [vmem:[#allocation2 + $0x5c] ss:$0 sps:$4 sm:$0xff]   ;;  %v6307_v30 = vld [vmem:[#allocation9 + $0x54] ss:$8 sps:$4 sm:$0xff]   ;;  %v6299_v58 = vld [vmem:[#allocation2 + $0x68] ss:$0 sps:$4 sm:$0xff]   ;;  %s8967_s14 = scalar_lea.hbm %s9189_s13, %s6068_s20  ;;  %p6521_p3 = scmp.lt.s32.totalorder %s8969_s16, %s6519_s15 }
 0x375   : > { %3499 = vrot.lane.b32.xlu0 %v6280_v17, %s6620_s27  ;;  %3501 = vrot.lane.b32.xlu1 %v6281_v28, %s6620_s27  ;;  %v6309_v33 = vld [vmem:[#allocation9 + $0x50] ss:$8 sps:$4 sm:$0xff]   ;;  %v6310_v60 = vld [vmem:[#allocation9 + $0x64] ss:$8 sps:$4 sm:$0xff]   ;;  %v6317_v54 = vld [vmem:[#allocation2 + $0x8c] ss:$0 sps:$4 sm:$0xff]  }
 0x376   : > { %4118 = vmatpush1.bf16.msra.mxu1 %v6294_v7  ;;  %v6315_v15 = vld [vmem:[#allocation2 + $0x84] sm:$0xff]   ;;  %v6312_v12 = vld [vmem:[#allocation9 + $0x60] ss:$8 sps:$4 sm:$0xff]   ;;  %v6318_v25 = vld [vmem:[#allocation9 + $0x84] ss:$8 sps:$4 sm:$0xff]   ;;  %s6520_s7 = scalar_lea.vmem %s6519_s15, 4096 }
 0x377   : > { %4119 = vmatprep.subr.bf16.mxu1 %v6296_v19  ;;  %v6313_v61 = vld [vmem:[#allocation9 + $0x74] ss:$8 sps:$4 sm:$0xff]   ;;  %v6322_v14 = vld [vmem:[#allocation2 + $0x90] sm:$0xff]   ;;  %v6333_v42 = vld [vmem:[#allocation2 + $0x18] sm:$0xff]  }
 0x378   : > { %v6321_v62 = vld [vmem:[#allocation2 + $0x98] ss:$0 sps:$4 sm:$0xff]   ;;  %5996 = vmatprep.mubr.msk.bf16.mxu1 %vm690_vm0, %v6333_v42  ;;  %v6316_v51 = vld [vmem:[#allocation9 + $0x70] ss:$8 sps:$4 sm:$0xff]   ;;  %v6338_v55 = vld [vmem:[#allocation2 + $0xa4] ss:$0 sps:$4 sm:$0xff]  }
 0x379   : > { %3503 = vrot.lane.b32.xlu0 %v6283_v57, %s6620_s27  ;;  %3505 = vrot.lane.b32.xlu1 %v6282_v40, %s6620_s27  ;;  %v6336_v48 = vld [vmem:[#allocation2 + $0x9c] sm:$0xff]   ;;  %v6320_v8 = vld [vmem:[#allocation9 + $0x80] ss:$8 sps:$4 sm:$0xff]   ;;  %v6323_v0 = vld [vmem:[#allocation9 + $0x94] ss:$8 sps:$4 sm:$0xff]  }
 0x37a   : > { %4120 = vmatpush1.bf16.msra.mxu1 %v6298_v23  ;;  %v6341_v20 = vld [vmem:[#allocation2 + $0xa8] sm:$0xff]   ;;  %v6340_v43 = vld [vmem:[#allocation2 + $0xb0] ss:$0 sps:$4 sm:$0xff]   ;;  %v6326_v39 = vld [vmem:[#allocation9 + $0xa4] ss:$8 sps:$4 sm:$0xff]  }
 0x37b   : > { %4121 = vmatprep.subr.bf16.mxu1 %v6301_v56  ;;  %v6325_v53 = vld [vmem:[#allocation9 + $0x90] ss:$8 sps:$4 sm:$0xff]   ;;  %v6347_v2 = vld [vmem:[#allocation2 + $0xb4] sm:$0xff]   ;;  %v6349_v4 = vld [vmem:[#allocation2 + $0xbc] ss:$0 sps:$4 sm:$0xff]  }
 0x37c   : > { %v6328_v44 = vld [vmem:[#allocation9 + $0xa0] ss:$8 sps:$4 sm:$0xff]   ;;  %v6329_v45 = vld [vmem:[#allocation9 + $0xb4] ss:$8 sps:$4 sm:$0xff]   ;;  %v6351_v34 = vld [vmem:[#allocation2 + $0xc8] ss:$0 sps:$4 sm:$0xff]  }
 0x37d   : > { %3507 = vrot.lane.b32.xlu0 %v6284_v10, %s6620_s27  ;;  %3509 = vrot.lane.b32.xlu1 %v6285_v22, %s6620_s27  ;;  %v6352_v18 = vld [vmem:[#allocation2 + $0xc0] sm:$0xff]   ;;  %v6358_v27 = vld [vmem:[#allocation2 + $0xcc] sm:$0xff]   ;;  %v6360_v1 = vld [vmem:[#allocation2 + $0xd4] ss:$0 sps:$4 sm:$0xff]  }
 0x37e   : > { %4122 = vmatpush1.bf16.msra.mxu1 %v6303_v38  ;;  %v6331_v5 = vld [vmem:[#allocation9 + $0xb0] ss:$8 sps:$4 sm:$0xff]   ;;  %v6363_v32 = vld [vmem:[#allocation2 + $0xd8] sm:$0xff]   ;;  %v6334_v31 = vld [vmem:[#allocation2 + $0xc] sm:$0xff]  }
 0x37f   : > { %4123 = vmatprep.subr.bf16.mxu1 %v6304_v24  ;;  %v6362_v13 = vld [vmem:[#allocation2 + $0xe0] ss:$0 sps:$4 sm:$0xff]   ;;  %v6337_v29 = vld [vmem:[#allocation2 + $0x8] ss:$0 sps:$4 sm:$0xff]   ;;  %v6335_v47 = vld [vmem:[#allocation2 + $0x14] ss:$0 sps:$4 sm:$0xff]  }
 0x380   : > { %v6332_v46 = vld [vmem:[#allocation2] sm:$0xff]   ;;  %v6342_v40 = vld [vmem:[#allocation2 + $0x28] sm:$0xff]   ;;  %v6344_v11 = vld [vmem:[#allocation2 + $0x30] sm:$0xff]  }
 0x381   : > { %3511 = vrot.lane.b32.xlu0 %v6287_v63, %s6620_s27  ;;  %3513 = vrot.lane.b32.xlu1 %v6286_v41, %s6620_s27  ;;  %v6339_v50 = vld [vmem:[#allocation2 + $0x20] sm:$0xff]   ;;  %v6343_v10 = vld [vmem:[#allocation2 + $0x18] sm:$0xff]  }
 0x382   : > { %4124 = vmatpush1.bf16.msra.mxu1 %v6306_v59  ;;  %v6345_v23 = vld [vmem:[#allocation2 + $0x20] ss:$0 sps:$4 sm:$0xff]   ;;  %v6348_v63 = vld [vmem:[#allocation2 + $0x24] sm:$0xff]   ;;  %v6350_v56 = vld [vmem:[#allocation2 + $0x38] sm:$0xff]  }
 0x383   : > { %4125 = vmatprep.subr.bf16.mxu1 %v6307_v30  ;;  %v6353_v30 = vld [vmem:[#allocation2 + $0x40] sm:$0xff]   ;;  %v6356_v42 = vld [vmem:[#allocation2 + $0x38] ss:$0 sps:$4 sm:$0xff]  }
 0x385   : > { %3515 = vrot.lane.b32.xlu0 %v6293_v6, %s6620_s27  ;;  %3517 = vrot.lane.b32.xlu1 %v6295_v21, %s6620_s27  ;;  %v6346_v21 = vld [vmem:[#allocation2 + $0x2c] ss:$0 sps:$4 sm:$0xff]  }
 0x386   : > { %4126 = vmatpush1.bf16.msra.mxu1 %v6309_v33 }
 0x387   : > { %4127 = vmatprep.subr.bf16.mxu1 %v6310_v60 }
 0x389   : > { %3519 = vrot.lane.b32.xlu0 %v6300_v9, %s6620_s27  ;;  %3521 = vrot.lane.b32.xlu1 %v6299_v58, %s6620_s27 }
 0x38a   : > { %4128 = vmatpush1.bf16.msra.mxu1 %v6312_v12  ;;  %v6354_v12 = vld [vmem:[#allocation2 + $0x30] sm:$0xff]  }
 0x38b   : > { %4129 = vmatprep.subr.bf16.mxu1 %v6313_v61 }
 0x38d   : > { %3523 = vrot.lane.b32.xlu0 %v6315_v15, %s6620_s27  ;;  %3525 = vrot.lane.b32.xlu1 %v6317_v54, %s6620_s27  ;;  %v6355_v15 = vld [vmem:[#allocation2 + $0x48] sm:$0xff]  }
 0x38e   : > { %4130 = vmatpush1.bf16.msra.mxu1 %v6316_v51  ;;  %v6361_v51 = vld [vmem:[#allocation2 + $0x50] sm:$0xff]  }
 0x38f   : > { %4131 = vmatprep.subr.bf16.mxu1 %v6318_v25 }
 0x391   : > { %3527 = vrot.lane.b32.xlu0 %v6322_v14, %s6620_s27  ;;  %3529 = vrot.lane.b32.xlu1 %v6321_v62, %s6620_s27  ;;  %v6359_v62 = vld [vmem:[#allocation2 + $0x3c] sm:$0xff]  }
 0x392   : > { %4132 = vmatpush1.bf16.msra.mxu1 %v6320_v8 }
 0x393   : > { %4133 = vmatprep.subr.bf16.mxu1 %v6323_v0  ;;  %v6357_v0 = vld [vmem:[#allocation2 + $0x44] ss:$0 sps:$4 sm:$0xff]  }
 0x395   : > { %3531 = vrot.lane.b32.xlu0 %v6336_v48, %s6620_s27  ;;  %3533 = vrot.lane.b32.xlu1 %v6338_v55, %s6620_s27 }
 0x396   : > { %4134 = vmatpush1.bf16.msra.mxu1 %v6325_v53  ;;  %v6364_v53 = vld [vmem:[#allocation2 + $0x58] sm:$0xff]  }
 0x397   : > { %4135 = vmatprep.subr.bf16.mxu1 %v6326_v39 }
 0x399   : > { %3535 = vrot.lane.b32.xlu0 %v6341_v20, %s6620_s27  ;;  %3537 = vrot.lane.b32.xlu1 %v6340_v43, %s6620_s27 }
 0x39a   : > { %4136 = vmatpush1.bf16.msra.mxu1 %v6328_v44  ;;  %v6366_v44 = vld [vmem:[#allocation2 + $0x60] sm:$0xff]  }
 0x39b   : > { %4137 = vmatprep.subr.bf16.mxu1 %v6329_v45 }
 0x39d   : > { %3539 = vrot.lane.b32.xlu0 %v6347_v2, %s6620_s27  ;;  %3541 = vrot.lane.b32.xlu1 %v6349_v4, %s6620_s27 }
 0x39e   : > { %4138 = vmatpush1.bf16.msra.mxu1 %v6331_v5 }
 0x3a1   : > { %3543 = vrot.lane.b32.xlu0 %v6352_v18, %s6620_s27  ;;  %3545 = vrot.lane.b32.xlu1 %v6351_v34, %s6620_s27  ;;  %v6365_v18 = vld [vmem:[#allocation2 + $0x48] sm:$0xff]  }
 0x3a5   : > { %3547 = vrot.lane.b32.xlu0 %v6358_v27, %s6620_s27  ;;  %3549 = vrot.lane.b32.xlu1 %v6360_v1, %s6620_s27  ;;  %v6367_v27 = vld [vmem:[#allocation2 + $0x50] ss:$0 sps:$4 sm:$0xff]   ;;  %v6369_v1 = vld [vmem:[#allocation2 + $0x54] sm:$0xff]  }
 0x3a9   : > { %3551 = vrot.lane.b32.xlu0 %v6363_v32, %s6620_s27  ;;  %3553 = vrot.lane.b32.xlu1 %v6362_v13, %s6620_s27  ;;  %v6370_v13 = vld [vmem:[#allocation2 + $0x68] sm:$0xff]  }
 0x3df   : > { %v3492_v37 = vpop.permute.xlu0 %3491  ;;  %v3496_v49 = vpop.permute.xlu1 %3495 }
 0x3e0   : > { %v3653_v36 = vsel %vm690_vm0, %v6332_v46, %v3492_v37  ;;  %v3659_v3 = vsel %vm690_vm0, %v6334_v31, %v3496_v49  ;;  %v6368_v37 = vld [vmem:[#allocation2 + $0x5c] ss:$0 sps:$4 sm:$0xff]  }
 0x3e1   : > { %4148 = vmatmul.mubr.bf16.vlgmr.msra.gmra.mrb[0].mxu1 %v3653_v36  ;;  %v3783_v52 = vunpack.c.h.b16 %v3659_v3 }
 0x3e2   : > { %5997 = vmatprep.mubr.msk.bf16.mxu1 %vm690_vm0, %v6339_v50 }
 0x3e3   : > { %v3494_v16 = vpop.permute.xlu0 %3493  ;;  %v3498_v17 = vpop.permute.xlu1 %3497 }
 0x3e4   : > { %v3656_v26 = vsel %vm690_vm0, %v6337_v29, %v3494_v16  ;;  %v3662_v57 = vsel %vm690_vm0, %v6335_v47, %v3498_v17  ;;  %v6371_v29 = vld [vmem:[#allocation2 + $0x70] sm:$0xff]  }
 0x3e5   : > { %v5941_v28 = vcombine.low %v3656_v26, %v3659_v3  ;;  %v3784_v35 = vunpack.c.l.b16 %v3662_v57  ;;  %v6373_v26 = vld [vmem:[#allocation2 + $0x90] sm:$0xff]  }
 0x3e7   : > { %v3855_v7 = vpack.c.b16 %v3784_v35, %v3783_v52  ;;  %v3500_v22 = vpop.permute.xlu0 %3499  ;;  %v3502_v41 = vpop.permute.xlu1 %3501  ;;  %v6374_v52 = vld [vmem:[#allocation2 + $0x80] ss:$0 sps:$4 sm:$0xff]   ;;  %v6376_v35 = vld [vmem:[#allocation2 + $0x84] sm:$0xff]  }
 0x3e8   : > { %v3665_v19 = vsel %vm690_vm0, %v6343_v10, %v3500_v22  ;;  %v3668_v6 = vsel %vm690_vm0, %v6345_v23, %v3502_v41  ;;  %v6375_v23 = vld [vmem:[#allocation2 + $0x8c] ss:$0 sps:$4 sm:$0xff]   ;;  %v6378_v41 = vld [vmem:[#allocation2 + $0xa0] sm:$0xff]  }
 0x3e9   : > { %4158 = vmatmul.mubr.bf16.gmra.mrb[4].mxu1 %v5941_v28  ;;  %v6372_v28 = vld [vmem:[#allocation2 + $0x78] sm:$0xff]  }
 0x3ea   : > { %5998 = vmatprep.mubr.msk.bf16.mxu1 %vm690_vm0, %v6342_v40 }
 0x3eb   : > { %v3504_v38 = vpop.permute.xlu0 %3503  ;;  %v3506_v59 = vpop.permute.xlu1 %3505 }
 0x3ec   : > { %v3671_v24 = vsel %vm690_vm0, %v6348_v63, %v3504_v38  ;;  %v3674_v58 = vsel %vm690_vm0, %v6346_v21, %v3506_v59  ;;  %v6380_v21 = vld [vmem:[#allocation2 + $0xa8] sm:$0xff]  }
 0x3ed   : > { %v5945_v9 = vcombine.low %v3668_v6, %v3671_v24  ;;  %v3790_v33 = vunpack.c.l.b16 %v3674_v58  ;;  %v3789_v60 = vunpack.c.h.b16 %v3671_v24 }
 0x3ef   : > { %v3861_v54 = vpack.c.b16 %v3790_v33, %v3789_v60  ;;  %v3508_v61 = vpop.permute.xlu0 %3507  ;;  %v3510_v25 = vpop.permute.xlu1 %3509  ;;  %v6381_v33 = vld [vmem:[#allocation2 + $0x98] ss:$0 sps:$4 sm:$0xff]   ;;  %v6383_v60 = vld [vmem:[#allocation2 + $0x9c] sm:$0xff]  }
 0x3f0   : > { %v3677_v14 = vsel %vm690_vm0, %v6354_v12, %v3508_v61  ;;  %v3680_v55 = vsel %vm690_vm0, %v6356_v42, %v3510_v25  ;;  %v6382_v42 = vld [vmem:[#allocation2 + $0xa4] ss:$0 sps:$4 sm:$0xff]   ;;  %v6385_v25 = vld [vmem:[#allocation2 + $0xb8] sm:$0xff]  }
 0x3f1   : > { %4168 = vmatmul.mubr.bf16.gmra.mrb[8].mxu1 %v3855_v7 }
 0x3f2   : > { %5999 = vmatprep.mubr.msk.bf16.mxu1 %vm690_vm0, %v6344_v11  ;;  %v6377_v11 = vld [vmem:[#allocation2 + $0x98] sm:$0xff]  }
 0x3f3   : > { %v3512_v48 = vpop.permute.xlu0 %3511  ;;  %v3514_v20 = vpop.permute.xlu1 %3513 }
 0x3f4   : > { %v3683_v8 = vsel %vm690_vm0, %v6359_v62, %v3512_v48  ;;  %v3686_v39 = vsel %vm690_vm0, %v6357_v0, %v3514_v20  ;;  %v6387_v0 = vld [vmem:[#allocation2 + $0xc0] sm:$0xff]  }
 0x3f5   : > { %v5949_v43 = vcombine.low %v3680_v55, %v3683_v8  ;;  %v3796_v2 = vunpack.c.l.b16 %v3686_v39  ;;  %v3795_v4 = vunpack.c.h.b16 %v3683_v8 }
 0x3f7   : > { %v3867_v45 = vpack.c.b16 %v3796_v2, %v3795_v4  ;;  %v3516_v34 = vpop.permute.xlu0 %3515  ;;  %v3518_v32 = vpop.permute.xlu1 %3517  ;;  %v6388_v2 = vld [vmem:[#allocation2 + $0xb0] ss:$0 sps:$4 sm:$0xff]   ;;  %v6390_v4 = vld [vmem:[#allocation2 + $0xb4] sm:$0xff]  }
 0x3f8   : > { %v3689_v5 = vsel %vm690_vm0, %v6365_v18, %v3516_v34  ;;  %v3692_v31 = vsel %vm690_vm0, %v6367_v27, %v3518_v32  ;;  %v6389_v27 = vld [vmem:[#allocation2 + $0xbc] ss:$0 sps:$4 sm:$0xff]   ;;  %v6392_v32 = vld [vmem:[#allocation2 + $0xd0] sm:$0xff]  }
 0x3f9   : > { %4178 = vmatmul.mubr.bf16.gmra.mrb[12].mxu1 %v3665_v19 }
 0x3fa   : > { %6000 = vmatprep.mubr.msk.bf16.mxu1 %vm690_vm0, %v6350_v56 }
 0x3fb   : > { %v3520_v46 = vpop.permute.xlu0 %3519  ;;  %v3522_v36 = vpop.permute.xlu1 %3521 }
 0x3fc   : > { %v3695_v50 = vsel %vm690_vm0, %v6369_v1, %v3520_v46  ;;  %v3698_v3 = vsel %vm690_vm0, %v6368_v37, %v3522_v36  ;;  %v6394_v37 = vld [vmem:[#allocation2 + $0xd8] sm:$0xff]  }
 0x3fd   : > { %v5953_v49 = vcombine.low %v3692_v31, %v3695_v50  ;;  %v3802_v16 = vunpack.c.l.b16 %v3698_v3  ;;  %v3801_v47 = vunpack.c.h.b16 %v3695_v50 }
 0x3ff   : > { %v3873_v17 = vpack.c.b16 %v3802_v16, %v3801_v47  ;;  %v3524_v40 = vpop.permute.xlu0 %3523  ;;  %v3526_v7 = vpop.permute.xlu1 %3525  ;;  %v6395_v16 = vld [vmem:[#allocation2 + $0xc8] ss:$0 sps:$4 sm:$0xff]   ;;  %v6397_v47 = vld [vmem:[#allocation2 + $0xcc] sm:$0xff]  }
 0x400   : > { %v3701_v57 = vsel %vm690_vm0, %v6372_v28, %v3524_v40  ;;  %v3704_v22 = vsel %vm690_vm0, %v6374_v52, %v3526_v7  ;;  %v6396_v52 = vld [vmem:[#allocation2 + $0xd4] ss:$0 sps:$4 sm:$0xff]   ;;  %v6399_v7 = vld [vmem:[#allocation2 + $0xe8] sm:$0xff]  }
 0x401   : > { %4188 = vmatmul.mubr.bf16.gmra.mrb[16].mxu1 %v5945_v9  ;;  %v6379_v9 = vld [vmem:[#allocation2 + $0x90] sm:$0xff]  }
 0x402   : > { %6001 = vmatprep.mubr.msk.bf16.mxu1 %vm690_vm0, %v6353_v30 }
 0x403   : > { %v3528_v10 = vpop.permute.xlu0 %3527  ;;  %v3530_v63 = vpop.permute.xlu1 %3529 }
 0x404   : > { %v3707_v19 = vsel %vm690_vm0, %v6376_v35, %v3528_v10  ;;  %v3710_v38 = vsel %vm690_vm0, %v6375_v23, %v3530_v63 }
 0x405   : > { %v5957_v56 = vcombine.low %v3704_v22, %v3707_v19  ;;  %v3808_v6 = vunpack.c.l.b16 %v3710_v38  ;;  %v3807_v24 = vunpack.c.h.b16 %v3707_v19 }
 0x407   : > { %v3879_v59 = vpack.c.b16 %v3808_v6, %v3807_v24  ;;  %v3532_v30 = vpop.permute.xlu0 %3531 }
 0x408   : > { %v3713_v58 = vsel %vm690_vm0, %v6379_v9, %v3532_v30 }
 0x409   : > { %4198 = vmatmul.mubr.bf16.gmra.mrb[20].mxu1 %v3861_v54  ;;  %v3534_v54 = vpop.permute.xlu1 %3533 }
 0x40a   : > { %6002 = vmatprep.mubr.msk.bf16.mxu1 %vm690_vm0, %v6355_v15  ;;  %v6384_v15 = vld [vmem:[#allocation2 + $0xb0] sm:$0xff]   ;;  %v3716_v61 = vsel %vm690_vm0, %v6381_v33, %v3534_v54 }
 0x40b   : > { %v3536_v12 = vpop.permute.xlu0 %3535 }
 0x40d   : > { %v3538_v62 = vpop.permute.xlu1 %3537 }
 0x40e   : > { %v3722_v48 = vsel %vm690_vm0, %v6382_v42, %v3538_v62 }
 0x40f   : > { %v3814_v55 = vunpack.c.l.b16 %v3722_v48 }
 0x411   : > { %4208 = vmatmul.mubr.bf16.gmra.mrb[24].mxu1 %v3677_v14  ;;  %v3719_v14 = vsel %vm690_vm0, %v6383_v60, %v3536_v12 }
 0x412   : > { %6003 = vmatprep.mubr.msk.bf16.mxu1 %vm690_vm0, %v6361_v51  ;;  %v5961_v51 = vcombine.low %v3716_v61, %v3719_v14  ;;  %v3813_v8 = vunpack.c.h.b16 %v3719_v14 }
 0x414   : > { %v3885_v20 = vpack.c.b16 %v3814_v55, %v3813_v8 }
 0x419   : > { %4218 = vmatmul.mubr.bf16.gmra.mrb[28].mxu1 %v5949_v43  ;;  %v6386_v43 = vld [vmem:[#allocation2 + $0xa8] sm:$0xff]  }
 0x41a   : > { %6004 = vmatprep.mubr.msk.bf16.mxu1 %vm690_vm0, %v6364_v53  ;;  %v3540_v53 = vpop.permute.xlu0 %3539 }
 0x41b   : > { %v3725_v39 = vsel %vm690_vm0, %v6386_v43, %v3540_v53 }
 0x41e   : > { %v3544_v18 = vpop.permute.xlu0 %3543 }
 0x421   : > { %4228 = vmatmul.mubr.bf16.gmra.mrb[32].mxu1 %v3867_v45  ;;  %v3542_v45 = vpop.permute.xlu1 %3541 }
 0x422   : > { %6005 = vmatprep.mubr.msk.bf16.mxu1 %vm690_vm0, %v6366_v44  ;;  %v6391_v44 = vld [vmem:[#allocation2 + $0xc8] sm:$0xff]   ;;  %v3728_v34 = vsel %vm690_vm0, %v6388_v2, %v3542_v45 }
 0x425   : > { %v3546_v1 = vpop.permute.xlu1 %3545 }
 0x426   : > { %v3734_v46 = vsel %vm690_vm0, %v6389_v27, %v3546_v1 }
 0x427   : > { %v3820_v31 = vunpack.c.l.b16 %v3734_v46 }
 0x429   : > { %4238 = vmatmul.mubr.bf16.gmra.mrb[36].mxu1 %v3689_v5  ;;  %v3731_v5 = vsel %vm690_vm0, %v6390_v4, %v3544_v18 }
 0x42a   : > { %6006 = vmatprep.mubr.msk.bf16.mxu1 %vm690_vm0, %v6370_v13  ;;  %v5965_v13 = vcombine.low %v3728_v34, %v3731_v5  ;;  %v3819_v50 = vunpack.c.h.b16 %v3731_v5 }
 0x42c   : > { %v3891_v36 = vpack.c.b16 %v3820_v31, %v3819_v50 }
 0x431   : > { %4248 = vmatmul.mubr.bf16.gmra.mrb[40].mxu1 %v5953_v49  ;;  %v6393_v49 = vld [vmem:[#allocation2 + $0xc0] sm:$0xff]  }
 0x432   : > { %6007 = vmatprep.mubr.msk.bf16.mxu1 %vm690_vm0, %v6371_v29  ;;  %v3548_v29 = vpop.permute.xlu0 %3547 }
 0x433   : > { %v3737_v3 = vsel %vm690_vm0, %v6393_v49, %v3548_v29 }
 0x436   : > { %v3552_v28 = vpop.permute.xlu0 %3551 }
 0x439   : > { %4258 = vmatmul.mubr.bf16.gmra.mrb[44].mxu1 %v3873_v17  ;;  %v3550_v17 = vpop.permute.xlu1 %3549 }
 0x43a   : > { %6008 = vmatprep.mubr.msk.bf16.mxu1 %vm690_vm0, %v6373_v26  ;;  %v6398_v26 = vld [vmem:[#allocation2 + $0xe0] sm:$0xff]   ;;  %v3740_v40 = vsel %vm690_vm0, %v6395_v16, %v3550_v17 }
 0x43d   : > { %v3554_v35 = vpop.permute.xlu1 %3553 }
 0x43e   : > { %v3746_v10 = vsel %vm690_vm0, %v6396_v52, %v3554_v35 }
 0x43f   : > { %v3826_v22 = vunpack.c.l.b16 %v3746_v10 }
 0x441   : > { %4268 = vmatmul.mubr.bf16.gmra.mrb[48].mxu1 %v3701_v57  ;;  %v3743_v57 = vsel %vm690_vm0, %v6397_v47, %v3552_v28 }
 0x442   : > { %6009 = vmatprep.mubr.msk.bf16.mxu1 %vm690_vm0, %v6377_v11  ;;  %v5969_v11 = vcombine.low %v3740_v40, %v3743_v57  ;;  %v3825_v19 = vunpack.c.h.b16 %v3743_v57 }
 0x444   : > { %v3897_v23 = vpack.c.b16 %v3826_v22, %v3825_v19 }
 0x449   : > { %4278 = vmatmul.mubr.bf16.gmra.mrb[52].mxu1 %v5957_v56 }
 0x44a   : > { %6010 = vmatprep.mubr.msk.bf16.mxu1 %vm690_vm0, %v6378_v41 }
 0x451   : > { %4288 = vmatmul.mubr.bf16.gmra.mrb[56].mxu1 %v3879_v59 }
 0x452   : > { %6011 = vmatprep.mubr.msk.bf16.mxu1 %vm690_vm0, %v6380_v21 }
 0x459   : > { %4298 = vmatmul.mubr.bf16.gmra.mrb[60].mxu1 %v3713_v58 }
 0x45a   : > { %6012 = vmatprep.mubr.msk.bf16.mxu1 %vm690_vm0, %v6384_v15 }
 0x461   : > { %4308 = vmatmul.mubr.bf16.gmra.mrb[64].mxu1 %v5961_v51 }
 0x462   : > { %6013 = vmatprep.mubr.msk.bf16.mxu1 %vm690_vm0, %v6385_v25 }
 0x469   : > { %4318 = vmatmul.mubr.bf16.gmra.mrb[68].mxu1 %v3885_v20 }
 0x46a   : > { %6014 = vmatprep.mubr.msk.bf16.mxu1 %vm690_vm0, %v6387_v0 }
 0x471   : > { %4328 = vmatmul.mubr.bf16.gmra.mrb[72].mxu1 %v3725_v39 }
 0x472   : > { %6015 = vmatprep.mubr.msk.bf16.mxu1 %vm690_vm0, %v6391_v44 }
 0x479   : > { %4338 = vmatmul.mubr.bf16.gmra.mrb[76].mxu1 %v5965_v13 }
 0x47a   : > { %6016 = vmatprep.mubr.msk.bf16.mxu1 %vm690_vm0, %v6392_v32 }
 0x481   : > { %4348 = vmatmul.mubr.bf16.gmra.mrb[80].mxu1 %v3891_v36 }
 0x482   : > { %6017 = vmatprep.mubr.msk.bf16.mxu1 %vm690_vm0, %v6394_v37 }
 0x489   : > { %4358 = vmatmul.mubr.bf16.gmra.mrb[84].mxu1 %v3737_v3 }
 0x48a   : > { %6018 = vmatprep.mubr.msk.bf16.mxu1 %vm690_vm0, %v6398_v26 }
 0x491   : > { %4368 = vmatmul.mubr.bf16.gmra.mrb[88].mxu1 %v5969_v11 }
 0x492   : > { %6019 = vmatprep.mubr.msk.bf16.mxu1 %vm690_vm0, %v6399_v7 }
 0x499   : > { %4378 = vmatmul.mubr.bf16.gmra.mrb[92].mxu1 %v3897_v23 }
 0x4b4   : > { %v8219_v63 = vpop.f32.mrb[0].mxu1 }
 0x4b5   : > { %v4151_v56 = vpop.f32.mrb[1].mxu1  ;;  %v4436_v38 = vrot.slane %v8219_v63, 1 }
 0x4b6   : > { %v8221_v41 = vpop.f32.mrb[2].mxu1  ;;  %v4692_v21 = vrot.slane %v4151_v56, 2 }
 0x4b7   : > { %v4437_v6 = vrot.slane %v8221_v41, 1  ;;  %v4155_v24 = vpop.f32.mrb[3].mxu1 }
 0x4b8   : > { %v4693_v59 = vrot.slane %v4155_v24, 2 }
 0x4b9   : > { %v4438_v9 = vsel %vm1610_vm1, %v4436_v38, %v4437_v6 }
 0x4ba   : > { %v8227_v30 = vsel %vm1931_vm2, %v4692_v21, %v4693_v59  ;;  %4516 = vrot.lane.b32.xlu0 %v4438_v9, %s6620_s27 }
 0x4bc   : > { %v4159_v58 = vpop.f32.mrb[4].mxu1 }
 0x4bd   : > { %v4439_v33 = vrot.slane %v4159_v58, 1  ;;  %v4161_v60 = vpop.f32.mrb[5].mxu1 }
 0x4be   : > { %v4695_v15 = vrot.slane %v4161_v60, 2  ;;  %v8230_v54 = vpop.f32.mrb[6].mxu1 }
 0x4bf   : > { %v4165_v12 = vpop.f32.mrb[7].mxu1  ;;  %v4440_v61 = vsel %vm1610_vm1, %v4437_v6, %v4439_v33  ;;  %v4441_v62 = vrot.slane %v8230_v54, 1 }
 0x4c0   : > { %v8234_v14 = vsel %vm1931_vm2, %v4693_v59, %v4695_v15  ;;  %4518 = vrot.lane.b32.xlu1 %v4440_v61, %s6620_s27  ;;  %v4697_v48 = vrot.slane %v4165_v12, 2 }
 0x4c4   : > { %v8237_v42 = vpop.f32.mrb[8].mxu1 }
 0x4c5   : > { %v4442_v51 = vrot.slane %v8237_v42, 1  ;;  %v4171_v25 = vpop.f32.mrb[9].mxu1 }
 0x4c6   : > { %v4698_v55 = vrot.slane %v4171_v25, 2  ;;  %v4173_v8 = vpop.f32.mrb[10].mxu1 }
 0x4c7   : > { %v4444_v0 = vrot.slane %v4173_v8, 1  ;;  %v4175_v20 = vpop.f32.mrb[11].mxu1  ;;  %v4443_v43 = vsel %vm1610_vm1, %v4441_v62, %v4442_v51 }
 0x4c8   : > { %v8243_v53 = vsel %vm1931_vm2, %v4697_v48, %v4698_v55  ;;  %v4700_v39 = vrot.slane %v4175_v20, 2  ;;  %4520 = vrot.lane.b32.xlu0 %v4443_v43, %s6620_s27 }
 0x4c9   : > { %v4445_v2 = vsel %vm1610_vm1, %v4442_v51, %v4444_v0 }
 0x4ca   : > { %v8248_v4 = vsel %vm1931_vm2, %v4698_v55, %v4700_v39  ;;  %4522 = vrot.lane.b32.xlu1 %v4445_v2, %s6620_s27 }
 0x4cc   : > { %v8251_v44 = vpop.f32.mrb[12].mxu1 }
 0x4cd   : > { %v4181_v45 = vpop.f32.mrb[13].mxu1  ;;  %v4446_v34 = vrot.slane %v8251_v44, 1 }
 0x4ce   : > { %v8253_v18 = vpop.f32.mrb[14].mxu1  ;;  %v4702_v1 = vrot.slane %v4181_v45, 2 }
 0x4cf   : > { %v4447_v5 = vrot.slane %v8253_v18, 1  ;;  %v4185_v27 = vpop.f32.mrb[15].mxu1 }
 0x4d0   : > { %v4703_v13 = vrot.slane %v4185_v27, 2 }
 0x4d1   : > { %v4448_v32 = vsel %vm1610_vm1, %v4446_v34, %v4447_v5 }
 0x4d2   : > { %v8259_v46 = vsel %vm1931_vm2, %v4702_v1, %v4703_v13  ;;  %4524 = vrot.lane.b32.xlu0 %v4448_v32, %s6620_s27 }
 0x4d4   : > { %v4189_v31 = vpop.f32.mrb[16].mxu1 }
 0x4d5   : > { %v4449_v50 = vrot.slane %v4189_v31, 1  ;;  %v4191_v37 = vpop.f32.mrb[17].mxu1 }
 0x4d6   : > { %v4705_v36 = vrot.slane %v4191_v37, 2  ;;  %v8262_v49 = vpop.f32.mrb[18].mxu1 }
 0x4d7   : > { %v4195_v29 = vpop.f32.mrb[19].mxu1  ;;  %v4450_v3 = vsel %vm1610_vm1, %v4447_v5, %v4449_v50  ;;  %v4451_v26 = vrot.slane %v8262_v49, 1 }
 0x4d8   : > { %v8266_v16 = vsel %vm1931_vm2, %v4703_v13, %v4705_v36  ;;  %4526 = vrot.lane.b32.xlu1 %v4450_v3, %s6620_s27  ;;  %v4707_v40 = vrot.slane %v4195_v29, 2 }
 0x4dc   : > { %v8269_v47 = vpop.f32.mrb[20].mxu1 }
 0x4dd   : > { %v4452_v17 = vrot.slane %v8269_v47, 1  ;;  %v4201_v28 = vpop.f32.mrb[21].mxu1 }
 0x4de   : > { %v4708_v57 = vrot.slane %v4201_v28, 2  ;;  %v4203_v52 = vpop.f32.mrb[22].mxu1 }
 0x4df   : > { %v4454_v35 = vrot.slane %v4203_v52, 1  ;;  %v4205_v11 = vpop.f32.mrb[23].mxu1  ;;  %v4453_v7 = vsel %vm1610_vm1, %v4451_v26, %v4452_v17 }
 0x4e0   : > { %v8275_v10 = vsel %vm1931_vm2, %v4707_v40, %v4708_v57  ;;  %v4710_v22 = vrot.slane %v4205_v11, 2  ;;  %4528 = vrot.lane.b32.xlu0 %v4453_v7, %s6620_s27 }
 0x4e1   : > { %v4455_v19 = vsel %vm1610_vm1, %v4452_v17, %v4454_v35 }
 0x4e2   : > { %v8280_v23 = vsel %vm1931_vm2, %v4708_v57, %v4710_v22  ;;  %4530 = vrot.lane.b32.xlu1 %v4455_v19, %s6620_s27 }
 0x4e4   : > { %v8283_v56 = vpop.f32.mrb[24].mxu1 }
 0x4e5   : > { %v4211_v38 = vpop.f32.mrb[25].mxu1  ;;  %v4456_v24 = vrot.slane %v8283_v56, 1 }
 0x4e6   : > { %v8285_v6 = vpop.f32.mrb[26].mxu1  ;;  %v4712_v9 = vrot.slane %v4211_v38, 2 }
 0x4e7   : > { %v4457_v21 = vrot.slane %v8285_v6, 1  ;;  %v4215_v59 = vpop.f32.mrb[27].mxu1 }
 0x4e8   : > { %v4713_v58 = vrot.slane %v4215_v59, 2 }
 0x4e9   : > { %v4458_v33 = vsel %vm1610_vm1, %v4456_v24, %v4457_v21 }
 0x4ea   : > { %v8291_v60 = vsel %vm1931_vm2, %v4712_v9, %v4713_v58  ;;  %4532 = vrot.lane.b32.xlu0 %v4458_v33, %s6620_s27 }
 0x4ec   : > { %v4219_v15 = vpop.f32.mrb[28].mxu1 }
 0x4ed   : > { %v4459_v12 = vrot.slane %v4219_v15, 1  ;;  %v4221_v61 = vpop.f32.mrb[29].mxu1 }
 0x4ee   : > { %v4715_v62 = vrot.slane %v4221_v61, 2  ;;  %v8294_v51 = vpop.f32.mrb[30].mxu1 }
 0x4ef   : > { %v4225_v25 = vpop.f32.mrb[31].mxu1  ;;  %v4460_v48 = vsel %vm1610_vm1, %v4457_v21, %v4459_v12  ;;  %v4461_v0 = vrot.slane %v8294_v51, 1 }
 0x4f0   : > { %v8298_v55 = vsel %vm1931_vm2, %v4713_v58, %v4715_v62  ;;  %4534 = vrot.lane.b32.xlu1 %v4460_v48, %s6620_s27  ;;  %v4717_v39 = vrot.slane %v4225_v25, 2 }
 0x4f4   : > { %v8301_v8 = vpop.f32.mrb[32].mxu1 }
 0x4f5   : > { %v4462_v20 = vrot.slane %v8301_v8, 1  ;;  %v4231_v43 = vpop.f32.mrb[33].mxu1 }
 0x4f6   : > { %v4718_v2 = vrot.slane %v4231_v43, 2  ;;  %v4233_v45 = vpop.f32.mrb[34].mxu1 }
 0x4f7   : > { %v4464_v34 = vrot.slane %v4233_v45, 1  ;;  %v4235_v5 = vpop.f32.mrb[35].mxu1  ;;  %v4463_v27 = vsel %vm1610_vm1, %v4461_v0, %v4462_v20 }
 0x4f8   : > { %v8307_v1 = vsel %vm1931_vm2, %v4717_v39, %v4718_v2  ;;  %v4720_v13 = vrot.slane %v4235_v5, 2  ;;  %4536 = vrot.lane.b32.xlu0 %v4463_v27, %s6620_s27 }
 0x4f9   : > { %v4465_v32 = vsel %vm1610_vm1, %v4462_v20, %v4464_v34 }
 0x4fa   : > { %v8312_v31 = vsel %vm1931_vm2, %v4718_v2, %v4720_v13  ;;  %4538 = vrot.lane.b32.xlu1 %v4465_v32, %s6620_s27 }
 0x4fc   : > { %v8315_v50 = vpop.f32.mrb[36].mxu1 }
 0x4fd   : > { %v4241_v37 = vpop.f32.mrb[37].mxu1  ;;  %v4466_v29 = vrot.slane %v8315_v50, 1 }
 0x4fe   : > { %v8317_v36 = vpop.f32.mrb[38].mxu1  ;;  %v4722_v17 = vrot.slane %v4241_v37, 2 }
 0x4ff   : > { %v4467_v3 = vrot.slane %v8317_v36, 1  ;;  %v4245_v26 = vpop.f32.mrb[39].mxu1 }
 0x500   : > { %v4723_v28 = vrot.slane %v4245_v26, 2 }
 0x501   : > { %v4468_v40 = vsel %vm1610_vm1, %v4466_v29, %v4467_v3 }
 0x502   : > { %v8323_v57 = vsel %vm1931_vm2, %v4722_v17, %v4723_v28  ;;  %4540 = vrot.lane.b32.xlu0 %v4468_v40, %s6620_s27 }
 0x504   : > { %v4249_v52 = vpop.f32.mrb[40].mxu1 }
 0x505   : > { %v4469_v35 = vrot.slane %v4249_v52, 1  ;;  %v4251_v11 = vpop.f32.mrb[41].mxu1 }
 0x506   : > { %v4725_v7 = vrot.slane %v4251_v11, 2  ;;  %v8326_v22 = vpop.f32.mrb[42].mxu1 }
 0x507   : > { %v4255_v19 = vpop.f32.mrb[43].mxu1  ;;  %v4470_v38 = vsel %vm1610_vm1, %v4467_v3, %v4469_v35  ;;  %v4471_v59 = vrot.slane %v8326_v22, 1 }
 0x508   : > { %v8330_v24 = vsel %vm1931_vm2, %v4723_v28, %v4725_v7  ;;  %4542 = vrot.lane.b32.xlu1 %v4470_v38, %s6620_s27  ;;  %v4727_v33 = vrot.slane %v4255_v19, 2 }
 0x50c   : > { %v8333_v21 = vpop.f32.mrb[44].mxu1 }
 0x50d   : > { %v4472_v9 = vrot.slane %v8333_v21, 1  ;;  %v4261_v58 = vpop.f32.mrb[45].mxu1 }
 0x50e   : > { %v4728_v15 = vrot.slane %v4261_v58, 2  ;;  %v4263_v12 = vpop.f32.mrb[46].mxu1 }
 0x50f   : > { %v4474_v61 = vrot.slane %v4263_v12, 1  ;;  %v4265_v62 = vpop.f32.mrb[47].mxu1  ;;  %v4473_v25 = vsel %vm1610_vm1, %v4471_v59, %v4472_v9 }
 0x510   : > { %v8339_v48 = vsel %vm1931_vm2, %v4727_v33, %v4728_v15  ;;  %v4730_v0 = vrot.slane %v4265_v62, 2  ;;  %4544 = vrot.lane.b32.xlu0 %v4473_v25, %s6620_s27 }
 0x511   : > { %v4475_v20 = vsel %vm1610_vm1, %v4472_v9, %v4474_v61 }
 0x512   : > { %v8344_v43 = vsel %vm1931_vm2, %v4728_v15, %v4730_v0  ;;  %4546 = vrot.lane.b32.xlu1 %v4475_v20, %s6620_s27 }
 0x514   : > { %v8347_v39 = vpop.f32.mrb[48].mxu1 }
 0x515   : > { %v4271_v2 = vpop.f32.mrb[49].mxu1  ;;  %v4476_v34 = vrot.slane %v8347_v39, 1 }
 0x516   : > { %v8349_v45 = vpop.f32.mrb[50].mxu1  ;;  %v4732_v13 = vrot.slane %v4271_v2, 2 }
 0x517   : > { %v4477_v5 = vrot.slane %v8349_v45, 1  ;;  %v4275_v27 = vpop.f32.mrb[51].mxu1 }
 0x518   : > { %v4733_v32 = vrot.slane %v4275_v27, 2 }
 0x519   : > { %v4478_v37 = vsel %vm1610_vm1, %v4476_v34, %v4477_v5 }
 0x51a   : > { %v8355_v29 = vsel %vm1931_vm2, %v4732_v13, %v4733_v32  ;;  %4548 = vrot.lane.b32.xlu0 %v4478_v37, %s6620_s27 }
 0x51c   : > { %v4279_v3 = vpop.f32.mrb[52].mxu1 }
 0x51d   : > { %v4479_v26 = vrot.slane %v4279_v3, 1  ;;  %v4281_v17 = vpop.f32.mrb[53].mxu1 }
 0x51e   : > { %v4735_v28 = vrot.slane %v4281_v17, 2  ;;  %v8358_v40 = vpop.f32.mrb[54].mxu1 }
 0x51f   : > { %v4285_v52 = vpop.f32.mrb[55].mxu1  ;;  %v4480_v35 = vsel %vm1610_vm1, %v4477_v5, %v4479_v26  ;;  %v4481_v19 = vrot.slane %v8358_v40, 1 }
 0x520   : > { %v8362_v11 = vsel %vm1931_vm2, %v4733_v32, %v4735_v28  ;;  %4550 = vrot.lane.b32.xlu1 %v4480_v35, %s6620_s27  ;;  %v4737_v9 = vrot.slane %v4285_v52, 2 }
 0x524   : > { %v8365_v7 = vpop.f32.mrb[56].mxu1 }
 0x525   : > { %v4482_v38 = vrot.slane %v8365_v7, 1  ;;  %v4291_v59 = vpop.f32.mrb[57].mxu1 }
 0x526   : > { %v4738_v58 = vrot.slane %v4291_v59, 2  ;;  %v4293_v33 = vpop.f32.mrb[58].mxu1 }
 0x527   : > { %v4484_v15 = vrot.slane %v4293_v33, 1  ;;  %v4295_v12 = vpop.f32.mrb[59].mxu1  ;;  %v4483_v61 = vsel %vm1610_vm1, %v4481_v19, %v4482_v38 }
 0x528   : > { %v8371_v62 = vsel %vm1931_vm2, %v4737_v9, %v4738_v58  ;;  %v4740_v25 = vrot.slane %v4295_v12, 2  ;;  %4552 = vrot.lane.b32.xlu0 %v4483_v61, %s6620_s27 }
 0x529   : > { %v4485_v0 = vsel %vm1610_vm1, %v4482_v38, %v4484_v15 }
 0x52a   : > { %v8376_v20 = vsel %vm1931_vm2, %v4738_v58, %v4740_v25  ;;  %4554 = vrot.lane.b32.xlu1 %v4485_v0, %s6620_s27 }
 0x52c   : > { %v4517_v2 = vpop.permute.xlu0 %4516  ;;  %v8379_v34 = vpop.f32.mrb[60].mxu1 }
 0x52d   : > { %v4612_v5 = vadd.f32 %v4517_v2, %v8219_v63  ;;  %v4301_v27 = vpop.f32.mrb[61].mxu1  ;;  %v4486_v37 = vrot.slane %v8379_v34, 1 }
 0x52e   : > { %v8382_v13 = vpop.f32.mrb[62].mxu1  ;;  %v4742_v17 = vrot.slane %v4301_v27, 2 }
 0x52f   : > { %v4804_v32 = vadd.f32 %v8227_v30, %v4612_v5  ;;  %v4487_v3 = vrot.slane %v8382_v13, 1  ;;  %v4305_v26 = vpop.f32.mrb[63].mxu1 }
 0x530   : > { %v4743_v28 = vrot.slane %v4305_v26, 2 }
 0x531   : > { %v4488_v52 = vsel %vm1610_vm1, %v4486_v37, %v4487_v3 }
 0x532   : > { %v8389_v35 = vsel %vm1931_vm2, %v4742_v17, %v4743_v28  ;;  %v4519_v19 = vpop.permute.xlu1 %4518  ;;  %4556 = vrot.lane.b32.xlu0 %v4488_v52, %s6620_s27 }
 0x533   : > { %v4613_v63 = vadd.f32 %v4519_v19, %v8221_v41 }
 0x534   : > { %v4309_v38 = vpop.f32.mrb[64].mxu1 }
 0x535   : > { %v4805_v30 = vadd.f32 %v8234_v14, %v4613_v63  ;;  %v4489_v59 = vrot.slane %v4309_v38, 1  ;;  %v4311_v9 = vpop.f32.mrb[65].mxu1 }
 0x536   : > { %v4745_v58 = vrot.slane %v4311_v9, 2  ;;  %v8394_v33 = vpop.f32.mrb[66].mxu1 }
 0x537   : > { %v4315_v15 = vpop.f32.mrb[67].mxu1  ;;  %v4490_v12 = vsel %vm1610_vm1, %v4487_v3, %v4489_v59  ;;  %v4491_v14 = vrot.slane %v8394_v33, 1 }
 0x538   : > { %v8398_v61 = vsel %vm1931_vm2, %v4743_v28, %v4745_v58  ;;  %4558 = vrot.lane.b32.xlu1 %v4490_v12, %s6620_s27  ;;  %v4747_v26 = vrot.slane %v4315_v15, 2  ;;  %v8429_v12 = vld [vmem:[%s9027_s5] ss:$0 sm:$0xff] }
 0x53a   : > { %v4521_v25 = vpop.permute.xlu0 %4520 }
 0x53b   : > { %v4614_v0 = vadd.f32 %v4521_v25, %v8230_v54 }
 0x53c   : > { %v4523_v41 = vpop.permute.xlu1 %4522  ;;  %v8402_v2 = vpop.f32.mrb[68].mxu1 }
 0x53d   : > { %v8406_v5 = vadd.f32 %v8243_v53, %v4614_v0  ;;  %v4615_v27 = vadd.f32 %v4523_v41, %v8237_v42  ;;  %v4492_v37 = vrot.slane %v8402_v2, 1  ;;  %v4321_v3 = vpop.f32.mrb[69].mxu1 }
 0x53e   : > { %v4748_v17 = vrot.slane %v4321_v3, 2  ;;  %v4323_v28 = vpop.f32.mrb[70].mxu1 }
 0x53f   : > { %v8411_v52 = vadd.f32 %v8248_v4, %v4615_v27  ;;  %v4494_v54 = vrot.slane %v4323_v28, 1  ;;  %v4325_v19 = vpop.f32.mrb[71].mxu1  ;;  %v4493_v63 = vsel %vm1610_vm1, %v4491_v14, %v4492_v37 }
 0x540   : > { %v8415_v38 = vsel %vm1931_vm2, %v4747_v26, %v4748_v17  ;;  %v4750_v53 = vrot.slane %v4325_v19, 2  ;;  %4560 = vrot.lane.b32.xlu0 %v4493_v63, %s6620_s27  ;;  %v8437_v26 = vadd.f32 %v8429_v12, %v4804_v32 }
 0x541   : > { %v4495_v42 = vsel %vm1610_vm1, %v4492_v37, %v4494_v54 }
 0x542   : > { %v8420_v59 = vsel %vm1931_vm2, %v4748_v17, %v4750_v53  ;;  %4562 = vrot.lane.b32.xlu1 %v4495_v42, %s6620_s27 }
 0x544   : > { %v4525_v9 = vpop.permute.xlu0 %4524  ;;  %v8423_v4 = vpop.f32.mrb[72].mxu1 }
 0x545   : > { %v4616_v58 = vadd.f32 %v4525_v9, %v8251_v44  ;;  %v4331_v15 = vpop.f32.mrb[73].mxu1  ;;  %v4496_v41 = vrot.slane %v8423_v4, 1 }
 0x546   : > { %v8431_v25 = vpop.f32.mrb[74].mxu1  ;;  %v4752_v37 = vrot.slane %v4331_v15, 2 }
 0x547   : > { %v4808_v0 = vadd.f32 %v8259_v46, %v4616_v58  ;;  %v4497_v14 = vrot.slane %v8431_v25, 1  ;;  %v4335_v27 = vpop.f32.mrb[75].mxu1 }
 0x548   : > { %v4753_v3 = vrot.slane %v4335_v27, 2  ;;  %v4896_v27 = vlaneseq }
 0x549   : > { %v8440_v44 = vadd.f32 %v8429_v12, %v4808_v0  ;;  %v4498_v17 = vsel %vm1610_vm1, %v4496_v41, %v4497_v14  ;;  %v6623_v0 = vmov 1983009808  }
 0x54a   : > { %v8444_v28 = vsel %vm1931_vm2, %v4752_v37, %v4753_v3  ;;  %v4527_v54 = vpop.permute.xlu1 %4526  ;;  %4564 = vrot.lane.b32.xlu0 %v4498_v17, %s6620_s27  ;;  %v4894_v41 = vunpack.c.l.s4 %v6623_v0  ;;  %v8456_v37 = vadd.f32 %v8429_v12, %v4805_v30 }
 0x54b   : > { %v4891_v46 = vcombine.low %v8437_v26, %v8440_v44  ;;  %v4892_v19 = vcombine.high %v8437_v26, %v8440_v44  ;;  %v4617_v32 = vadd.f32 %v4527_v54, %v8253_v18 }
 0x54c   : > { %v4339_v63 = vpop.f32.mrb[76].mxu1  ;;  %v4895_v30 = vunpack.c.0.s8 %v4894_v41 }
 0x54d   : > { %v4809_v53 = vadd.f32 %v8266_v16, %v4617_v32  ;;  %v4499_v42 = vrot.slane %v4339_v63, 1  ;;  %v4341_v9 = vpop.f32.mrb[77].mxu1  ;;  %v8470_v63 = vshrl.u32 %v4896_v27, 7 }
 0x54e   : > { %v4755_v58 = vrot.slane %v4341_v9, 2  ;;  %v8453_v15 = vpop.f32.mrb[78].mxu1 }
 0x54f   : > { %9165 = vst [vmem:[#allocation22_spill] sm:$0xff] %v8453_v15  ;;  %v8459_v17 = vadd.f32 %v8429_v12, %v4809_v53  ;;  %v4345_v26 = vpop.f32.mrb[79].mxu1  ;;  %v4500_v18 = vsel %vm1610_vm1, %v4497_v14, %v4499_v42  ;;  %v4501_v14 = vrot.slane %v8453_v15, 1 }
 0x550   : > { %v8463_v44 = vsel %vm1931_vm2, %v4753_v3, %v4755_v58  ;;  %4566 = vrot.lane.b32.xlu1 %v4500_v18, %s6620_s27  ;;  %v4757_v41 = vrot.slane %v4345_v26, 2 }
 0x551   : > { %9166 = vst [vmem:[#allocation26_spill] sm:$0xff] %v8463_v44  ;;  %v5027_v16 = vcombine.low %v8456_v37, %v8459_v17  ;;  %v5028_v54 = vcombine.high %v8456_v37, %v8459_v17  ;;  %v4845_v37 = vadd.f32 %v8429_v12, %v8406_v5 }
 0x552   : > { %v4529_v32 = vpop.permute.xlu0 %4528 }
 0x553   : > { %v4618_v53 = vadd.f32 %v4529_v32, %v8262_v49  ;;  %v8482_v49 = vsub.s32 %v4895_v30, %v8470_v63 }
 0x554   : > { %v4531_v9 = vpop.permute.xlu1 %4530  ;;  %v8473_v0 = vpop.f32.mrb[80].mxu1 }
 0x555   : > { %v4810_v3 = vadd.f32 %v8275_v10, %v4618_v53  ;;  %v4619_v42 = vadd.f32 %v4531_v9, %v8269_v47  ;;  %v4502_v58 = vrot.slane %v8473_v0, 1  ;;  %v4351_v18 = vpop.f32.mrb[81].mxu1  ;;  %v4846_v53 = vadd.f32 %v8429_v12, %v8411_v52 }
 0x556   : > { %v4758_v27 = vrot.slane %v4351_v18, 2  ;;  %v4353_v17 = vpop.f32.mrb[82].mxu1 }
 0x557   : > { %v4849_v32 = vadd.f32 %v8429_v12, %v4810_v3  ;;  %v4811_v15 = vadd.f32 %v8280_v23, %v4619_v42  ;;  %v4504_v44 = vrot.slane %v4353_v17, 1  ;;  %v4355_v10 = vpop.f32.mrb[83].mxu1  ;;  %v4503_v47 = vsel %vm1610_vm1, %v4501_v14, %v4502_v58 }
 0x558   : > { %v8490_v9 = vsel %vm1931_vm2, %v4757_v41, %v4758_v27  ;;  %v4760_v5 = vrot.slane %v4355_v10, 2  ;;  %4568 = vrot.lane.b32.xlu0 %v4503_v47, %s6620_s27  ;;  %v8500_v14 = vrot.slane %v4891_v46, %v8482_v49 }
 0x559   : > { %v4907_v26 = vcombine.low %v4845_v37, %v4849_v32  ;;  %v4908_v30 = vcombine.high %v4845_v37, %v4849_v32  ;;  %v4850_v18 = vadd.f32 %v8429_v12, %v4811_v15  ;;  %v4505_v3 = vsel %vm1610_vm1, %v4502_v58, %v4504_v44 }
 0x55a   : > { %v8496_v23 = vsel %vm1931_vm2, %v4758_v27, %v4760_v5  ;;  %4570 = vrot.lane.b32.xlu1 %v4505_v3, %s6620_s27  ;;  %v8511_v44 = vrot.slane %v4892_v19, %v8482_v49  ;;  %v8525_v19 = vrot.slane %v5027_v16, %v8482_v49 }
 0x55b   : > { %v5043_v52 = vcombine.low %v4846_v53, %v4850_v18  ;;  %v5044_v42 = vcombine.high %v4846_v53, %v4850_v18  ;;  %v8503_v41 = vrot.slane %v4907_v26, %v8482_v49  ;;  %v8506_v17 = vrot.slane %v4908_v30, %v8482_v49 }
 0x55c   : > { %v4533_v37 = vpop.permute.xlu0 %4532  ;;  %v8508_v15 = vpop.f32.mrb[84].mxu1 }
 0x55d   : > { %9167 = vst [vmem:[#allocation27_spill] sm:$0xff] %v8508_v15  ;;  %v4620_v58 = vadd.f32 %v4533_v37, %v8283_v56  ;;  %v4361_v27 = vpop.f32.mrb[85].mxu1  ;;  %v8528_v56 = vrot.slane %v5043_v52, %v8482_v49  ;;  %v4506_v26 = vrot.slane %v8508_v15, 1  ;;  %v8539_v52 = vrot.slane %v5028_v54, %v8482_v49 }
 0x55e   : > { %v8518_v10 = vpop.f32.mrb[86].mxu1  ;;  %v4762_v3 = vrot.slane %v4361_v27, 2 }
 0x55f   : > { %9168 = vst [vmem:[#allocation32_spill] sm:$0xff] %v8518_v10  ;;  %v4812_v5 = vadd.f32 %v8291_v60, %v4620_v58  ;;  %v4507_v30 = vrot.slane %v8518_v10, 1  ;;  %v4365_v18 = vpop.f32.mrb[87].mxu1  ;;  %v8542_v60 = vrot.slane %v5044_v42, %v8482_v49 }
 0x560   : > { %v4763_v37 = vrot.slane %v4365_v18, 2 }
 0x561   : > { %v4508_v53 = vsel %vm1610_vm1, %v4506_v26, %v4507_v30 }
 0x562   : > { %v8545_v58 = vsel %vm1931_vm2, %v4762_v3, %v4763_v37  ;;  %v4535_v32 = vpop.permute.xlu1 %4534  ;;  %4572 = vrot.lane.b32.xlu0 %v4508_v53, %s6620_s27 }
 0x563   : > { %9169 = vst [vmem:[#allocation24_spill] sm:$0xff] %v8545_v58  ;;  %v4621_v27 = vadd.f32 %v4535_v32, %v8285_v6 }
 0x564   : > { %v4369_v16 = vpop.f32.mrb[88].mxu1 }
 0x565   : > { %v4813_v54 = vadd.f32 %v8298_v55, %v4621_v27  ;;  %v4509_v47 = vrot.slane %v4369_v16, 1  ;;  %v4371_v42 = vpop.f32.mrb[89].mxu1 }
 0x566   : > { %v4765_v46 = vrot.slane %v4371_v42, 2  ;;  %v8554_v10 = vpop.f32.mrb[90].mxu1 }
 0x567   : > { %9170 = vst [vmem:[#allocation28_spill] sm:$0xff] %v8554_v10  ;;  %v4375_v3 = vpop.f32.mrb[91].mxu1  ;;  %v4510_v58 = vsel %vm1610_vm1, %v4507_v30, %v4509_v47  ;;  %v4511_v55 = vrot.slane %v8554_v10, 1 }
 0x568   : > { %v8558_v53 = vsel %vm1931_vm2, %v4763_v37, %v4765_v46  ;;  %4574 = vrot.lane.b32.xlu1 %v4510_v58, %s6620_s27  ;;  %v4767_v30 = vrot.slane %v4375_v3, 2 }
 0x569   : > { %9171 = vst [vmem:[#allocation30_spill] sm:$0xff] %v8558_v53 }
 0x56a   : > { %v4537_v6 = vpop.permute.xlu0 %4536 }
 0x56b   : > { %v4622_v32 = vadd.f32 %v4537_v6, %v8294_v51 }
 0x56c   : > { %v4539_v18 = vpop.permute.xlu1 %4538  ;;  %v8562_v26 = vpop.f32.mrb[92].mxu1 }
 0x56d   : > { %v4814_v16 = vadd.f32 %v8307_v1, %v4622_v32  ;;  %v4623_v27 = vadd.f32 %v4539_v18, %v8301_v8  ;;  %v4512_v42 = vrot.slane %v8562_v26, 1  ;;  %v4381_v47 = vpop.f32.mrb[93].mxu1  ;;  %v4851_v32 = vadd.f32 %v8429_v12, %v4812_v5 }
 0x56e   : > { %v4768_v46 = vrot.slane %v4381_v47, 2  ;;  %v4383_v37 = vpop.f32.mrb[94].mxu1 }
 0x56f   : > { %v4815_v58 = vadd.f32 %v8312_v31, %v4623_v27  ;;  %v4514_v53 = vrot.slane %v4383_v37, 1  ;;  %v4385_v15 = vpop.f32.mrb[95].mxu1  ;;  %v4513_v51 = vsel %vm1610_vm1, %v4511_v55, %v4512_v42 }
 0x570   : > { %v8571_v6 = vsel %vm1931_vm2, %v4767_v30, %v4768_v46  ;;  %v4770_v10 = vrot.slane %v4385_v15, 2  ;;  %4576 = vrot.lane.b32.xlu0 %v4513_v51, %s6620_s27 }
 0x571   : > { %v4515_v8 = vsel %vm1610_vm1, %v4512_v42, %v4514_v53  ;;  %v6624_v53 = vmov 1934713408  }
 0x572   : > { %v8576_v1 = vsel %vm1931_vm2, %v4768_v46, %v4770_v10  ;;  %4578 = vrot.lane.b32.xlu1 %v4515_v8, %s6620_s27  ;;  %v4958_v42 = vunpack.c.l.s4 %v6624_v53  ;;  %v4852_v46 = vadd.f32 %v8429_v12, %v4813_v54 }
 0x574   : > { %v4541_v18 = vpop.permute.xlu0 %4540 }
 0x575   : > { %v4624_v31 = vadd.f32 %v4541_v18, %v8315_v50  ;;  %v4959_v50 = vunpack.c.0.s8 %v4958_v42  ;;  %v9174_v42 = vcombine.low %v8511_v44, %v8506_v17 }
 0x577   : > { %v4816_v3 = vadd.f32 %v8323_v57, %v4624_v31  ;;  %v8589_v31 = vsub.s32 %v4959_v50, %v8470_v63 }
 0x579   : > { %v4855_v55 = vadd.f32 %v8429_v12, %v4816_v3 }
 0x57a   : > { %v4543_v27 = vpop.permute.xlu1 %4542 }
 0x57b   : > { %v4923_v15 = vcombine.low %v4851_v32, %v4855_v55  ;;  %v4924_v47 = vcombine.high %v4851_v32, %v4855_v55  ;;  %v4625_v30 = vadd.f32 %v4543_v27, %v8317_v36  ;;  %v9172_v55 = vcombine.low %v8500_v14, %v8503_v41 }
 0x57d   : > { %v4817_v10 = vadd.f32 %v8330_v24, %v4625_v30  ;;  %v4853_v24 = vadd.f32 %v8429_v12, %v4814_v16  ;;  %v8600_v27 = vrot.slane %v9172_v55, %v8589_v31  ;;  %v4938_v53 = vrot.slane %v4924_v47, %v8482_v49 }
 0x57f   : > { %v4856_v37 = vadd.f32 %v8429_v12, %v4817_v10  ;;  %v8616_v10 = vrot.slane %v9174_v42, %v8589_v31 }
 0x581   : > { %v5059_v51 = vcombine.low %v4852_v46, %v4856_v37  ;;  %v5060_v57 = vcombine.high %v4852_v46, %v4856_v37 }
 0x582   : > { %v4545_v8 = vpop.permute.xlu0 %4544 }
 0x583   : > { %v4626_v5 = vadd.f32 %v4545_v8, %v8326_v22  ;;  %v9173_v22 = vcombine.high %v8500_v14, %v8503_v41  ;;  %v9175_v14 = vcombine.high %v8511_v44, %v8506_v17  ;;  %v5067_v47 = vrot.slane %v5059_v51, %v8482_v49 }
 0x584   : > { %v4547_v18 = vpop.permute.xlu1 %4546  ;;  %v9176_v8 = vcombine.low %v8525_v19, %v8528_v56  ;;  %v9177_v17 = vcombine.high %v8525_v19, %v8528_v56 }
 0x585   : > { %v4818_v36 = vadd.f32 %v8339_v48, %v4626_v5  ;;  %v4627_v3 = vadd.f32 %v4547_v18, %v8333_v21  ;;  %v8606_v63 = vrot.slane %v9173_v22, %v8589_v31  ;;  %v4854_v21 = vadd.f32 %v8429_v12, %v4815_v58 }
 0x586   : > { %v8622_v41 = vrot.slane %v9175_v14, %v8589_v31  ;;  %v8631_v5 = vrot.slane %v9176_v8, %v8589_v31  ;;  %v8637_v44 = vrot.slane %v9177_v17, %v8589_v31  ;;  %v9178_v18 = vcombine.low %v8539_v52, %v8542_v60 }
 0x587   : > { %v4857_v54 = vadd.f32 %v8429_v12, %v4818_v36  ;;  %v4819_v32 = vadd.f32 %v8344_v43, %v4627_v3  ;;  %v4931_v43 = vrot.slane %v4923_v15, %v8482_v49  ;;  %v5074_v22 = vrot.slane %v5060_v57, %v8482_v49 }
 0x588   : > { %v8643_v36 = vrot.slane %v9178_v18, %v8589_v31  ;;  %v9179_v14 = vcombine.high %v8539_v52, %v8542_v60 }
 0x589   : > { %v4939_v48 = vcombine.low %v4853_v24, %v4857_v54  ;;  %v4940_v16 = vcombine.high %v4853_v24, %v4857_v54  ;;  %v4858_v30 = vadd.f32 %v8429_v12, %v4819_v32 }
 0x58b   : > { %v5075_v58 = vcombine.low %v4854_v21, %v4858_v30  ;;  %v5076_v46 = vcombine.high %v4854_v21, %v4858_v30  ;;  %v4947_v37 = vrot.slane %v4939_v48, %v8482_v49  ;;  %v4954_v15 = vrot.slane %v4940_v16, %v8482_v49 }
 0x58c   : > { %v4549_v50 = vpop.permute.xlu0 %4548 }
 0x58d   : > { %v4628_v51 = vadd.f32 %v4549_v50, %v8347_v39  ;;  %v4987_v3 = vcombine.low %v4931_v43, %v4947_v37  ;;  %v4988_v24 = vcombine.high %v4931_v43, %v4947_v37  ;;  %v5003_v54 = vcombine.low %v4938_v53, %v4954_v15 }
 0x58e   : > { %v5004_v32 = vcombine.high %v4938_v53, %v4954_v15  ;;  %v5083_v55 = vrot.slane %v5075_v58, %v8482_v49  ;;  %v5090_v19 = vrot.slane %v5076_v46, %v8482_v49  ;;  %v8672_v58 = vrot.slane %v9179_v14, %v8589_v31 }
 0x58f   : > { %v4820_v56 = vadd.f32 %v8355_v29, %v4628_v51  ;;  %v8651_v21 = vrot.slane %v4987_v3, %v8589_v31  ;;  %v8654_v48 = vrot.slane %v4988_v24, %v8589_v31  ;;  %v8657_v39 = vrot.slane %v5003_v54, %v8589_v31 }
 0x590   : > { %v8660_v16 = vrot.slane %v5004_v32, %v8589_v31  ;;  %v5123_v30 = vcombine.low %v5067_v47, %v5083_v55  ;;  %v5124_v43 = vcombine.high %v5067_v47, %v5083_v55  ;;  %v5139_v53 = vcombine.low %v5074_v22, %v5090_v19 }
 0x591   : > { %v5020_v57 = vcombine.high %v8600_v27, %v8651_v21  ;;  %v5022_v29 = vcombine.high %v8606_v63, %v8654_v48  ;;  %v5024_v42 = vcombine.high %v8616_v10, %v8657_v39  ;;  %v5140_v52 = vcombine.high %v5074_v22, %v5090_v19 }
 0x592   : > { %v4551_v46 = vpop.permute.xlu1 %4550  ;;  %v5026_v37 = vcombine.high %v8622_v41, %v8660_v16  ;;  %v8677_v15 = vrot.slane %v5123_v30, %v8589_v31  ;;  %v8680_v50 = vrot.slane %v5124_v43, %v8589_v31  ;;  %v8683_v47 = vrot.slane %v5139_v53, %v8589_v31 }
 0x593   : > { %v4629_v8 = vadd.f32 %v4551_v46, %v8349_v45  ;;  %5437 = vrot.lane.b32.xlu0 %v5020_v57, %s6620_s27  ;;  %v5019_v60 = vcombine.low %v8600_v27, %v8651_v21  ;;  %v5021_v17 = vcombine.low %v8606_v63, %v8654_v48  ;;  %v5023_v45 = vcombine.low %v8616_v10, %v8657_v39  ;;  %v4877_v27 = vld [vmem:[%s6882_s9 + $0x10] sm:$0xff]  ;;  %v4878_v63 = vld [vmem:[%s6882_s9 + $0x18] sm:$0xff] }
 0x594   : > { %v5156_v18 = vcombine.high %v8631_v5, %v8677_v15  ;;  %v5158_v51 = vcombine.high %v8637_v44, %v8680_v50  ;;  %v5160_v3 = vcombine.high %v8643_v36, %v8683_v47  ;;  %v8701_v54 = vrot.slane %v5140_v52, %v8589_v31 }
 0x595   : > { %v4821_v24 = vadd.f32 %v8362_v11, %v4629_v8  ;;  %v5025_v32 = vcombine.low %v8622_v41, %v8660_v16  ;;  %v5155_v55 = vcombine.low %v8631_v5, %v8677_v15  ;;  %v5157_v22 = vcombine.low %v8637_v44, %v8680_v50 }
 0x596   : > { %v5159_v19 = vcombine.low %v8643_v36, %v8683_v47  ;;  %v5162_v11 = vcombine.high %v8672_v58, %v8701_v54  ;;  %v9187_v44 = vcombine.low %v8672_v58, %v8701_v54 }
 0x597   : > { %5445 = vrot.lane.b32.xlu0 %v5022_v29, %s6620_s27 }
 0x59a   : > { %v4553_v43 = vpop.permute.xlu0 %4552 }
 0x59b   : > { %v4630_v53 = vadd.f32 %v4553_v43, %v8358_v40  ;;  %5453 = vrot.lane.b32.xlu0 %v5024_v42, %s6620_s27  ;;  %v4859_v40 = vadd.f32 %v8429_v12, %v4820_v56 }
 0x59c   : > { %v4555_v57 = vpop.permute.xlu1 %4554 }
 0x59d   : > { %v4822_v14 = vadd.f32 %v8371_v62, %v4630_v53  ;;  %v4631_v46 = vadd.f32 %v4555_v57, %v8365_v7 }
 0x59f   : > { %v4823_v8 = vadd.f32 %v8376_v20, %v4631_v46  ;;  %5461 = vrot.lane.b32.xlu0 %v5026_v37, %s6620_s27 }
 0x5a1   : > { %v4862_v46 = vadd.f32 %v8429_v12, %v4823_v8 }
 0x5a3   : > { %5469 = vrot.lane.b32.xlu0 %v5156_v18, %s6620_s27  ;;  %v4860_v18 = vadd.f32 %v8429_v12, %v4821_v24 }
 0x5a4   : > { %v4557_v29 = vpop.permute.xlu0 %4556 }
 0x5a5   : > { %v4632_v52 = vadd.f32 %v4557_v29, %v8379_v34 }
 0x5a7   : > { %v4824_v30 = vadd.f32 %v8389_v35, %v4632_v52  ;;  %5477 = vrot.lane.b32.xlu0 %v5158_v51, %s6620_s27 }
 0x5a9   : > { %v4863_v42 = vadd.f32 %v8429_v12, %v4824_v30 }
 0x5aa   : > { %v4559_v62 = vpop.permute.xlu1 %4558 }
 0x5ab   : > { %v5163_v43 = vcombine.low %v4859_v40, %v4863_v42  ;;  %v5164_v7 = vcombine.high %v4859_v40, %v4863_v42  ;;  %v4633_v20 = vadd.f32 %v4559_v62, %v8382_v13  ;;  %5485 = vrot.lane.b32.xlu0 %v5160_v3, %s6620_s27  ;;  %v4861_v3 = vadd.f32 %v8429_v12, %v4822_v14 }
 0x5ad   : > { %v4825_v37 = vadd.f32 %v8398_v61, %v4633_v20  ;;  %v5171_v40 = vrot.slane %v5163_v43, %v8482_v49 }
 0x5af   : > { %v4864_v34 = vadd.f32 %v8429_v12, %v4825_v37  ;;  %5493 = vrot.lane.b32.xlu0 %v5162_v11, %s6620_s27 }
 0x5b1   : > { %v5299_v35 = vcombine.low %v4860_v18, %v4864_v34  ;;  %v5300_v51 = vcombine.high %v4860_v18, %v4864_v34 }
 0x5b2   : > { %v4561_v56 = vpop.permute.xlu0 %4560 }
 0x5b3   : > { %v4634_v30 = vadd.f32 %v4561_v56, %v8394_v33  ;;  %v5178_v33 = vrot.slane %v5164_v7, %v8482_v49  ;;  %v5307_v20 = vrot.slane %v5299_v35, %v8482_v49  ;;  %v5314_v43 = vrot.slane %v5300_v51, %v8482_v49 }
 0x5b4   : > { %v4563_v53 = vpop.permute.xlu1 %4562 }
 0x5b5   : > { %v4826_v57 = vadd.f32 %v8415_v38, %v4634_v30  ;;  %v4635_v13 = vadd.f32 %v4563_v53, %v8402_v2 }
 0x5b7   : > { %v4865_v61 = vadd.f32 %v8429_v12, %v4826_v57  ;;  %v4827_v24 = vadd.f32 %v8420_v59, %v4635_v13 }
 0x5b9   : > { %v5179_v29 = vcombine.low %v4861_v3, %v4865_v61  ;;  %v5180_v11 = vcombine.high %v4861_v3, %v4865_v61  ;;  %v4866_v52 = vadd.f32 %v8429_v12, %v4827_v24 }
 0x5bb   : > { %v5315_v42 = vcombine.low %v4862_v46, %v4866_v52  ;;  %v5316_v38 = vcombine.high %v4862_v46, %v4866_v52  ;;  %v5187_v2 = vrot.slane %v5179_v29, %v8482_v49  ;;  %v5194_v14 = vrot.slane %v5180_v11, %v8482_v49  ;;  %v9181_v29 = vld [vmem:[#allocation22_spill] sm:$0xff] }
 0x5bc   : > { %v4565_v62 = vpop.permute.xlu0 %4564 }
 0x5bd   : > { %v4636_v59 = vadd.f32 %v4565_v62, %v8423_v4  ;;  %v5227_v8 = vcombine.low %v5171_v40, %v5187_v2  ;;  %v5228_v37 = vcombine.high %v5171_v40, %v5187_v2  ;;  %v5243_v18 = vcombine.low %v5178_v33, %v5194_v14  ;;  %v9180_v4 = vld [vmem:[#allocation26_spill] sm:$0xff]  ;;  %v9183_v2 = vld [vmem:[#allocation24_spill] sm:$0xff] }
 0x5be   : > { %v5244_v34 = vcombine.high %v5178_v33, %v5194_v14  ;;  %v5323_v56 = vrot.slane %v5315_v42, %v8482_v49  ;;  %v5330_v7 = vrot.slane %v5316_v38, %v8482_v49  ;;  %v9182_v42 = vld [vmem:[#allocation27_spill] sm:$0xff] }
 0x5bf   : > { %v4828_v30 = vadd.f32 %v8444_v28, %v4636_v59 }
 0x5c0   : > { %v5363_v53 = vcombine.low %v5307_v20, %v5323_v56  ;;  %v5364_v57 = vcombine.high %v5307_v20, %v5323_v56  ;;  %v5379_v13 = vcombine.low %v5314_v43, %v5330_v7  ;;  %v5380_v3 = vcombine.high %v5314_v43, %v5330_v7  ;;  %v9184_v43 = vld [vmem:[#allocation32_spill] sm:$0xff] }
 0x5c1   : > { %v4867_v62 = vadd.f32 %v8429_v12, %v4828_v30 }
 0x5c2   : > { %v4567_v61 = vpop.permute.xlu1 %4566 }
 0x5c3   : > { %v4637_v35 = vadd.f32 %v4567_v61, %v8431_v25  ;;  %v9185_v61 = vld [vmem:[#allocation30_spill] sm:$0xff] }
 0x5c5   : > { %v4829_v24 = vadd.f32 %v9180_v4, %v4637_v35 }
 0x5ca   : > { %v4569_v46 = vpop.permute.xlu0 %4568 }
 0x5cb   : > { %v4638_v11 = vadd.f32 %v4569_v46, %v9181_v29  ;;  %v9186_v29 = vld [vmem:[#allocation28_spill] sm:$0xff] }
 0x5cc   : > { %v4571_v52 = vpop.permute.xlu1 %4570 }
 0x5cd   : > { %v4830_v40 = vadd.f32 %v8490_v9, %v4638_v11  ;;  %v4639_v51 = vadd.f32 %v4571_v52, %v8473_v0  ;;  %v4868_v0 = vadd.f32 %v8429_v12, %v4829_v24  ;;  %v8773_v24 = vrot.slane %v5227_v8, %v8589_v31 }
 0x5cf   : > { %v4831_v33 = vadd.f32 %v8496_v23, %v4639_v51 }
 0x5d4   : > { %v4573_v28 = vpop.permute.xlu0 %4572 }
 0x5d5   : > { %v4640_v38 = vadd.f32 %v4573_v28, %v9182_v42  ;;  %v4869_v28 = vadd.f32 %v8429_v12, %v4830_v40 }
 0x5d7   : > { %v4832_v14 = vadd.f32 %v9183_v2, %v4640_v38  ;;  %v8776_v2 = vrot.slane %v5228_v37, %v8589_v31 }
 0x5d9   : > { %v4871_v25 = vadd.f32 %v8429_v12, %v4832_v14  ;;  %v4870_v14 = vadd.f32 %v8429_v12, %v4831_v33 }
 0x5da   : > { %v4575_v20 = vpop.permute.xlu1 %4574 }
 0x5db   : > { %v5195_v59 = vcombine.low %v4867_v62, %v4871_v25  ;;  %v5196_v56 = vcombine.high %v4867_v62, %v4871_v25  ;;  %v4641_v7 = vadd.f32 %v4575_v20, %v9184_v43  ;;  %v8783_v20 = vrot.slane %v5243_v18, %v8589_v31 }
 0x5dc   : > { %v8800_v18 = vrot.slane %v5380_v3, %v8589_v31 }
 0x5dd   : > { %v4833_v9 = vadd.f32 %v9185_v61, %v4641_v7  ;;  %v5210_v40 = vrot.slane %v5196_v56, %v8482_v49  ;;  %v8791_v7 = vrot.slane %v5363_v53, %v8589_v31 }
 0x5df   : > { %v4872_v23 = vadd.f32 %v8429_v12, %v4833_v9 }
 0x5e1   : > { %v5331_v35 = vcombine.low %v4868_v0, %v4872_v23  ;;  %v5332_v4 = vcombine.high %v4868_v0, %v4872_v23 }
 0x5e2   : > { %v4577_v46 = vpop.permute.xlu0 %4576 }
 0x5e3   : > { %v4642_v11 = vadd.f32 %v4577_v46, %v9186_v29  ;;  %v5339_v0 = vrot.slane %v5331_v35, %v8482_v49  ;;  %v5346_v53 = vrot.slane %v5332_v4, %v8482_v49 }
 0x5e4   : > { %v4579_v52 = vpop.permute.xlu1 %4578 }
 0x5e5   : > { %v4834_v30 = vadd.f32 %v8571_v6, %v4642_v11  ;;  %v4643_v51 = vadd.f32 %v4579_v52, %v8562_v26  ;;  %v5203_v26 = vrot.slane %v5195_v59, %v8482_v49  ;;  %v8797_v59 = vrot.slane %v5379_v13, %v8589_v31 }
 0x5e7   : > { %v4873_v42 = vadd.f32 %v8429_v12, %v4834_v30  ;;  %v4835_v38 = vadd.f32 %v8576_v1, %v4643_v51  ;;  %v8786_v1 = vrot.slane %v5244_v34, %v8589_v31 }
 0x5e9   : > { %v5211_v62 = vcombine.low %v4869_v28, %v4873_v42  ;;  %v5212_v25 = vcombine.high %v4869_v28, %v4873_v42  ;;  %v4874_v6 = vadd.f32 %v8429_v12, %v4835_v38  ;;  %v8794_v12 = vrot.slane %v5364_v57, %v8589_v31 }
 0x5eb   : > { %v5347_v8 = vcombine.low %v4870_v14, %v4874_v6  ;;  %v5348_v43 = vcombine.high %v4870_v14, %v4874_v6  ;;  %v5219_v37 = vrot.slane %v5211_v62, %v8482_v49  ;;  %v5226_v33 = vrot.slane %v5212_v25, %v8482_v49 }
 0x5ed   : > { %v5259_v34 = vcombine.low %v5203_v26, %v5219_v37  ;;  %v5260_v56 = vcombine.high %v5203_v26, %v5219_v37  ;;  %v5275_v61 = vcombine.low %v5210_v40, %v5226_v33  ;;  %v5276_v9 = vcombine.high %v5210_v40, %v5226_v33 }
 0x5ee   : > { %v5355_v23 = vrot.slane %v5347_v8, %v8482_v49  ;;  %v5362_v46 = vrot.slane %v5348_v43, %v8482_v49 }
 0x5ef   : > { %v8807_v57 = vrot.slane %v5259_v34, %v8589_v31  ;;  %v8810_v13 = vrot.slane %v5260_v56, %v8589_v31  ;;  %v8813_v3 = vrot.slane %v5275_v61, %v8589_v31  ;;  %v8816_v29 = vrot.slane %v5276_v9, %v8589_v31  ;;  %v4875_v61 = vld [vmem:[%s6882_s9] sm:$0xff] }
 0x5f0   : > { %v5395_v11 = vcombine.low %v5339_v0, %v5355_v23  ;;  %v5396_v35 = vcombine.high %v5339_v0, %v5355_v23  ;;  %v5411_v52 = vcombine.low %v5346_v53, %v5362_v46  ;;  %v5412_v30 = vcombine.high %v5346_v53, %v5362_v46  ;;  %v4876_v53 = vld [vmem:[%s6882_s9 + $0x8] sm:$0xff] }
 0x5f1   : > { %v5292_v4 = vcombine.high %v8773_v24, %v8807_v57  ;;  %v5294_v49 = vcombine.high %v8776_v2, %v8810_v13  ;;  %v5296_v51 = vcombine.high %v8783_v20, %v8813_v3  ;;  %v5298_v28 = vcombine.high %v8786_v1, %v8816_v29 }
 0x5f2   : > { %v8827_v42 = vrot.slane %v5395_v11, %v8589_v31  ;;  %v8830_v38 = vrot.slane %v5396_v35, %v8589_v31  ;;  %v8833_v14 = vrot.slane %v5411_v52, %v8589_v31  ;;  %v8836_v62 = vrot.slane %v5412_v30, %v8589_v31  ;;  %v4879_v30 = vld [vmem:[%s6882_s9 + $0x20] sm:$0xff] }
 0x5f3   : > { %5439 = vrot.lane.b32.xlu1 %v5292_v4, %s6620_s27  ;;  %v5291_v25 = vcombine.low %v8773_v24, %v8807_v57  ;;  %v5293_v6 = vcombine.low %v8776_v2, %v8810_v13  ;;  %v5295_v26 = vcombine.low %v8783_v20, %v8813_v3  ;;  %v5297_v40 = vcombine.low %v8786_v1, %v8816_v29  ;;  %v4880_v4 = vld [vmem:[%s6882_s9 + $0x28] sm:$0xff] }
 0x5f4   : > { %v5428_v8 = vcombine.high %v8791_v7, %v8827_v42  ;;  %v5430_v31 = vcombine.high %v8794_v12, %v8830_v38  ;;  %v5432_v24 = vcombine.high %v8797_v59, %v8833_v14  ;;  %v5434_v43 = vcombine.high %v8800_v18, %v8836_v62 }
 0x5f5   : > { %v5427_v37 = vcombine.low %v8791_v7, %v8827_v42  ;;  %v5429_v33 = vcombine.low %v8794_v12, %v8830_v38  ;;  %v5431_v34 = vcombine.low %v8797_v59, %v8833_v14  ;;  %v5433_v56 = vcombine.low %v8800_v18, %v8836_v62 }
 0x5f7   : > { %5447 = vrot.lane.b32.xlu1 %v5294_v49, %s6620_s27 }
 0x5fb   : > { %5455 = vrot.lane.b32.xlu1 %v5296_v51, %s6620_s27 }
 0x5ff   : > { %5463 = vrot.lane.b32.xlu1 %v5298_v28, %s6620_s27 }
 0x603   : > { %5471 = vrot.lane.b32.xlu1 %v5428_v8, %s6620_s27  ;;  %v4883_v8 = vld [vmem:[%s6882_s9 + $0x40] sm:$0xff] }
 0x605   : > { %v5438_v9 = vpop.permute.xlu0 %5437 }
 0x606   : > { %v5499_v0 = vsel %vm690_vm0, %v5019_v60, %v5438_v9 }
 0x607   : > { %v5515_v23 = vadd.f32 %v5499_v0, %v4875_v61  ;;  %5479 = vrot.lane.b32.xlu1 %v5430_v31, %s6620_s27  ;;  %v4886_v0 = vld [vmem:[%s6882_s9 + $0x58] sm:$0xff] }
 0x609   : > { %5531 = vst [vmem:[%s8115_s21] sm:$0xff] %v5515_v23  ;;  %v5446_v46 = vpop.permute.xlu0 %5445 }
 0x60a   : > { %v5501_v57 = vsel %vm690_vm0, %v5021_v17, %v5446_v46 }
 0x60b   : > { %v5516_v11 = vadd.f32 %v5501_v57, %v4876_v53  ;;  %5487 = vrot.lane.b32.xlu1 %v5432_v24, %s6620_s27  ;;  %v4888_v53 = vld [vmem:[%s6882_s9 + $0x68] sm:$0xff] }
 0x60d   : > { %5532 = vst [vmem:[%s8115_s21 + $0x8] sm:$0xff] %v5516_v11  ;;  %v5454_v21 = vpop.permute.xlu0 %5453 }
 0x60e   : > { %v5503_v60 = vsel %vm690_vm0, %v5023_v45, %v5454_v21 }
 0x60f   : > { %v5517_v35 = vadd.f32 %v5503_v60, %v4877_v27  ;;  %5495 = vrot.lane.b32.xlu1 %v5434_v43, %s6620_s27  ;;  %v4885_v43 = vld [vmem:[%s6882_s9 + $0x50] sm:$0xff] }
 0x611   : > { %5533 = vst [vmem:[%s8115_s21 + $0x10] sm:$0xff] %v5517_v35  ;;  %v5462_v48 = vpop.permute.xlu0 %5461 }
 0x612   : > { %v5505_v17 = vsel %vm690_vm0, %v5025_v32, %v5462_v48  ;;  %v4881_v32 = vld [vmem:[%s6882_s9 + $0x30] sm:$0xff] }
 0x613   : > { %v5518_v52 = vadd.f32 %v5505_v17, %v4878_v63 }
 0x615   : > { %5534 = vst [vmem:[%s8115_s21 + $0x18] sm:$0xff] %v5518_v52  ;;  %v5470_v10 = vpop.permute.xlu0 %5469 }
 0x616   : > { %v5507_v39 = vsel %vm690_vm0, %v5155_v55, %v5470_v10  ;;  %v4882_v55 = vld [vmem:[%s6882_s9 + $0x38] sm:$0xff] }
 0x617   : > { %v5519_v45 = vadd.f32 %v5507_v39, %v4879_v30 }
 0x619   : > { %5535 = vst [vmem:[%s8115_s21 + $0x20] sm:$0xff] %v5519_v45  ;;  %v5478_v49 = vpop.permute.xlu0 %5477 }
 0x61a   : > { %v5509_v41 = vsel %vm690_vm0, %v5157_v22, %v5478_v49 }
 0x61b   : > { %v5520_v16 = vadd.f32 %v5509_v41, %v4880_v4 }
 0x61d   : > { %5536 = vst [vmem:[%s8115_s21 + $0x28] sm:$0xff] %v5520_v16  ;;  %v5486_v51 = vpop.permute.xlu0 %5485 }
 0x61e   : > { %v5511_v5 = vsel %vm690_vm0, %v5159_v19, %v5486_v51  ;;  %v4884_v19 = vld [vmem:[%s6882_s9 + $0x48] sm:$0xff] }
 0x61f   : > { %v5521_v15 = vadd.f32 %v5511_v5, %v4881_v32 }
 0x621   : > { %5537 = vst [vmem:[%s8115_s21 + $0x30] sm:$0xff] %v5521_v15  ;;  %v5494_v28 = vpop.permute.xlu0 %5493 }
 0x622   : > { %v5513_v50 = vsel %vm690_vm0, %v9187_v44, %v5494_v28 }
 0x623   : > { %v5522_v22 = vadd.f32 %v5513_v50, %v4882_v55 }
 0x625   : > { %5538 = vst [vmem:[%s8115_s21 + $0x38] sm:$0xff] %v5522_v22 }
 0x665   : > { %v5440_v31 = vpop.permute.xlu1 %5439 }
 0x666   : > { %v5500_v36 = vsel %vm690_vm0, %v5291_v25, %v5440_v31 }
 0x667   : > { %v5523_v47 = vadd.f32 %v5500_v36, %v4883_v8 }
 0x669   : > { %5539 = vst [vmem:[%s8115_s21 + $0x40] sm:$0xff] %v5523_v47  ;;  %v5448_v24 = vpop.permute.xlu1 %5447 }
 0x66a   : > { %v5502_v58 = vsel %vm690_vm0, %v5293_v6, %v5448_v24  ;;  %v4887_v6 = vld [vmem:[%s6882_s9 + $0x60] sm:$0xff] }
 0x66b   : > { %v5524_v54 = vadd.f32 %v5502_v58, %v4884_v19 }
 0x66d   : > { %5540 = vst [vmem:[%s8115_s21 + $0x48] sm:$0xff] %v5524_v54  ;;  %v5456_v61 = vpop.permute.xlu1 %5455 }
 0x66e   : > { %v5504_v25 = vsel %vm690_vm0, %v5295_v26, %v5456_v61 }
 0x66f   : > { %v5525_v9 = vadd.f32 %v5504_v25, %v4885_v43 }
 0x671   : > { %5541 = vst [vmem:[%s8115_s21 + $0x50] sm:$0xff] %v5525_v9  ;;  %v5464_v23 = vpop.permute.xlu1 %5463 }
 0x672   : > { %v5506_v2 = vsel %vm690_vm0, %v5297_v40, %v5464_v23  ;;  %v4889_v40 = vld [vmem:[%s6882_s9 + $0x70] sm:$0xff] }
 0x673   : > { %v5526_v13 = vadd.f32 %v5506_v2, %v4886_v0 }
 0x675   : > { %5542 = vst [vmem:[%s8115_s21 + $0x58] sm:$0xff] %v5526_v13  ;;  %v5472_v20 = vpop.permute.xlu1 %5471 }
 0x676   : > { %v5508_v3 = vsel %vm690_vm0, %v5427_v37, %v5472_v20  ;;  %v4890_v37 = vld [vmem:[%s6882_s9 + $0x78] sm:$0xff]  ;;  %s6514_s9 = scalar_lea.vmem %s8969_s16, 2048 }
 0x677   : > { %v5527_v26 = vadd.f32 %v5508_v3, %v4887_v6  ;;  %p6515_p2 = scmp.ne.s32.totalorder %s8969_s16, %s6514_s9  ;;  %p6522_p8 = scmp.lt.s32.totalorder %s6520_s7, %s6514_s9 }
 0x679   : > { %5543 = vst [vmem:[%s8115_s21 + $0x60] sm:$0xff] %v5527_v26  ;;  %v5480_v46 = vpop.permute.xlu1 %5479  ;;  %p6516_p9 = pnand %p6515_p2, %p9190_p7  ;;  %p6523_p11 = por %p6522_p8, %p6521_p3 }
 0x67a   : > { %v5510_v1 = vsel %vm690_vm0, %v5429_v33, %v5480_v46 }
 0x67b   : > { %v5528_v29 = vadd.f32 %v5510_v1, %v4888_v53  ;;  %p6517_p0 = pneg %p6516_p9 }
 0x67d   : > { %5544 = vst [vmem:[%s8115_s21 + $0x68] sm:$0xff] %v5528_v29  ;;  %v5488_v57 = vpop.permute.xlu1 %5487  ;;  %p6524_p4 = pnand %p6523_p11, %p6517_p0 }
 0x67e   : > { %v5512_v7 = vsel %vm690_vm0, %v5431_v34, %v5488_v57 }
 0x67f   : > { %v5529_v42 = vadd.f32 %v5512_v7, %v4889_v40 }
 0x681   : > { %5545 = vst [vmem:[%s8115_s21 + $0x70] sm:$0xff] %v5529_v42  ;;  %v5496_v12 = vpop.permute.xlu1 %5495 }
 0x682   : > { %v5514_v38 = vsel %vm690_vm0, %v5433_v56, %v5496_v12 }
 0x683   : > { %v5530_v59 = vadd.f32 %v5514_v38, %v4890_v37 }
 0x685   : > { %5546 = vst [vmem:[%s8115_s21 + $0x78] sm:$0xff] %v5530_v59 }
 0x686   : > { %6527 = shalt.err (!%p6524_p4)
}
 0x687   : > { %s6528_s12 = scalar_lea.hbm %s8967_s14, 2048  ;;  %s6532_s6 = scalar_lea.hbm %s9189_s13, 4096 }
 0x688   : > { %p6529_p13 = scmp.ne.s32.totalorder %s8967_s14, %s6528_s12  ;;  %p6533_p5 = scmp.lt.u32.totalorder %s8967_s14, %s9189_s13 }
 0x689   : > { %p6534_p10 = scmp.lt.u32.totalorder %s6532_s6, %s6528_s12  ;;  %p6536_p2 = scmp.lt.u32.totalorder %s6528_s12, %s8967_s14 }
 0x68a   : > { %p6530_p1 = pnand %p6529_p13, %p9190_p7 }
 0x68b   : > { %p6535_p12 = por %p6534_p10, %p6533_p5 }
 0x68c   : > { %p6531_p6 = pneg %p6530_p1 }
 0x68d   : > { %p6537_p9 = por %p6536_p2, %p6535_p12 }
 0x68f   : > { %p6538_p0 = pnand %p6537_p9, %p6531_p6 }
 0x691   : > { %6541 = shalt.err (!%p6538_p0)
}
 0x692   : > { %s6626_s19 = smov 1024   ;;  %s6627_s20 = smov 2048  }
 0x693   : > { %6083 = dma.vmem_to_hbm [thread:$0]  (%p9190_p7), %s8969_s16, 2048, %s8967_s14, %s8974_s24, %s6626_s19, %s6627_s20, %s6620_s27  }
 0x694 PF: > { %s9191_s2 = sld [smem:[#allocation17_spill]]  ;;  %s9192_s8 = sld [smem:[#allocation19_spill]] }
 0x695   : > { %p9194_p8 = scmp.ge.s32.totalorder %s6608_s26, 2 }
 0x69a   : > { %s5579_s9 = sand.u32 1, %s9191_s2   ;;  %p9193_p3 = scmp.ne.s32.totalorder %s9192_s8, 0 }
 0x69b   : > { %s5580_s10 = scalar_lea.sflag [#allocation5], %s5579_s9 }
 0x69c   : > { %p6100_p11 = pnand %p9194_p8, %p9193_p3 }
 0x69e   : > { %6583 = dma.done.wait (!%p6100_p11), %s5580_s10, 2048  }
 0x69f   : > { %6585 = vsyncadd (!%p6100_p11), %s5580_s10, 4294965248  ;;  %s24_s26 = sadd.s32 1, %s6608_s26   ;;  %s9195_s21 = smov %s6592_s22 }
 0x6a0   : > { %p21_p4 = scmp.ge.s32.totalorder %s24_s26, 4   ;;  %s9196_s22 = smov %s6596_s23 }
 0x6a1   : > { %s9197_s23 = smov %s6836_s17  ;;  %s9198_s24 = smov %s6604_s25 }
 0x6a2   : > { %s9199_s25 = smov %s9201_s28  ;;  %23 = sbr.rel (!%p21_p4) target bundleno = 11 (0xb), region = 115 }
 0x6a9   :  { %5585 = vsyncpa [#allocation4], 1 }
 0x6aa   :  { %5587 = vsyncpa [#allocation4 + $0x1], 1 }
 0x6ab   :  { %5588 = vsyncpa [#allocation7], 1 }
 0x6ac   :  { %5590 = vsyncpa [#allocation7 + $0x1], 1 }
 0x6ad   :  { %5591 = vsyncpa [#allocation10], 1 }
 0x6ae   :  { %5592 = vsyncpa [#allocation5], 1 }
 0x6af   :  { %5594 = vsyncpa [#allocation5 + $0x1], 1 }

</bundles_post_ra>
